<compile_context>
chip_gen: v6e
topology: v6e:2x2x1
jax: 0.10.0
libtpu: 0.0.40
codegen_flags: <defaults>
</compile_context>

<pallas_src>
import functools

import jax
import jax.numpy as jnp
from jax.experimental import pallas as pl
from jax.experimental.pallas import tpu as pltpu


# -----------------------------------------------------------------------------
# Kernel 1: encoder (fused K=27 conv matmul + ReLU + masked-mean-pool matmul,
#           chunked over conv rows) + projection MLP (+ optional L2 normalize).
#           TB images per grid step; weights resident; pooled features accumulate
#           in VMEM scratch across the row-chunk ("arbitrary") grid axis.
# -----------------------------------------------------------------------------
def _encoder_proj_kernel(xcol_ref, pool_ref, wc_ref, bc_ref, w1_ref, b1_ref,
                         w2_ref, b2_ref, out_ref, feat_acc, *, normalize):
    j = pl.program_id(1)
    tb = xcol_ref.shape[0]

    @pl.when(j == 0)
    def _init():
        feat_acc[...] = jnp.zeros_like(feat_acc)

    pool = pool_ref[...]                      # (1, RC) f32: border mask * 1/(H*W)
    wc = wc_ref[...]                          # (9*Cin, Cvp) bf16
    bc = bc_ref[...]                          # (1, Cvp) f32

    # Static unroll over the TB images of this group: one K=27 conv matmul per image
    # (M = RC rows), f32 bias+ReLU epilogue, then the masked mean-pool as a matmul.
    for t in range(tb):
        acc = jnp.dot(xcol_ref[t], wc, preferred_element_type=jnp.float32)  # (RC, Cvp)
        acc = jnp.maximum(acc + bc, 0.0)
        pooled = jnp.dot(pool, acc, preferred_element_type=jnp.float32)     # (1, Cvp)
        feat_acc[pl.ds(t, 1), :] += pooled

    @pl.when(j == pl.num_programs(1) - 1)
    def _finalize():
        feat = feat_acc[...]                                                 # (TB, Cvp)
        z1 = jnp.dot(feat.astype(jnp.bfloat16), w1_ref[...],
                     preferred_element_type=jnp.float32) + b1_ref[...]
        z1 = jnp.maximum(z1, 0.0)
        z2 = jnp.dot(z1.astype(jnp.bfloat16), w2_ref[...],
                     preferred_element_type=jnp.float32) + b2_ref[...]
        if normalize:                          # training: normalize once at the source
            ss = jnp.sum(z2 * z2, axis=-1, keepdims=True)
            z2 = z2 * jax.lax.rsqrt(jnp.maximum(ss, 1e-24))
        out_ref[...] = z2.astype(out_ref.dtype)


# -----------------------------------------------------------------------------
# Kernel 2: NT-Xent loss. Keys resident (already L2-normalized, bf16); the query
#           block is sliced out of the resident keys; per-block partial losses are
#           written to independent output blocks ("parallel" -> both v7x cores).
# -----------------------------------------------------------------------------
def _ntxent_kernel(k_ref, p_ref, out_ref, *, tau, n_total, tq):
    i = pl.program_id(0)
    start = pl.multiple_of(i * tq, tq)
    q = k_ref[pl.ds(start, tq), :]            # (TQ, D) bf16 normalized queries
    k = k_ref[...]                            # (N, D)  bf16 normalized keys (resident)
    p = p_ref[...]                            # (TQ, D) bf16 partner rows ((r+B) mod N)

    inv_tau = jnp.float32(1.0 / tau)

    # sim = q @ k.T without materializing a transpose (contract last axes), bf16 MXU
    # inputs with f32 accumulation.
    sim = jax.lax.dot_general(q, k, (((1,), (1,)), ((), ())),
                              preferred_element_type=jnp.float32) * inv_tau   # (TQ, N)

    # Mask self-similarity: global query row = i*TQ + local row.
    row = jax.lax.broadcasted_iota(jnp.int32, (tq, n_total), 0) + i * tq
    col = jax.lax.broadcasted_iota(jnp.int32, (tq, n_total), 1)
    sim = jnp.where(col == row, jnp.float32(-1e30), sim)

    # Positive logits via a direct row-wise dot against the partner rows.
    pos = jnp.sum(q.astype(jnp.float32) * p.astype(jnp.float32),
                  axis=-1, keepdims=True) * inv_tau                           # (TQ, 1)

    m = jnp.max(sim, axis=-1, keepdims=True)
    lse = jnp.log(jnp.sum(jnp.exp(sim - m), axis=-1, keepdims=True)) + m

    block = jnp.sum(lse - pos) * jnp.float32(1.0 / n_total)
    out_ref[...] = jnp.broadcast_to(block, out_ref.shape).astype(jnp.float32)


# -----------------------------------------------------------------------------
# Glue
# -----------------------------------------------------------------------------
def _round_up(x, m):
    return ((x + m - 1) // m) * m


def _cdiv(a, b):
    return -(-a // b)


def _pad_to(a, shape):
    return jnp.pad(a, [(0, t - s) for s, t in zip(a.shape, shape)])


def _pick_tq(n):
    for t in (256, 128, 64, 32, 16, 8):       # cap at 256 (v7x VMEM headroom)
        if n % t == 0:
            return t
    return n


def init_params(key, c_in=3, vis_dim=32, proj_dim=32):
    """PyTorch-layout parameters (Conv2d weight (Cout,Cin,3,3) + 2-layer MLP)."""
    k1, k2, k3 = jax.random.split(key, 3)
    return dict(
        conv_w=jax.random.normal(k1, (vis_dim, c_in, 3, 3), jnp.float32)
        / jnp.sqrt(9.0 * c_in),
        conv_b=jnp.zeros((vis_dim,), jnp.float32),
        w1=jax.random.normal(k2, (vis_dim, proj_dim), jnp.float32) / jnp.sqrt(1.0 * vis_dim),
        b1=jnp.zeros((proj_dim,), jnp.float32),
        w2=jax.random.normal(k3, (proj_dim, proj_dim), jnp.float32) / jnp.sqrt(1.0 * proj_dim),
        b2=jnp.zeros((proj_dim,), jnp.float32),
    )


def simclr_forward(images, params, tau=0.5, from_training=True):
    """images: (B, 6, H, W) float32 = two 3-channel views stacked on channels
    (training), or (N, 3, H, W) when from_training=False."""
    if from_training:
        v1, v2 = jnp.split(images, [3], axis=1)
        x = jnp.concatenate([v1, v2], axis=0)                  # (2B, 3, H, W)
    else:
        x = images
    n, c_in, h, w = x.shape

    vis_dim = params['conv_w'].shape[0]
    proj_dim = params['w2'].shape[1]
    cvp = _round_up(vis_dim, 128)        # lane-dense channel dims (zero-padding exact)
    pjp = _round_up(proj_dim, 128)
    kc = 9 * c_in                        # fused conv contraction dim
    wp = w + 2
    nrows = (h - 1) * wp + w             # flat rows covering all valid output pixels

    # Row chunking for bounded VMEM (v7x safe at any image size).
    nchunks = _cdiv(nrows, 512)
    rc = _round_up(nrows, 8) if nchunks == 1 else _round_up(_cdiv(nrows, nchunks), 128)
    nrows_pad = rc * nchunks

    tb = 8                               # images per encoder grid step
    n_pad = _round_up(n, tb)

    # ---- host-side im2col: 9 shifted slices of the flattened padded plane ----------
    xp = jnp.pad(jnp.transpose(x, (0, 2, 3, 1)),
                 ((0, 0), (1, 1), (1, 1), (0, 0)))             # (N, H+2, W+2, C)
    xf = xp.reshape(n, (h + 2) * wp, c_in)
    taps = [xf[:, di * wp + dj: di * wp + dj + nrows, :]
            for di in range(3) for dj in range(3)]
    xcol = jnp.concatenate(taps, axis=-1)                      # (N, L, 9*Cin)
    xcol = jnp.pad(xcol, ((0, n_pad - n), (0, nrows_pad - nrows), (0, 0))
                   ).astype(jnp.bfloat16)

    # Masked mean-pool vector: zeros on rows straddling the spatial padding & row pad.
    r = jnp.arange(nrows_pad)
    valid = (r < nrows) & ((r % wp) < w)
    pool_vec = (valid.astype(jnp.float32) / float(h * w))[None, :]   # (1, L_pad)

    # Conv weight (Cout,Cin,3,3) -> (di,dj,c)-major (9*Cin, Cv_pad); MLP weights padded.
    wc = jnp.transpose(params['conv_w'], (2, 3, 1, 0)).reshape(kc, vis_dim)
    wc = _pad_to(wc, (kc, cvp)).astype(jnp.bfloat16)
    bc = _pad_to(params['conv_b'][None, :], (1, cvp)).astype(jnp.float32)
    w1 = _pad_to(params['w1'], (cvp, pjp)).astype(jnp.bfloat16)
    b1 = _pad_to(params['b1'][None, :], (1, pjp)).astype(jnp.float32)
    w2 = _pad_to(params['w2'], (pjp, pjp)).astype(jnp.bfloat16)
    b2 = _pad_to(params['b2'][None, :], (1, pjp)).astype(jnp.float32)

    # ---- encoder + projection: grid over (image groups, row chunks) ----------------
    enc = pl.pallas_call(
        functools.partial(_encoder_proj_kernel, normalize=from_training),
        out_shape=jax.ShapeDtypeStruct((n_pad, pjp), jnp.float32),
        grid=(n_pad // tb, nchunks),
        in_specs=[
            pl.BlockSpec((tb, rc, kc), lambda i, j: (i, j, 0)),
            pl.BlockSpec((1, rc), lambda i, j: (0, j)),
            pl.BlockSpec((kc, cvp), lambda i, j: (0, 0)),
            pl.BlockSpec((1, cvp), lambda i, j: (0, 0)),
            pl.BlockSpec((cvp, pjp), lambda i, j: (0, 0)),
            pl.BlockSpec((1, pjp), lambda i, j: (0, 0)),
            pl.BlockSpec((pjp, pjp), lambda i, j: (0, 0)),
            pl.BlockSpec((1, pjp), lambda i, j: (0, 0)),
        ],
        out_specs=pl.BlockSpec((tb, pjp), lambda i, j: (i, 0)),
        scratch_shapes=[pltpu.VMEM((tb, cvp), jnp.float32)],
        compiler_params=pltpu.CompilerParams(
            dimension_semantics=("parallel", "arbitrary")),
    )(xcol, pool_vec, wc, bc, w1, b1, w2, b2)

    vis = enc[:n]                                              # drop batch padding

    if not from_training:
        return {'loss': jnp.float32(0.0), 'visual': vis[:, :proj_dim]}

    # ---- NT-Xent: per-query-block partial sums under "parallel" semantics ----------
    batch = n // 2
    vis_b16 = vis.astype(jnp.bfloat16)                         # already L2-normalized
    partner = jnp.roll(vis_b16, -batch, axis=0)                # partner[r] = vis[(r+B)%N]

    tq = _pick_tq(n)
    num_blocks = n // tq
    partials = pl.pallas_call(
        functools.partial(_ntxent_kernel, tau=float(tau), n_total=n, tq=tq),
        out_shape=jax.ShapeDtypeStruct((num_blocks, 8, 128), jnp.float32),
        grid=(num_blocks,),
        in_specs=[
            pl.BlockSpec((n, pjp), lambda i: (0, 0)),          # keys resident
            pl.BlockSpec((tq, pjp), lambda i: (i, 0)),         # partner block
        ],
        out_specs=pl.BlockSpec((1, 8, 128), lambda i: (i, 0, 0)),
        compiler_params=pltpu.CompilerParams(
            dimension_semantics=("parallel",)),
    )(vis_b16, partner)

    loss = jnp.sum(partials[:, 0, 0])
    return {'loss': loss}


if __name__ == "__main__":
    key = jax.random.PRNGKey(0)
    pkey, ikey = jax.random.split(key)
    params = init_params(pkey, c_in=3, vis_dim=32, proj_dim=32)
    # batch=2, 6 channels (two RGB views stacked on channels), 16x16 spatial
    images = jax.random.normal(ikey, (2, 6, 16, 16), jnp.float32)

    # Training path: returns the NT-Xent loss (matches the PyTorch module).
    out = simclr_forward(images, params, tau=0.5, from_training=True)
    jax.block_until_ready(out['loss'])
    assert out['loss'].shape == ()
    assert bool(jnp.isfinite(out['loss']))

    # Evaluation path: returns loss=0 and the (un-normalized) projected visuals.
    x_eval = jnp.concatenate(jnp.split(images, 2, axis=1), axis=0)  # (4, 3, 16, 16)
    out_e = simclr_forward(x_eval, params, tau=0.5, from_training=False)
    jax.block_until_ready(out_e['visual'])
    assert out_e['visual'].shape == (4, 32)
    assert bool(jnp.all(jnp.isfinite(out_e['visual'])))

    print("KERNEL_OK")
</pallas_src>

<mosaic_0001>
module attributes {stable_mosaic.version = 11 : i64} {
  func.func @_encoder_proj_kernel(%arg0: i32, %arg1: i32, %arg2: memref<8x288x27xbf16, #tpu.memory_space<vmem>>, %arg3: memref<1x288xf32, #tpu.memory_space<vmem>>, %arg4: memref<27x128xbf16, #tpu.memory_space<vmem>>, %arg5: memref<1x128xf32, #tpu.memory_space<vmem>>, %arg6: memref<128x128xbf16, #tpu.memory_space<vmem>>, %arg7: memref<1x128xf32, #tpu.memory_space<vmem>>, %arg8: memref<128x128xbf16, #tpu.memory_space<vmem>>, %arg9: memref<1x128xf32, #tpu.memory_space<vmem>>, %arg10: memref<8x128xf32, #tpu.memory_space<vmem>>, %arg11: memref<8x128xf32, #tpu.memory_space<vmem>>) attributes {dimension_semantics = [#tpu.dimension_semantics<parallel>, #tpu.dimension_semantics<arbitrary>], iteration_bounds = array<i64: 1, 1>, scalar_prefetch = 0 : i64, scratch_operands = 1 : i64, tpu.core_type = #tpu.core_type<tc>, window_params = [{transform_indices = @transform_0, window_bounds = array<i64: 8, 288, 27>}, {transform_indices = @transform_1, window_bounds = array<i64: 1, 288>}, {pipeline_mode = #tpu.pipeline_mode<synchronous>, transform_indices = @transform_2, window_bounds = array<i64: 27, 128>}, {pipeline_mode = #tpu.pipeline_mode<synchronous>, transform_indices = @transform_3, window_bounds = array<i64: 1, 128>}, {pipeline_mode = #tpu.pipeline_mode<synchronous>, transform_indices = @transform_4, window_bounds = array<i64: 128, 128>}, {pipeline_mode = #tpu.pipeline_mode<synchronous>, transform_indices = @transform_5, window_bounds = array<i64: 1, 128>}, {pipeline_mode = #tpu.pipeline_mode<synchronous>, transform_indices = @transform_6, window_bounds = array<i64: 128, 128>}, {pipeline_mode = #tpu.pipeline_mode<synchronous>, transform_indices = @transform_7, window_bounds = array<i64: 1, 128>}, {transform_indices = @transform_8, window_bounds = array<i64: 8, 128>}]} {
    %c0_i32 = arith.constant 0 : i32
    %0 = arith.cmpi eq, %arg1, %c0_i32 : i32
    %1 = arith.extui %0 : i1 to i32
    %c0_i32_0 = arith.constant 0 : i32
    %2 = arith.cmpi ne, %1, %c0_i32_0 : i32
    scf.if %2 {
      %cst_80 = arith.constant 0.000000e+00 : f32
      %97 = vector.broadcast %cst_80 : f32 to vector<8x128xf32>
      %c0_81 = arith.constant 0 : index
      %c0_82 = arith.constant 0 : index
      %98 = vector.load %arg11[%c0_81, %c0_82] : memref<8x128xf32, #tpu.memory_space<vmem>>, vector<8x128xf32>
      tpu.vector_store %arg11[%c0_81, %c0_82], %97 {strides = array<i32>} : memref<8x128xf32, #tpu.memory_space<vmem>>, vector<8x128xf32>,
    } else {
    }
    %c0 = arith.constant 0 : index
    %c0_1 = arith.constant 0 : index
    %3 = vector.load %arg3[%c0, %c0_1] : memref<1x288xf32, #tpu.memory_space<vmem>>, vector<1x288xf32>
    %c0_2 = arith.constant 0 : index
    %c0_3 = arith.constant 0 : index
    %4 = vector.load %arg4[%c0_2, %c0_3] : memref<27x128xbf16, #tpu.memory_space<vmem>>, vector<27x128xbf16>
    %c0_4 = arith.constant 0 : index
    %c0_5 = arith.constant 0 : index
    %5 = vector.load %arg5[%c0_4, %c0_5] : memref<1x128xf32, #tpu.memory_space<vmem>>, vector<1x128xf32>
    %c0_6 = arith.constant 0 : index
    %c0_7 = arith.constant 0 : index
    %c0_8 = arith.constant 0 : index
    %6 = vector.load %arg2[%c0_6, %c0_7, %c0_8] : memref<8x288x27xbf16, #tpu.memory_space<vmem>>, vector<1x288x27xbf16>
    %7 = vector.shape_cast %6 : vector<1x288x27xbf16> to vector<288x27xbf16>
    %cst = arith.constant dense<0.000000e+00> : vector<288x128xf32>
    %8 = tpu.matmul %7, %4, %cst {dimension_numbers = #tpu.dot_dimension_numbers<[1], [0], [0], [1], [0, 0, 1, 1], [], []>} : vector<288x27xbf16>, vector<27x128xbf16>, vector<288x128xf32> -> vector<288x128xf32>
    %9 = vector.broadcast %5 : vector<1x128xf32> to vector<288x128xf32>
    %10 = arith.addf %8, %9 : vector<288x128xf32>
    %cst_9 = arith.constant 0.000000e+00 : f32
    %11 = vector.broadcast %cst_9 : f32 to vector<288x128xf32>
    %12 = arith.maximumf %10, %11 : vector<288x128xf32>
    %cst_10 = arith.constant dense<0.000000e+00> : vector<1x128xf32>
    %13 = tpu.matmul %3, %12, %cst_10 {dimension_numbers = #tpu.dot_dimension_numbers<[1], [0], [0], [1], [0, 0, 1, 1], [], []>} : vector<1x288xf32>, vector<288x128xf32>, vector<1x128xf32> -> vector<1x128xf32>
    %c0_11 = arith.constant 0 : index
    %c0_12 = arith.constant 0 : index
    %14 = vector.load %arg11[%c0_11, %c0_12] : memref<8x128xf32, #tpu.memory_space<vmem>>, vector<1x128xf32>
    %15 = arith.addf %14, %13 : vector<1x128xf32>
    %c0_13 = arith.constant 0 : index
    %c0_14 = arith.constant 0 : index
    %16 = vector.load %arg11[%c0_13, %c0_14] : memref<8x128xf32, #tpu.memory_space<vmem>>, vector<1x128xf32>
    tpu.vector_store %arg11[%c0_13, %c0_14], %15 {strides = array<i32>} : memref<8x128xf32, #tpu.memory_space<vmem>>, vector<1x128xf32>,
    %c1 = arith.constant 1 : index
    %c0_15 = arith.constant 0 : index
    %c0_16 = arith.constant 0 : index
    %17 = vector.load %arg2[%c1, %c0_15, %c0_16] : memref<8x288x27xbf16, #tpu.memory_space<vmem>>, vector<1x288x27xbf16>
    %18 = vector.shape_cast %17 : vector<1x288x27xbf16> to vector<288x27xbf16>
    %cst_17 = arith.constant dense<0.000000e+00> : vector<288x128xf32>
    %19 = tpu.matmul %18, %4, %cst_17 {dimension_numbers = #tpu.dot_dimension_numbers<[1], [0], [0], [1], [0, 0, 1, 1], [], []>} : vector<288x27xbf16>, vector<27x128xbf16>, vector<288x128xf32> -> vector<288x128xf32>
    %20 = vector.broadcast %5 : vector<1x128xf32> to vector<288x128xf32>
    %21 = arith.addf %19, %20 : vector<288x128xf32>
    %cst_18 = arith.constant 0.000000e+00 : f32
    %22 = vector.broadcast %cst_18 : f32 to vector<288x128xf32>
    %23 = arith.maximumf %21, %22 : vector<288x128xf32>
    %cst_19 = arith.constant dense<0.000000e+00> : vector<1x128xf32>
    %24 = tpu.matmul %3, %23, %cst_19 {dimension_numbers = #tpu.dot_dimension_numbers<[1], [0], [0], [1], [0, 0, 1, 1], [], []>} : vector<1x288xf32>, vector<288x128xf32>, vector<1x128xf32> -> vector<1x128xf32>
    %c1_20 = arith.constant 1 : index
    %c0_21 = arith.constant 0 : index
    %25 = vector.load %arg11[%c1_20, %c0_21] : memref<8x128xf32, #tpu.memory_space<vmem>>, vector<1x128xf32>
    %26 = arith.addf %25, %24 : vector<1x128xf32>
    %c1_22 = arith.constant 1 : index
    %c0_23 = arith.constant 0 : index
    %27 = vector.load %arg11[%c1_22, %c0_23] : memref<8x128xf32, #tpu.memory_space<vmem>>, vector<1x128xf32>
    tpu.vector_store %arg11[%c1_22, %c0_23], %26 {strides = array<i32>} : memref<8x128xf32, #tpu.memory_space<vmem>>, vector<1x128xf32>,
    %c2 = arith.constant 2 : index
    %c0_24 = arith.constant 0 : index
    %c0_25 = arith.constant 0 : index
    %28 = vector.load %arg2[%c2, %c0_24, %c0_25] : memref<8x288x27xbf16, #tpu.memory_space<vmem>>, vector<1x288x27xbf16>
    %29 = vector.shape_cast %28 : vector<1x288x27xbf16> to vector<288x27xbf16>
    %cst_26 = arith.constant dense<0.000000e+00> : vector<288x128xf32>
    %30 = tpu.matmul %29, %4, %cst_26 {dimension_numbers = #tpu.dot_dimension_numbers<[1], [0], [0], [1], [0, 0, 1, 1], [], []>} : vector<288x27xbf16>, vector<27x128xbf16>, vector<288x128xf32> -> vector<288x128xf32>
    %31 = vector.broadcast %5 : vector<1x128xf32> to vector<288x128xf32>
    %32 = arith.addf %30, %31 : vector<288x128xf32>
    %cst_27 = arith.constant 0.000000e+00 : f32
    %33 = vector.broadcast %cst_27 : f32 to vector<288x128xf32>
    %34 = arith.maximumf %32, %33 : vector<288x128xf32>
    %cst_28 = arith.constant dense<0.000000e+00> : vector<1x128xf32>
    %35 = tpu.matmul %3, %34, %cst_28 {dimension_numbers = #tpu.dot_dimension_numbers<[1], [0], [0], [1], [0, 0, 1, 1], [], []>} : vector<1x288xf32>, vector<288x128xf32>, vector<1x128xf32> -> vector<1x128xf32>
    %c2_29 = arith.constant 2 : index
    %c0_30 = arith.constant 0 : index
    %36 = vector.load %arg11[%c2_29, %c0_30] : memref<8x128xf32, #tpu.memory_space<vmem>>, vector<1x128xf32>
    %37 = arith.addf %36, %35 : vector<1x128xf32>
    %c2_31 = arith.constant 2 : index
    %c0_32 = arith.constant 0 : index
    %38 = vector.load %arg11[%c2_31, %c0_32] : memref<8x128xf32, #tpu.memory_space<vmem>>, vector<1x128xf32>
    tpu.vector_store %arg11[%c2_31, %c0_32], %37 {strides = array<i32>} : memref<8x128xf32, #tpu.memory_space<vmem>>, vector<1x128xf32>,
    %c3 = arith.constant 3 : index
    %c0_33 = arith.constant 0 : index
    %c0_34 = arith.constant 0 : index
    %39 = vector.load %arg2[%c3, %c0_33, %c0_34] : memref<8x288x27xbf16, #tpu.memory_space<vmem>>, vector<1x288x27xbf16>
    %40 = vector.shape_cast %39 : vector<1x288x27xbf16> to vector<288x27xbf16>
    %cst_35 = arith.constant dense<0.000000e+00> : vector<288x128xf32>
    %41 = tpu.matmul %40, %4, %cst_35 {dimension_numbers = #tpu.dot_dimension_numbers<[1], [0], [0], [1], [0, 0, 1, 1], [], []>} : vector<288x27xbf16>, vector<27x128xbf16>, vector<288x128xf32> -> vector<288x128xf32>
    %42 = vector.broadcast %5 : vector<1x128xf32> to vector<288x128xf32>
    %43 = arith.addf %41, %42 : vector<288x128xf32>
    %cst_36 = arith.constant 0.000000e+00 : f32
    %44 = vector.broadcast %cst_36 : f32 to vector<288x128xf32>
    %45 = arith.maximumf %43, %44 : vector<288x128xf32>
    %cst_37 = arith.constant dense<0.000000e+00> : vector<1x128xf32>
    %46 = tpu.matmul %3, %45, %cst_37 {dimension_numbers = #tpu.dot_dimension_numbers<[1], [0], [0], [1], [0, 0, 1, 1], [], []>} : vector<1x288xf32>, vector<288x128xf32>, vector<1x128xf32> -> vector<1x128xf32>
    %c3_38 = arith.constant 3 : index
    %c0_39 = arith.constant 0 : index
    %47 = vector.load %arg11[%c3_38, %c0_39] : memref<8x128xf32, #tpu.memory_space<vmem>>, vector<1x128xf32>
    %48 = arith.addf %47, %46 : vector<1x128xf32>
    %c3_40 = arith.constant 3 : index
    %c0_41 = arith.constant 0 : index
    %49 = vector.load %arg11[%c3_40, %c0_41] : memref<8x128xf32, #tpu.memory_space<vmem>>, vector<1x128xf32>
    tpu.vector_store %arg11[%c3_40, %c0_41], %48 {strides = array<i32>} : memref<8x128xf32, #tpu.memory_space<vmem>>, vector<1x128xf32>,
    %c4 = arith.constant 4 : index
    %c0_42 = arith.constant 0 : index
    %c0_43 = arith.constant 0 : index
    %50 = vector.load %arg2[%c4, %c0_42, %c0_43] : memref<8x288x27xbf16, #tpu.memory_space<vmem>>, vector<1x288x27xbf16>
    %51 = vector.shape_cast %50 : vector<1x288x27xbf16> to vector<288x27xbf16>
    %cst_44 = arith.constant dense<0.000000e+00> : vector<288x128xf32>
    %52 = tpu.matmul %51, %4, %cst_44 {dimension_numbers = #tpu.dot_dimension_numbers<[1], [0], [0], [1], [0, 0, 1, 1], [], []>} : vector<288x27xbf16>, vector<27x128xbf16>, vector<288x128xf32> -> vector<288x128xf32>
    %53 = vector.broadcast %5 : vector<1x128xf32> to vector<288x128xf32>
    %54 = arith.addf %52, %53 : vector<288x128xf32>
    %cst_45 = arith.constant 0.000000e+00 : f32
    %55 = vector.broadcast %cst_45 : f32 to vector<288x128xf32>
    %56 = arith.maximumf %54, %55 : vector<288x128xf32>
    %cst_46 = arith.constant dense<0.000000e+00> : vector<1x128xf32>
    %57 = tpu.matmul %3, %56, %cst_46 {dimension_numbers = #tpu.dot_dimension_numbers<[1], [0], [0], [1], [0, 0, 1, 1], [], []>} : vector<1x288xf32>, vector<288x128xf32>, vector<1x128xf32> -> vector<1x128xf32>
    %c4_47 = arith.constant 4 : index
    %c0_48 = arith.constant 0 : index
    %58 = vector.load %arg11[%c4_47, %c0_48] : memref<8x128xf32, #tpu.memory_space<vmem>>, vector<1x128xf32>
    %59 = arith.addf %58, %57 : vector<1x128xf32>
    %c4_49 = arith.constant 4 : index
    %c0_50 = arith.constant 0 : index
    %60 = vector.load %arg11[%c4_49, %c0_50] : memref<8x128xf32, #tpu.memory_space<vmem>>, vector<1x128xf32>
    tpu.vector_store %arg11[%c4_49, %c0_50], %59 {strides = array<i32>} : memref<8x128xf32, #tpu.memory_space<vmem>>, vector<1x128xf32>,
    %c5 = arith.constant 5 : index
    %c0_51 = arith.constant 0 : index
    %c0_52 = arith.constant 0 : index
    %61 = vector.load %arg2[%c5, %c0_51, %c0_52] : memref<8x288x27xbf16, #tpu.memory_space<vmem>>, vector<1x288x27xbf16>
    %62 = vector.shape_cast %61 : vector<1x288x27xbf16> to vector<288x27xbf16>
    %cst_53 = arith.constant dense<0.000000e+00> : vector<288x128xf32>
    %63 = tpu.matmul %62, %4, %cst_53 {dimension_numbers = #tpu.dot_dimension_numbers<[1], [0], [0], [1], [0, 0, 1, 1], [], []>} : vector<288x27xbf16>, vector<27x128xbf16>, vector<288x128xf32> -> vector<288x128xf32>
    %64 = vector.broadcast %5 : vector<1x128xf32> to vector<288x128xf32>
    %65 = arith.addf %63, %64 : vector<288x128xf32>
    %cst_54 = arith.constant 0.000000e+00 : f32
    %66 = vector.broadcast %cst_54 : f32 to vector<288x128xf32>
    %67 = arith.maximumf %65, %66 : vector<288x128xf32>
    %cst_55 = arith.constant dense<0.000000e+00> : vector<1x128xf32>
    %68 = tpu.matmul %3, %67, %cst_55 {dimension_numbers = #tpu.dot_dimension_numbers<[1], [0], [0], [1], [0, 0, 1, 1], [], []>} : vector<1x288xf32>, vector<288x128xf32>, vector<1x128xf32> -> vector<1x128xf32>
    %c5_56 = arith.constant 5 : index
    %c0_57 = arith.constant 0 : index
    %69 = vector.load %arg11[%c5_56, %c0_57] : memref<8x128xf32, #tpu.memory_space<vmem>>, vector<1x128xf32>
    %70 = arith.addf %69, %68 : vector<1x128xf32>
    %c5_58 = arith.constant 5 : index
    %c0_59 = arith.constant 0 : index
    %71 = vector.load %arg11[%c5_58, %c0_59] : memref<8x128xf32, #tpu.memory_space<vmem>>, vector<1x128xf32>
    tpu.vector_store %arg11[%c5_58, %c0_59], %70 {strides = array<i32>} : memref<8x128xf32, #tpu.memory_space<vmem>>, vector<1x128xf32>,
    %c6 = arith.constant 6 : index
    %c0_60 = arith.constant 0 : index
    %c0_61 = arith.constant 0 : index
    %72 = vector.load %arg2[%c6, %c0_60, %c0_61] : memref<8x288x27xbf16, #tpu.memory_space<vmem>>, vector<1x288x27xbf16>
    %73 = vector.shape_cast %72 : vector<1x288x27xbf16> to vector<288x27xbf16>
    %cst_62 = arith.constant dense<0.000000e+00> : vector<288x128xf32>
    %74 = tpu.matmul %73, %4, %cst_62 {dimension_numbers = #tpu.dot_dimension_numbers<[1], [0], [0], [1], [0, 0, 1, 1], [], []>} : vector<288x27xbf16>, vector<27x128xbf16>, vector<288x128xf32> -> vector<288x128xf32>
    %75 = vector.broadcast %5 : vector<1x128xf32> to vector<288x128xf32>
    %76 = arith.addf %74, %75 : vector<288x128xf32>
    %cst_63 = arith.constant 0.000000e+00 : f32
    %77 = vector.broadcast %cst_63 : f32 to vector<288x128xf32>
    %78 = arith.maximumf %76, %77 : vector<288x128xf32>
    %cst_64 = arith.constant dense<0.000000e+00> : vector<1x128xf32>
    %79 = tpu.matmul %3, %78, %cst_64 {dimension_numbers = #tpu.dot_dimension_numbers<[1], [0], [0], [1], [0, 0, 1, 1], [], []>} : vector<1x288xf32>, vector<288x128xf32>, vector<1x128xf32> -> vector<1x128xf32>
    %c6_65 = arith.constant 6 : index
    %c0_66 = arith.constant 0 : index
    %80 = vector.load %arg11[%c6_65, %c0_66] : memref<8x128xf32, #tpu.memory_space<vmem>>, vector<1x128xf32>
    %81 = arith.addf %80, %79 : vector<1x128xf32>
    %c6_67 = arith.constant 6 : index
    %c0_68 = arith.constant 0 : index
    %82 = vector.load %arg11[%c6_67, %c0_68] : memref<8x128xf32, #tpu.memory_space<vmem>>, vector<1x128xf32>
    tpu.vector_store %arg11[%c6_67, %c0_68], %81 {strides = array<i32>} : memref<8x128xf32, #tpu.memory_space<vmem>>, vector<1x128xf32>,
    %c7 = arith.constant 7 : index
    %c0_69 = arith.constant 0 : index
    %c0_70 = arith.constant 0 : index
    %83 = vector.load %arg2[%c7, %c0_69, %c0_70] : memref<8x288x27xbf16, #tpu.memory_space<vmem>>, vector<1x288x27xbf16>
    %84 = vector.shape_cast %83 : vector<1x288x27xbf16> to vector<288x27xbf16>
    %cst_71 = arith.constant dense<0.000000e+00> : vector<288x128xf32>
    %85 = tpu.matmul %84, %4, %cst_71 {dimension_numbers = #tpu.dot_dimension_numbers<[1], [0], [0], [1], [0, 0, 1, 1], [], []>} : vector<288x27xbf16>, vector<27x128xbf16>, vector<288x128xf32> -> vector<288x128xf32>
    %86 = vector.broadcast %5 : vector<1x128xf32> to vector<288x128xf32>
    %87 = arith.addf %85, %86 : vector<288x128xf32>
    %cst_72 = arith.constant 0.000000e+00 : f32
    %88 = vector.broadcast %cst_72 : f32 to vector<288x128xf32>
    %89 = arith.maximumf %87, %88 : vector<288x128xf32>
    %cst_73 = arith.constant dense<0.000000e+00> : vector<1x128xf32>
    %90 = tpu.matmul %3, %89, %cst_73 {dimension_numbers = #tpu.dot_dimension_numbers<[1], [0], [0], [1], [0, 0, 1, 1], [], []>} : vector<1x288xf32>, vector<288x128xf32>, vector<1x128xf32> -> vector<1x128xf32>
    %c7_74 = arith.constant 7 : index
    %c0_75 = arith.constant 0 : index
    %91 = vector.load %arg11[%c7_74, %c0_75] : memref<8x128xf32, #tpu.memory_space<vmem>>, vector<1x128xf32>
    %92 = arith.addf %91, %90 : vector<1x128xf32>
    %c7_76 = arith.constant 7 : index
    %c0_77 = arith.constant 0 : index
    %93 = vector.load %arg11[%c7_76, %c0_77] : memref<8x128xf32, #tpu.memory_space<vmem>>, vector<1x128xf32>
    tpu.vector_store %arg11[%c7_76, %c0_77], %92 {strides = array<i32>} : memref<8x128xf32, #tpu.memory_space<vmem>>, vector<1x128xf32>,
    %c0_i32_78 = arith.constant 0 : i32
    %94 = arith.cmpi eq, %arg1, %c0_i32_78 : i32
    %95 = arith.extui %94 : i1 to i32
    %c0_i32_79 = arith.constant 0 : i32
    %96 = arith.cmpi ne, %95, %c0_i32_79 : i32
    scf.if %96 {
      %c0_80 = arith.constant 0 : index
      %c0_81 = arith.constant 0 : index
      %97 = vector.load %arg11[%c0_80, %c0_81] : memref<8x128xf32, #tpu.memory_space<vmem>>, vector<8x128xf32>
      %98 = arith.truncf %97 : vector<8x128xf32> to vector<8x128xbf16>
      %c0_82 = arith.constant 0 : index
      %c0_83 = arith.constant 0 : index
      %99 = vector.load %arg6[%c0_82, %c0_83] : memref<128x128xbf16, #tpu.memory_space<vmem>>, vector<128x128xbf16>
      %cst_84 = arith.constant dense<0.000000e+00> : vector<8x128xf32>
      %100 = tpu.matmul %98, %99, %cst_84 {dimension_numbers = #tpu.dot_dimension_numbers<[1], [0], [0], [1], [0, 0, 1, 1], [], []>} : vector<8x128xbf16>, vector<128x128xbf16>, vector<8x128xf32> -> vector<8x128xf32>
      %c0_85 = arith.constant 0 : index
      %c0_86 = arith.constant 0 : index
      %101 = vector.load %arg7[%c0_85, %c0_86] : memref<1x128xf32, #tpu.memory_space<vmem>>, vector<1x128xf32>
      %102 = vector.broadcast %101 : vector<1x128xf32> to vector<8x128xf32>
      %103 = arith.addf %100, %102 : vector<8x128xf32>
      %cst_87 = arith.constant 0.000000e+00 : f32
      %104 = vector.broadcast %cst_87 : f32 to vector<8x128xf32>
      %105 = arith.maximumf %103, %104 : vector<8x128xf32>
      %106 = arith.truncf %105 : vector<8x128xf32> to vector<8x128xbf16>
      %c0_88 = arith.constant 0 : index
      %c0_89 = arith.constant 0 : index
      %107 = vector.load %arg8[%c0_88, %c0_89] : memref<128x128xbf16, #tpu.memory_space<vmem>>, vector<128x128xbf16>
      %cst_90 = arith.constant dense<0.000000e+00> : vector<8x128xf32>
      %108 = tpu.matmul %106, %107, %cst_90 {dimension_numbers = #tpu.dot_dimension_numbers<[1], [0], [0], [1], [0, 0, 1, 1], [], []>} : vector<8x128xbf16>, vector<128x128xbf16>, vector<8x128xf32> -> vector<8x128xf32>
      %c0_91 = arith.constant 0 : index
      %c0_92 = arith.constant 0 : index
      %109 = vector.load %arg9[%c0_91, %c0_92] : memref<1x128xf32, #tpu.memory_space<vmem>>, vector<1x128xf32>
      %110 = vector.broadcast %109 : vector<1x128xf32> to vector<8x128xf32>
      %111 = arith.addf %108, %110 : vector<8x128xf32>
      %112 = arith.mulf %111, %111 : vector<8x128xf32>
      %cst_93 = arith.constant dense<0.000000e+00> : vector<8xf32>
      %113 = vector.multi_reduction <add>, %112, %cst_93 [1] : vector<8x128xf32> to vector<8xf32>
      %114 = vector.shape_cast %113 : vector<8xf32> to vector<8x1xf32>
      %cst_94 = arith.constant 1.000000e-24 : f32
      %115 = vector.broadcast %cst_94 : f32 to vector<8x1xf32>
      %116 = arith.maximumf %114, %115 : vector<8x1xf32>
      %117 = math.rsqrt %116 : vector<8x1xf32>
      %118 = vector.broadcast %117 : vector<8x1xf32> to vector<8x128xf32>
      %119 = arith.mulf %111, %118 : vector<8x128xf32>
      %c0_95 = arith.constant 0 : index
      %c0_96 = arith.constant 0 : index
      %120 = vector.load %arg10[%c0_95, %c0_96] : memref<8x128xf32, #tpu.memory_space<vmem>>, vector<8x128xf32>
      tpu.vector_store %arg10[%c0_95, %c0_96], %119 {strides = array<i32>} : memref<8x128xf32, #tpu.memory_space<vmem>>, vector<8x128xf32>,
    } else {
    }
    return
  }
  func.func @transform_0(%arg0: i32, %arg1: i32) -> (i32, i32, i32) {
    %c0_i32 = arith.constant 0 : i32
    %c0_i32_0 = arith.constant 0 : i32
    return %arg0, %arg1, %c0_i32 : i32, i32, i32
  }
  func.func @transform_1(%arg0: i32, %arg1: i32) -> (i32, i32) {
    %c0_i32 = arith.constant 0 : i32
    %c0_i32_0 = arith.constant 0 : i32
    return %c0_i32, %arg1 : i32, i32
  }
  func.func @transform_2(%arg0: i32, %arg1: i32) -> (i32, i32) {
    %c0_i32 = arith.constant 0 : i32
    %c0_i32_0 = arith.constant 0 : i32
    %c0_i32_1 = arith.constant 0 : i32
    return %c0_i32, %c0_i32_0 : i32, i32
  }
  func.func @transform_3(%arg0: i32, %arg1: i32) -> (i32, i32) {
    %c0_i32 = arith.constant 0 : i32
    %c0_i32_0 = arith.constant 0 : i32
    %c0_i32_1 = arith.constant 0 : i32
    return %c0_i32, %c0_i32_0 : i32, i32
  }
  func.func @transform_4(%arg0: i32, %arg1: i32) -> (i32, i32) {
    %c0_i32 = arith.constant 0 : i32
    %c0_i32_0 = arith.constant 0 : i32
    %c0_i32_1 = arith.constant 0 : i32
    return %c0_i32, %c0_i32_0 : i32, i32
  }
  func.func @transform_5(%arg0: i32, %arg1: i32) -> (i32, i32) {
    %c0_i32 = arith.constant 0 : i32
    %c0_i32_0 = arith.constant 0 : i32
    %c0_i32_1 = arith.constant 0 : i32
    return %c0_i32, %c0_i32_0 : i32, i32
  }
  func.func @transform_6(%arg0: i32, %arg1: i32) -> (i32, i32) {
    %c0_i32 = arith.constant 0 : i32
    %c0_i32_0 = arith.constant 0 : i32
    %c0_i32_1 = arith.constant 0 : i32
    return %c0_i32, %c0_i32_0 : i32, i32
  }
  func.func @transform_7(%arg0: i32, %arg1: i32) -> (i32, i32) {
    %c0_i32 = arith.constant 0 : i32
    %c0_i32_0 = arith.constant 0 : i32
    %c0_i32_1 = arith.constant 0 : i32
    return %c0_i32, %c0_i32_0 : i32, i32
  }
  func.func @transform_8(%arg0: i32, %arg1: i32) -> (i32, i32) {
    %c0_i32 = arith.constant 0 : i32
    %c0_i32_0 = arith.constant 0 : i32
    return %arg0, %c0_i32 : i32, i32
  }
}

</mosaic_0001>

<bundles_post_ra>
// kernel: tpu_custom_call.1
= control target key start
LH: loop header
LB: loop body
LE: loop exit
PB: predicated region body
PF: predicated region fallthrough
CT: control target
= control target key end

     0   :  { %vm240_vm0 = vcmask 1044480   ;;  %vm241_vm1 = vcmask 1045504   ;;  %v6340_v1 = vmov 65535   ;;  %vm185_vm2 = vcmask 220160   ;;  %s7796_s0 = inlined_call_operand.vmem [shape: bf16[8,288,27], index: 0, kind: input, shape index: {}]   ;;  %s7797_s1 = inlined_call_operand.vmem [shape: f32[1,288], index: 1, kind: input, shape index: {}]   ;;  %s7798_s2 = inlined_call_operand.vmem [shape: bf16[27,128], index: 2, kind: input, shape index: {}]   ;;  %s7799_s3 = inlined_call_operand.vmem [shape: f32[1,128], index: 3, kind: input, shape index: {}]   ;;  %s7800_s4 = inlined_call_operand.vmem [shape: bf16[128,128], index: 4, kind: input, shape index: {}]   ;;  %s7801_s5 = inlined_call_operand.vmem [shape: f32[1,128], index: 5, kind: input, shape index: {}]   ;;  %s7802_s6 = inlined_call_operand.vmem [shape: bf16[128,128], index: 6, kind: input, shape index: {}]   ;;  %s7803_s7 = inlined_call_operand.vmem [shape: f32[1,128], index: 7, kind: input, shape index: {}]   ;;  %s7804_s8 = inlined_call_operand.hbm [shape: f32[8,128], index: 8, kind: output, shape index: {}]  }
   0x1   :  { %v6149_v0 = vld [vmem:[%s7798_s2 + $0x8] sm:$0x3f]   ;;  %v242_v2 = vsel %vm240_vm0, 4294967295, %v6340_v1  ;;  %v6151_v3 = vld [vmem:[%s7796_s0] sm:$0xff]   ;;  %v6153_v8 = vld [vmem:[%s7796_s0 + $0x10] sm:$0xff]  }
   0x2   :  { %v243_v4 = vsel %vm241_vm1, %v242_v2, 0  ;;  %v6150_v6 = vld [vmem:[%s7798_s2] sm:$0xff]   ;;  %5701 = vmatprep.mubr.msk.bf16.mxu0 %vm185_vm2, %v6151_v3  ;;  %v6152_v7 = vld [vmem:[%s7796_s0 + $0x8] sm:$0xff]   ;;  %v6154_v9 = vld [vmem:[%s7796_s0 + $0x18] sm:$0xff]  }
   0x3   :  { %v6395_v5 = vand.u32 %v6149_v0, %v243_v4  ;;  %v6155_v10 = vld [vmem:[%s7796_s0 + $0x20] sm:$0xff]   ;;  %v6156_v11 = vld [vmem:[%s7796_s0 + $0x28] sm:$0xff]   ;;  %v6157_v12 = vld [vmem:[%s7796_s0 + $0x30] sm:$0xff]  }
   0x4   :  { %v6158_v13 = vld [vmem:[%s7796_s0 + $0x38] sm:$0xff]   ;;  %v6159_v14 = vld [vmem:[%s7796_s0 + $0x40] sm:$0xff]   ;;  %v6160_v15 = vld [vmem:[%s7796_s0 + $0x48] sm:$0xff]  }
   0x5   :  { %5697 = vmatprep.subr.bf16.mxu0 %v6395_v5  ;;  %v6161_v16 = vld [vmem:[%s7796_s0 + $0x50] sm:$0xff]   ;;  %v6162_v17 = vld [vmem:[%s7796_s0 + $0x58] sm:$0xff]   ;;  %v6163_v18 = vld [vmem:[%s7796_s0 + $0x60] sm:$0xff]  }
   0x6   :  { %5698 = vmatpush3.bf16.msra.mxu0 %v6395_v5  ;;  %v6164_v19 = vld [vmem:[%s7796_s0 + $0x68] sm:$0xff]   ;;  %v6165_v20 = vld [vmem:[%s7796_s0 + $0x70] sm:$0xff]   ;;  %v6166_v21 = vld [vmem:[%s7796_s0 + $0x78] sm:$0xff]  }
   0x7   :  { %5699 = vmatprep.subr.bf16.mxu0 %v6150_v6  ;;  %v6167_v22 = vld [vmem:[%s7796_s0 + $0x80] sm:$0xff]   ;;  %v6168_v23 = vld [vmem:[%s7796_s0 + $0x88] sm:$0xff]  }
   0xa   :  { %5700 = vmatpush3.bf16.msra.mxu0 %v6150_v6 }
   0xd   :  { %5702 = vmatmul.mubr.msk.bf16.vlgmr.msra.gmra.mxu0 %vm185_vm2, %v6152_v7 }
   0xe   :  { %5705 = vmatprep.mubr.msk.bf16.mxu0 %vm185_vm2, %v6153_v8 }
  0x15   :  { %5706 = vmatmul.mubr.msk.bf16.gmra.mxu0 %vm185_vm2, %v6154_v9 }
  0x16   :  { %5709 = vmatprep.mubr.msk.bf16.mxu0 %vm185_vm2, %v6155_v10 }
  0x1d   :  { %5710 = vmatmul.mubr.msk.bf16.gmra.mxu0 %vm185_vm2, %v6156_v11 }
  0x1e   :  { %5713 = vmatprep.mubr.msk.bf16.mxu0 %vm185_vm2, %v6157_v12 }
  0x25   :  { %5714 = vmatmul.mubr.msk.bf16.gmra.mxu0 %vm185_vm2, %v6158_v13 }
  0x26   :  { %5717 = vmatprep.mubr.msk.bf16.mxu0 %vm185_vm2, %v6159_v14 }
  0x2d   :  { %5718 = vmatmul.mubr.msk.bf16.gmra.mxu0 %vm185_vm2, %v6160_v15 }
  0x2e   :  { %5721 = vmatprep.mubr.msk.bf16.mxu0 %vm185_vm2, %v6161_v16 }
  0x35   :  { %5722 = vmatmul.mubr.msk.bf16.gmra.mxu0 %vm185_vm2, %v6162_v17 }
  0x36   :  { %5725 = vmatprep.mubr.msk.bf16.mxu0 %vm185_vm2, %v6163_v18 }
  0x3d   :  { %5726 = vmatmul.mubr.msk.bf16.gmra.mxu0 %vm185_vm2, %v6164_v19 }
  0x3e   :  { %5729 = vmatprep.mubr.msk.bf16.mxu0 %vm185_vm2, %v6165_v20 }
  0x45   :  { %5730 = vmatmul.mubr.msk.bf16.gmra.mxu0 %vm185_vm2, %v6166_v21 }
  0x46   :  { %5733 = vmatprep.mubr.msk.bf16.mxu0 %vm185_vm2, %v6167_v22 }
  0x4d   :  { %5734 = vmatmul.mubr.msk.bf16.gmra.mxu0 %vm185_vm2, %v6168_v23 }
  0x4e   :  { %13 = vsyncpa [#allocation4], 0  ;;  %v461_v24 = vlaneseq  ;;  %v36_v27 = vld [vmem:[%s7797_s1] sm:$0x7]  ;;  %v6341_v31 = vmov 0.0   ;;  %vm6342_vm3 = vmmov 0  }
  0x4f   :  { %35 = vst [vmem:[#allocation2] sm:$0xff] %v6341_v31  ;;  %v6512_v0 = vld [vmem:[%s7799_s3] ss:$0 sm:$0xff]  ;;  %vm475_vm4 = vcmask 261120  }
  0x50   :  { %v462_v25 = vshrl.u32 %v461_v24, 7 }
  0x52   :  { %v467_v26 = vsub.s32 1, %v462_v25  ;;  %v463_v28 = vsub.s32 0, %v462_v25  ;;  %v471_v32 = vsub.s32 2, %v462_v25 }
  0x54   :  { %v6474_v29 = vrot.slane %v36_v27, %v467_v26  ;;  %v6476_v30 = vrot.slane %v36_v27, %v463_v28  ;;  %v6481_v33 = vrot.slane %v36_v27, %v471_v32 }
  0x56   :  { %542 = vmatprep.mubr.f32.mxu1 %v6474_v29  ;;  %1079 = vmatprep.mubr.f32.mxu0 %v6474_v29 }
  0xcd   :  { %v6483_v34 = vpop.f32.mrf.mxu0 }
  0xcf   :  { %v6485_v35 = vpop.f32.mrf.mxu0 }
  0xd1   :  { %v6487_v36 = vpop.f32.mrf.mxu0 }
  0xd3   :  { %v6489_v37 = vpop.f32.mrf.mxu0 }
  0xd5   :  { %v6491_v38 = vpop.f32.mrf.mxu0 }
  0xd7   :  { %v6493_v39 = vpop.f32.mrf.mxu0 }
  0xd9   :  { %v6495_v40 = vpop.f32.mrf.mxu0 }
  0xdb   :  { %v6497_v41 = vpop.f32.mrf.mxu0 }
  0xdd   :  { %v5711_v42 = vpop.f32.mrf.mxu0 }
  0xde   :  { %v322_v22 = vadd.f32 %v5711_v42, %v6512_v0 }
  0xdf   :  { %v313_v43 = vpop.f32.mrf.mxu0 }
  0xe1   :  { %v5712_v44 = vpop.f32.mrf.mxu0 }
  0xe2   :  { %v325_v18 = vadd.f32 %v5712_v44, %v6512_v0  ;;  %v434_v44 = vmax.f32 %v322_v22, 0.0  ;;  %v6169_v22 = vld [vmem:[%s7796_s0 + $0x90] sm:$0xff]  }
  0xe3   :  { %v316_v45 = vpop.f32.mrf.mxu0 }
  0xe4   :  { %v435_v26 = vmax.f32 %v325_v18, 0.0  ;;  %v317_v27 = vadd.f32 %v6512_v0, %v316_v45 }
  0xe5   :  { %v5715_v46 = vpop.f32.mrf.mxu0 }
  0xe6   :  { %v338_v6 = vadd.f32 %v5715_v46, %v6512_v0  ;;  %v314_v46 = vadd.f32 %v6512_v0, %v313_v43 }
  0xe7   :  { %v329_v47 = vpop.f32.mrf.mxu0 }
  0xe8   :  { %v438_v14 = vmax.f32 %v338_v6, 0.0  ;;  %v330_v15 = vadd.f32 %v6512_v0, %v329_v47 }
  0xe9   :  { %v5716_v48 = vpop.f32.mrf.mxu0 }
  0xea   :  { %v341_v1 = vadd.f32 %v5716_v48, %v6512_v0  ;;  %v436_v23 = vmax.f32 %v330_v15, 0.0  ;;  %v309_v48 = vadd.f32 %v6495_v40, %v6512_v0 }
  0xeb   :  { %v332_v49 = vpop.f32.mrf.mxu0 }
  0xec   :  { %v439_v10 = vmax.f32 %v341_v1, 0.0  ;;  %v333_v11 = vadd.f32 %v6512_v0, %v332_v49  ;;  %v433_v49 = vmax.f32 %v317_v27, 0.0  ;;  %v6173_v27 = vld [vmem:[%s7796_s0 + $0xb0] sm:$0xff]  }
  0xed   :  { %v6499_v50 = vpop.f32.mrf.mxu0 }
  0xee   :  { %v437_v19 = vmax.f32 %v333_v11, 0.0 }
  0xef   :  { %v6501_v51 = vpop.f32.mrf.mxu0 }
  0xf1   :  { %v6503_v52 = vpop.f32.mrf.mxu0 }
  0xf3   :  { %v6505_v53 = vpop.f32.mrf.mxu0 }
  0xf5   :  { %v5723_v54 = vpop.f32.mrf.mxu0 }
  0xf6   :  { %v370_v45 = vadd.f32 %v5723_v54, %v6512_v0 }
  0xf7   :  { %v6507_v55 = vpop.f32.mrf.mxu0 }
  0xf8   :  { %v446_v40 = vmax.f32 %v370_v45, 0.0  ;;  %v362_v54 = vadd.f32 %v6512_v0, %v6507_v55  ;;  %v354_v55 = vadd.f32 %v6499_v50, %v6512_v0  ;;  %v346_v50 = vadd.f32 %v6512_v0, %v6501_v51  ;;  %v6182_v45 = vld [vmem:[%s7796_s0 + $0xf8] sm:$0xff]  }
  0xf9   :  { %v5724_v56 = vpop.f32.mrf.mxu0 }
  0xfa   :  { %v373_v42 = vadd.f32 %v5724_v56, %v6512_v0  ;;  %v431_v56 = vmax.f32 %v309_v48, 0.0  ;;  %v440_v15 = vmax.f32 %v346_v50, 0.0  ;;  %v6180_v48 = vld [vmem:[%s7796_s0 + $0xe8] sm:$0xff]  }
  0xfb   :  { %v364_v57 = vpop.f32.mrf.mxu0 }
  0xfc   :  { %v447_v43 = vmax.f32 %v373_v42, 0.0  ;;  %v6178_v42 = vld [vmem:[%s7796_s0 + $0xd8] sm:$0xff]  }
  0xfd   :  { %v5727_v58 = vpop.f32.mrf.mxu0 }
  0xfe   :  { %v386_v20 = vadd.f32 %v5727_v58, %v6512_v0 }
  0xff   :  { %v377_v59 = vpop.f32.mrf.mxu0 }
 0x100   :  { %v450_v28 = vmax.f32 %v386_v20, 0.0  ;;  %v378_v32 = vadd.f32 %v6512_v0, %v377_v59  ;;  %v306_v59 = vadd.f32 %v6491_v38, %v6512_v0  ;;  %v298_v38 = vadd.f32 %v6512_v0, %v6493_v39 }
 0x101   :  { %v5728_v60 = vpop.f32.mrf.mxu0  ;;  %v290_v39 = vadd.f32 %v6483_v34, %v6512_v0  ;;  %v282_v34 = vadd.f32 %v6512_v0, %v6485_v35 }
 0x102   :  { %v389_v16 = vadd.f32 %v5728_v60, %v6512_v0  ;;  %v448_v58 = vmax.f32 %v378_v32, 0.0  ;;  %v432_v60 = vmax.f32 %v314_v46, 0.0  ;;  %v430_v1 = vmax.f32 %v306_v59, 0.0  ;;  %v6175_v32 = vld [vmem:[%s7796_s0 + $0xc0] sm:$0xff]   ;;  %v6177_v46 = vld [vmem:[%s7796_s0 + $0xd0] sm:$0xff]   ;;  %v6184_v59 = vld [vmem:[%s7796_s0 + $0x108] sm:$0xff]  }
 0x103   :  { %v380_v61 = vpop.f32.mrf.mxu0 }
 0x104   :  { %v451_v24 = vmax.f32 %v389_v16, 0.0  ;;  %v381_v25 = vadd.f32 %v6512_v0, %v380_v61  ;;  %v365_v61 = vadd.f32 %v6512_v0, %v364_v57  ;;  %v357_v57 = vadd.f32 %v6503_v52, %v6512_v0 }
 0x105   :  { %v5731_v62 = vpop.f32.mrf.mxu0  ;;  %v349_v52 = vadd.f32 %v6512_v0, %v6505_v53  ;;  %v424_v16 = vmax.f32 %v282_v34, 0.0 }
 0x106   :  { %v402_v3 = vadd.f32 %v5731_v62, %v6512_v0  ;;  %v449_v47 = vmax.f32 %v381_v25, 0.0  ;;  %v301_v62 = vadd.f32 %v6512_v0, %v6497_v41  ;;  %v293_v41 = vadd.f32 %v6487_v36, %v6512_v0  ;;  %v6171_v25 = vld [vmem:[%s7796_s0 + $0xa0] sm:$0xff]  }
 0x107   :  { %v393_v63 = vpop.f32.mrf.mxu0  ;;  %v285_v36 = vadd.f32 %v6512_v0, %v6489_v37 }
 0x108   :  { %v454_v12 = vmax.f32 %v402_v3, 0.0  ;;  %v394_v13 = vadd.f32 %v6512_v0, %v393_v63  ;;  %v429_v3 = vmax.f32 %v301_v62, 0.0 }
 0x109   :  { %v5732_v2 = vpop.f32.mrf.mxu0  ;;  %v425_v53 = vmax.f32 %v285_v36, 0.0 }
 0x10a   :  { %v405_v4 = vadd.f32 %v5732_v2, %v6512_v0  ;;  %v452_v21 = vmax.f32 %v394_v13, 0.0  ;;  %v445_v2 = vmax.f32 %v365_v61, 0.0  ;;  %v441_v13 = vmax.f32 %v349_v52, 0.0 }
 0x10b   :  { %v396_v7 = vpop.f32.mrf.mxu0 }
 0x10c   :  { %v397_v8 = vadd.f32 %v6512_v0, %v396_v7  ;;  %v455_v9 = vmax.f32 %v405_v4, 0.0  ;;  %v444_v4 = vmax.f32 %v362_v54, 0.0  ;;  %v428_v7 = vmax.f32 %v298_v38, 0.0  ;;  %v618_v54 = vld [vmem:[#allocation2] sm:$0x1] }
 0x10d   :  { %v5735_v63 = vpop.f32.mrf.mxu0 }
 0x10e   :  { %5219 = vmatprep.subr.mxu1 %v455_v9  ;;  %v453_v17 = vmax.f32 %v397_v8, 0.0  ;;  %v443_v8 = vmax.f32 %v357_v57, 0.0  ;;  %v427_v9 = vmax.f32 %v293_v41, 0.0 }
 0x10f   :  { %5220 = vmatpush3.msra.mxu1 %v439_v10  ;;  %v409_v6 = vpop.f32.mrf.mxu0  ;;  %v442_v10 = vmax.f32 %v354_v55, 0.0 }
 0x110   :  { %5221 = vmatprep.subr.mxu1 %v454_v12  ;;  %v426_v12 = vmax.f32 %v290_v39, 0.0 }
 0x111   :  { %5222 = vmatpush3.msra.mxu1 %v438_v14  ;;  %v5736_v11 = vpop.f32.mrf.mxu0 }
 0x112   :  { %5223 = vmatprep.subr.mxu1 %v453_v17  ;;  %v421_v14 = vadd.f32 %v5736_v11, %v6512_v0  ;;  %v418_v17 = vadd.f32 %v5735_v63, %v6512_v0 }
 0x113   :  { %5224 = vmatpush3.msra.mxu1 %v437_v19  ;;  %v412_v37 = vpop.f32.mrf.mxu0  ;;  %v410_v19 = vadd.f32 %v6512_v0, %v409_v6 }
 0x114   :  { %5225 = vmatprep.subr.mxu1 %v452_v21  ;;  %v459_v51 = vmax.f32 %v421_v14, 0.0  ;;  %v413_v18 = vadd.f32 %v6512_v0, %v412_v37  ;;  %v458_v35 = vmax.f32 %v418_v17, 0.0 }
 0x115   :  { %5226 = vmatpush3.msra.mxu1 %v436_v23  ;;  %v456_v21 = vmax.f32 %v410_v19, 0.0  ;;  %v6581_v23 = vld [vmem:[%s7798_s2] sm:$0xff]  }
 0x116   :  { %5227 = vmatprep.subr.mxu1 %v451_v24  ;;  %v457_v20 = vmax.f32 %v413_v18, 0.0  ;;  %v6170_v24 = vld [vmem:[%s7796_s0 + $0x98] sm:$0xff]  }
 0x117   :  { %5228 = vmatpush3.msra.mxu1 %v435_v26  ;;  %v6172_v26 = vld [vmem:[%s7796_s0 + $0xa8] sm:$0xff]  }
 0x118   :  { %5229 = vmatprep.subr.mxu1 %v450_v28  ;;  %v6174_v28 = vld [vmem:[%s7796_s0 + $0xb8] sm:$0xff]  }
 0x119   :  { %5230 = vmatpush3.msra.mxu1 %v434_v44  ;;  %v6176_v44 = vld [vmem:[%s7796_s0 + $0xc8] sm:$0xff]  }
 0x11a   :  { %5231 = vmatprep.subr.mxu1 %v449_v47  ;;  %v6179_v47 = vld [vmem:[%s7796_s0 + $0xe0] sm:$0xff]  }
 0x11b   :  { %5232 = vmatpush3.msra.mxu1 %v433_v49  ;;  %v6181_v49 = vld [vmem:[%s7796_s0 + $0xf0] sm:$0xff]  }
 0x11c   :  { %5233 = vmatprep.subr.mxu1 %v448_v58  ;;  %v6183_v58 = vld [vmem:[%s7796_s0 + $0x100] sm:$0xff]  }
 0x11d   :  { %5234 = vmatpush3.msra.mxu1 %v432_v60  ;;  %v6185_v60 = vld [vmem:[%s7796_s0 + $0x110] sm:$0xff]  }
 0x11e   :  { %5235 = vmatprep.subr.mxu1 %v447_v43  ;;  %v6186_v43 = vld [vmem:[%s7796_s0 + $0x118] sm:$0xff]  }
 0x11f   :  { %5236 = vmatpush3.msra.mxu1 %v431_v56 }
 0x120   :  { %5237 = vmatprep.subr.mxu1 %v446_v40 }
 0x121   :  { %5238 = vmatpush3.msra.mxu1 %v430_v1 }
 0x122   :  { %5239 = vmatprep.subr.mxu1 %v445_v2 }
 0x123   :  { %5240 = vmatpush3.msra.mxu1 %v429_v3 }
 0x124   :  { %5241 = vmatprep.subr.mxu1 %v444_v4 }
 0x125   :  { %5242 = vmatpush3.msra.mxu1 %v428_v7 }
 0x126   :  { %5243 = vmatprep.subr.mxu1 %v443_v8 }
 0x127   :  { %5244 = vmatpush3.msra.mxu1 %v427_v9 }
 0x128   :  { %5245 = vmatprep.subr.mxu1 %v442_v10 }
 0x129   :  { %5246 = vmatpush3.msra.mxu1 %v426_v12 }
 0x12a   :  { %5247 = vmatprep.subr.mxu1 %v441_v13 }
 0x12b   :  { %5248 = vmatpush3.msra.mxu1 %v425_v53 }
 0x12c   :  { %5249 = vmatprep.subr.mxu1 %v440_v15 }
 0x12d   :  { %5250 = vmatpush3.msra.mxu1 %v424_v16 }
 0x12e   :  { %543 = vmatmul.mubr.f32.vlgmr.msra.gmra.mxu1 %v6476_v30  ;;  %5737 = vmatprep.subr.mxu1 %v6341_v31 }
 0x12f   :  { %5738 = vmatpush3.msra.mxu1 %v459_v51  ;;  %5745 = vmatprep.mubr.msk.f32.mxu1 %vm6342_vm3, %v6341_v31 }
 0x130   :  { %5739 = vmatprep.subr.mxu1 %v6341_v31 }
 0x131   :  { %5740 = vmatpush3.msra.mxu1 %v458_v35 }
 0x132   :  { %5741 = vmatprep.subr.mxu1 %v6341_v31 }
 0x133   :  { %5742 = vmatpush3.msra.mxu1 %v457_v20 }
 0x134   :  { %5743 = vmatprep.subr.mxu1 %v6341_v31 }
 0x135   :  { %5744 = vmatpush3.msra.mxu1 %v456_v21 }
 0x136   :  { %5746 = vmatmul.mubr.msk.f32.vlgmr.msra.gmra.mxu1 %vm475_vm4, %v6481_v33  ;;  %5748 = vmatprep.subr.bf16.mxu1 %v6395_v5 }
 0x137   :  { %5749 = vmatpush3.bf16.msra.mxu1 %v6395_v5  ;;  %5752 = vmatprep.mubr.msk.bf16.mxu1 %vm185_vm2, %v6169_v22 }
 0x138   :  { %5750 = vmatprep.subr.bf16.mxu1 %v6581_v23 }
 0x13b   :  { %5751 = vmatpush3.bf16.msra.mxu1 %v6581_v23 }
 0x13e   :  { %5753 = vmatmul.mubr.msk.bf16.vlgmr.msra.gmra.mxu1 %vm185_vm2, %v6170_v24 }
 0x13f   :  { %5756 = vmatprep.mubr.msk.bf16.mxu1 %vm185_vm2, %v6171_v25 }
 0x146   :  { %5757 = vmatmul.mubr.msk.bf16.gmra.mxu1 %vm185_vm2, %v6172_v26 }
 0x147   :  { %5760 = vmatprep.mubr.msk.bf16.mxu1 %vm185_vm2, %v6173_v27 }
 0x14e   :  { %5761 = vmatmul.mubr.msk.bf16.gmra.mxu1 %vm185_vm2, %v6174_v28 }
 0x14f   :  { %5764 = vmatprep.mubr.msk.bf16.mxu1 %vm185_vm2, %v6175_v32 }
 0x156   :  { %5765 = vmatmul.mubr.msk.bf16.gmra.mxu1 %vm185_vm2, %v6176_v44 }
 0x157   :  { %5768 = vmatprep.mubr.msk.bf16.mxu1 %vm185_vm2, %v6177_v46 }
 0x15e   :  { %5769 = vmatmul.mubr.msk.bf16.gmra.mxu1 %vm185_vm2, %v6178_v42 }
 0x15f   :  { %5772 = vmatprep.mubr.msk.bf16.mxu1 %vm185_vm2, %v6179_v47 }
 0x166   :  { %5773 = vmatmul.mubr.msk.bf16.gmra.mxu1 %vm185_vm2, %v6180_v48 }
 0x167   :  { %5776 = vmatprep.mubr.msk.bf16.mxu1 %vm185_vm2, %v6181_v49 }
 0x16e   :  { %5777 = vmatmul.mubr.msk.bf16.gmra.mxu1 %vm185_vm2, %v6182_v45 }
 0x16f   :  { %5780 = vmatprep.mubr.msk.bf16.mxu1 %vm185_vm2, %v6183_v58 }
 0x176   :  { %5781 = vmatmul.mubr.msk.bf16.gmra.mxu1 %vm185_vm2, %v6184_v59 }
 0x177   :  { %5784 = vmatprep.mubr.msk.bf16.mxu1 %vm185_vm2, %v6185_v60 }
 0x17e   :  { %5785 = vmatmul.mubr.msk.bf16.gmra.mxu1 %vm185_vm2, %v6186_v43 }
 0x17f   :  { %1616 = vmatprep.mubr.f32.mxu1 %v6474_v29 }
 0x1ee   :  { %v5251_v61 = vpop.f32.mrf.mxu1 }
 0x1f0   :  { %v5252_v56 = vpop.f32.mrf.mxu1 }
 0x1f1   :  { %v5253_v62 = vadd.f32 %v5252_v56, %v5251_v61 }
 0x1f6   :  { %v614_v40 = vpop.f32.mrf.mxu1 }
 0x1f7   :  { %v615_v63 = vadd.f32 %v5253_v62, %v614_v40 }
 0x1f8   :  { %v5747_v1 = vpop.f32.mrf.mxu1 }
 0x1f9   :  { %v619_v38 = vadd.f32 %v618_v54, %v615_v63 }
 0x1fb   :  { %620 = vst [vmem:[#allocation2] sm:$0x1] %v619_v38 }
 0x1fe   :  { %v6654_v57 = vpop.f32.mrf.mxu1 }
 0x200   :  { %v6656_v2 = vpop.f32.mrf.mxu1 }
 0x202   :  { %v6658_v41 = vpop.f32.mrf.mxu1 }
 0x204   :  { %v6660_v3 = vpop.f32.mrf.mxu1 }
 0x206   :  { %v6662_v55 = vpop.f32.mrf.mxu1 }
 0x208   :  { %v6664_v4 = vpop.f32.mrf.mxu1 }
 0x20a   :  { %v6666_v6 = vpop.f32.mrf.mxu1 }
 0x20c   :  { %v6668_v39 = vpop.f32.mrf.mxu1 }
 0x20e   :  { %v5762_v7 = vpop.f32.mrf.mxu1 }
 0x20f   :  { %v877_v56 = vadd.f32 %v5762_v7, %v6512_v0 }
 0x210   :  { %v868_v8 = vpop.f32.mrf.mxu1 }
 0x212   :  { %v5763_v52 = vpop.f32.mrf.mxu1 }
 0x213   :  { %v880_v59 = vadd.f32 %v5763_v52, %v6512_v0 }
 0x214   :  { %v871_v9 = vpop.f32.mrf.mxu1 }
 0x215   :  { %v990_v63 = vmax.f32 %v880_v59, 0.0  ;;  %v872_v1 = vadd.f32 %v6512_v0, %v871_v9 }
 0x216   :  { %v5766_v36 = vpop.f32.mrf.mxu1 }
 0x217   :  { %v893_v26 = vadd.f32 %v5766_v36, %v6512_v0  ;;  %v989_v36 = vmax.f32 %v877_v56, 0.0 }
 0x218   :  { %v884_v10 = vpop.f32.mrf.mxu1 }
 0x219   :  { %v993_v48 = vmax.f32 %v893_v26, 0.0  ;;  %v885_v49 = vadd.f32 %v6512_v0, %v884_v10  ;;  %v869_v10 = vadd.f32 %v6512_v0, %v868_v8 }
 0x21a   :  { %v5767_v50 = vpop.f32.mrf.mxu1 }
 0x21b   :  { %v896_v21 = vadd.f32 %v5767_v50, %v6512_v0  ;;  %v991_v62 = vmax.f32 %v885_v49, 0.0 }
 0x21c   :  { %v887_v11 = vpop.f32.mrf.mxu1 }
 0x21d   :  { %v994_v44 = vmax.f32 %v896_v21, 0.0  ;;  %v888_v46 = vadd.f32 %v6512_v0, %v887_v11  ;;  %v864_v11 = vadd.f32 %v6666_v6, %v6512_v0 }
 0x21e   :  { %v6670_v12 = vpop.f32.mrf.mxu1 }
 0x21f   :  { %v992_v60 = vmax.f32 %v888_v46, 0.0 }
 0x220   :  { %v6672_v34 = vpop.f32.mrf.mxu1 }
 0x222   :  { %v6674_v13 = vpop.f32.mrf.mxu1 }
 0x224   :  { %v6676_v53 = vpop.f32.mrf.mxu1 }
 0x226   :  { %v5774_v14 = vpop.f32.mrf.mxu1 }
 0x227   :  { %v925_v9 = vadd.f32 %v5774_v14, %v6512_v0 }
 0x228   :  { %v6678_v15 = vpop.f32.mrf.mxu1 }
 0x229   :  { %v1001_v6 = vmax.f32 %v925_v9, 0.0  ;;  %v917_v14 = vadd.f32 %v6512_v0, %v6678_v15  ;;  %v909_v15 = vadd.f32 %v6670_v12, %v6512_v0  ;;  %v901_v12 = vadd.f32 %v6512_v0, %v6672_v34  ;;  %v6200_v9 = vld [vmem:[%s7796_s0 + $0x188] sm:$0xff]  }
 0x22a   :  { %v5775_v37 = vpop.f32.mrf.mxu1 }
 0x22b   :  { %v928_v7 = vadd.f32 %v5775_v37, %v6512_v0  ;;  %v986_v37 = vmax.f32 %v864_v11, 0.0  ;;  %v999_v26 = vmax.f32 %v917_v14, 0.0  ;;  %v997_v46 = vmax.f32 %v909_v15, 0.0  ;;  %v6198_v11 = vld [vmem:[%s7796_s0 + $0x178] sm:$0xff]   ;;  %v1155_v14 = vld [vmem:[#allocation2 + $0x1] sm:$0x1] }
 0x22c   :  { %v919_v16 = vpop.f32.mrf.mxu1 }
 0x22d   :  { %v1002_v8 = vmax.f32 %v928_v7, 0.0  ;;  %v6196_v7 = vld [vmem:[%s7796_s0 + $0x168] sm:$0xff]  }
 0x22e   :  { %v5778_v17 = vpop.f32.mrf.mxu1 }
 0x22f   :  { %v941_v43 = vadd.f32 %v5778_v17, %v6512_v0  ;;  %v988_v17 = vmax.f32 %v872_v1, 0.0  ;;  %v6191_v1 = vld [vmem:[%s7796_s0 + $0x140] sm:$0xff]  }
 0x230   :  { %v932_v51 = vpop.f32.mrf.mxu1 }
 0x231   :  { %v1005_v38 = vmax.f32 %v941_v43, 0.0  ;;  %v933_v52 = vadd.f32 %v6512_v0, %v932_v51  ;;  %v861_v51 = vadd.f32 %v6662_v55, %v6512_v0  ;;  %v853_v55 = vadd.f32 %v6512_v0, %v6664_v4 }
 0x232   :  { %v5779_v18 = vpop.f32.mrf.mxu1  ;;  %v845_v4 = vadd.f32 %v6654_v57, %v6512_v0  ;;  %v837_v57 = vadd.f32 %v6512_v0, %v6656_v2 }
 0x233   :  { %v944_v45 = vadd.f32 %v5779_v18, %v6512_v0  ;;  %v1003_v18 = vmax.f32 %v933_v52, 0.0  ;;  %v6193_v52 = vld [vmem:[%s7796_s0 + $0x150] sm:$0xff]  }
 0x234   :  { %v935_v35 = vpop.f32.mrf.mxu1 }
 0x235   :  { %v1006_v40 = vmax.f32 %v944_v45, 0.0  ;;  %v936_v54 = vadd.f32 %v6512_v0, %v935_v35  ;;  %v987_v35 = vmax.f32 %v869_v10, 0.0  ;;  %v995_v45 = vmax.f32 %v901_v12, 0.0  ;;  %v6195_v10 = vld [vmem:[%s7796_s0 + $0x160] sm:$0xff]  }
 0x236   :  { %v5782_v19 = vpop.f32.mrf.mxu1 }
 0x237   :  { %v957_v24 = vadd.f32 %v5782_v19, %v6512_v0  ;;  %v1004_v50 = vmax.f32 %v936_v54, 0.0  ;;  %v920_v19 = vadd.f32 %v6512_v0, %v919_v16  ;;  %v912_v16 = vadd.f32 %v6674_v13, %v6512_v0  ;;  %v6189_v54 = vld [vmem:[%s7796_s0 + $0x130] sm:$0xff]  }
 0x238   :  { %v948_v20 = vpop.f32.mrf.mxu1  ;;  %v904_v13 = vadd.f32 %v6512_v0, %v6676_v53 }
 0x239   :  { %v1009_v42 = vmax.f32 %v957_v24, 0.0  ;;  %v949_v47 = vadd.f32 %v6512_v0, %v948_v20  ;;  %v856_v20 = vadd.f32 %v6512_v0, %v6668_v39  ;;  %v1000_v24 = vmax.f32 %v920_v19, 0.0 }
 0x23a   :  { %v5783_v22 = vpop.f32.mrf.mxu1  ;;  %v848_v39 = vadd.f32 %v6658_v41, %v6512_v0  ;;  %v840_v41 = vadd.f32 %v6512_v0, %v6660_v3 }
 0x23b   :  { %v960_v25 = vadd.f32 %v5783_v22, %v6512_v0  ;;  %v1007_v61 = vmax.f32 %v949_v47, 0.0  ;;  %v985_v22 = vmax.f32 %v861_v51, 0.0  ;;  %v981_v47 = vmax.f32 %v845_v4, 0.0  ;;  %v6202_v51 = vld [vmem:[%s7796_s0 + $0x198] sm:$0xff]  }
 0x23c   :  { %v951_v27 = vpop.f32.mrf.mxu1  ;;  %v980_v53 = vmax.f32 %v840_v41, 0.0 }
 0x23d   :  { %v1010_v28 = vmax.f32 %v960_v25, 0.0  ;;  %v952_v32 = vadd.f32 %v6512_v0, %v951_v27  ;;  %v984_v25 = vmax.f32 %v856_v20, 0.0 }
 0x23e   :  { %v5786_v21 = vpop.f32.mrf.mxu1 }
 0x23f   :  { %5279 = vmatprep.subr.mxu0 %v1010_v28  ;;  %v1008_v58 = vmax.f32 %v952_v32, 0.0  ;;  %v983_v28 = vmax.f32 %v853_v55, 0.0  ;;  %v998_v32 = vmax.f32 %v912_v16, 0.0  ;;  %v973_v59 = vadd.f32 %v5786_v21, %v6512_v0 }
 0x240   :  { %5280 = vmatpush3.msra.mxu0 %v994_v44  ;;  %v964_v27 = vpop.f32.mrf.mxu1  ;;  %v982_v44 = vmax.f32 %v848_v39, 0.0 }
 0x241   :  { %5281 = vmatprep.subr.mxu0 %v1009_v42  ;;  %v1013_v2 = vmax.f32 %v973_v59, 0.0  ;;  %v965_v43 = vadd.f32 %v6512_v0, %v964_v27 }
 0x242   :  { %5282 = vmatpush3.msra.mxu0 %v993_v48  ;;  %v5787_v42 = vpop.f32.mrf.mxu1  ;;  %v996_v48 = vmax.f32 %v904_v13, 0.0 }
 0x243   :  { %5283 = vmatprep.subr.mxu0 %v1008_v58  ;;  %v976_v49 = vadd.f32 %v5787_v42, %v6512_v0  ;;  %v979_v58 = vmax.f32 %v837_v57, 0.0  ;;  %v1011_v56 = vmax.f32 %v965_v43, 0.0 }
 0x244   :  { %5284 = vmatpush3.msra.mxu0 %v992_v60  ;;  %v967_v3 = vpop.f32.mrf.mxu1 }
 0x245   :  { %5285 = vmatprep.subr.mxu0 %v1007_v61  ;;  %v1014_v34 = vmax.f32 %v976_v49, 0.0  ;;  %v968_v60 = vadd.f32 %v6512_v0, %v967_v3 }
 0x246   :  { %5286 = vmatpush3.msra.mxu0 %v991_v62  ;;  %v6187_v62 = vld [vmem:[%s7796_s0 + $0x120] sm:$0xff]  }
 0x247   :  { %5287 = vmatprep.subr.mxu0 %v1006_v40  ;;  %v1012_v61 = vmax.f32 %v968_v60, 0.0  ;;  %v6188_v40 = vld [vmem:[%s7796_s0 + $0x128] sm:$0xff]  }
 0x248   :  { %5288 = vmatpush3.msra.mxu0 %v990_v63  ;;  %v6190_v63 = vld [vmem:[%s7796_s0 + $0x138] sm:$0xff]  }
 0x249   :  { %5289 = vmatprep.subr.mxu0 %v1005_v38  ;;  %v6192_v38 = vld [vmem:[%s7796_s0 + $0x148] sm:$0xff]  }
 0x24a   :  { %5290 = vmatpush3.msra.mxu0 %v989_v36  ;;  %v6194_v36 = vld [vmem:[%s7796_s0 + $0x158] sm:$0xff]  }
 0x24b   :  { %5291 = vmatprep.subr.mxu0 %v1004_v50  ;;  %v6197_v50 = vld [vmem:[%s7796_s0 + $0x170] sm:$0xff]  }
 0x24c   :  { %5292 = vmatpush3.msra.mxu0 %v988_v17  ;;  %v6199_v17 = vld [vmem:[%s7796_s0 + $0x180] sm:$0xff]  }
 0x24d   :  { %5293 = vmatprep.subr.mxu0 %v1003_v18  ;;  %v6201_v18 = vld [vmem:[%s7796_s0 + $0x190] sm:$0xff]  }
 0x24e   :  { %5294 = vmatpush3.msra.mxu0 %v987_v35  ;;  %v6203_v35 = vld [vmem:[%s7796_s0 + $0x1a0] sm:$0xff]  }
 0x24f   :  { %5295 = vmatprep.subr.mxu0 %v1002_v8  ;;  %v6204_v8 = vld [vmem:[%s7796_s0 + $0x1a8] sm:$0xff]  }
 0x250   :  { %5296 = vmatpush3.msra.mxu0 %v986_v37 }
 0x251   :  { %5297 = vmatprep.subr.mxu0 %v1001_v6 }
 0x252   :  { %5298 = vmatpush3.msra.mxu0 %v985_v22 }
 0x253   :  { %5299 = vmatprep.subr.mxu0 %v1000_v24 }
 0x254   :  { %5300 = vmatpush3.msra.mxu0 %v984_v25 }
 0x255   :  { %5301 = vmatprep.subr.mxu0 %v999_v26 }
 0x256   :  { %5302 = vmatpush3.msra.mxu0 %v983_v28 }
 0x257   :  { %5303 = vmatprep.subr.mxu0 %v998_v32 }
 0x258   :  { %5304 = vmatpush3.msra.mxu0 %v982_v44 }
 0x259   :  { %5305 = vmatprep.subr.mxu0 %v997_v46 }
 0x25a   :  { %5306 = vmatpush3.msra.mxu0 %v981_v47 }
 0x25b   :  { %5307 = vmatprep.subr.mxu0 %v996_v48 }
 0x25c   :  { %5308 = vmatpush3.msra.mxu0 %v980_v53 }
 0x25d   :  { %5309 = vmatprep.subr.mxu0 %v995_v45 }
 0x25e   :  { %5310 = vmatpush3.msra.mxu0 %v979_v58 }
 0x25f   :  { %1080 = vmatmul.mubr.f32.vlgmr.msra.gmra.mxu0 %v6476_v30  ;;  %5788 = vmatprep.subr.mxu0 %v6341_v31 }
 0x260   :  { %5789 = vmatpush3.msra.mxu0 %v1014_v34  ;;  %5796 = vmatprep.mubr.msk.f32.mxu0 %vm6342_vm3, %v6341_v31 }
 0x261   :  { %5790 = vmatprep.subr.mxu0 %v6341_v31 }
 0x262   :  { %5791 = vmatpush3.msra.mxu0 %v1013_v2 }
 0x263   :  { %5792 = vmatprep.subr.mxu0 %v6341_v31 }
 0x264   :  { %5793 = vmatpush3.msra.mxu0 %v1012_v61 }
 0x265   :  { %5794 = vmatprep.subr.mxu0 %v6341_v31 }
 0x266   :  { %5795 = vmatpush3.msra.mxu0 %v1011_v56 }
 0x267   :  { %5797 = vmatmul.mubr.msk.f32.vlgmr.msra.gmra.mxu0 %vm475_vm4, %v6481_v33  ;;  %5799 = vmatprep.subr.bf16.mxu0 %v6395_v5 }
 0x268   :  { %5800 = vmatpush3.bf16.msra.mxu0 %v6395_v5  ;;  %5803 = vmatprep.mubr.msk.bf16.mxu0 %vm185_vm2, %v6187_v62 }
 0x269   :  { %5801 = vmatprep.subr.bf16.mxu0 %v6581_v23 }
 0x26c   :  { %5802 = vmatpush3.bf16.msra.mxu0 %v6581_v23 }
 0x26f   :  { %5804 = vmatmul.mubr.msk.bf16.vlgmr.msra.gmra.mxu0 %vm185_vm2, %v6188_v40 }
 0x270   :  { %5807 = vmatprep.mubr.msk.bf16.mxu0 %vm185_vm2, %v6189_v54 }
 0x277   :  { %5808 = vmatmul.mubr.msk.bf16.gmra.mxu0 %vm185_vm2, %v6190_v63 }
 0x278   :  { %5811 = vmatprep.mubr.msk.bf16.mxu0 %vm185_vm2, %v6191_v1 }
 0x27f   :  { %5812 = vmatmul.mubr.msk.bf16.gmra.mxu0 %vm185_vm2, %v6192_v38 }
 0x280   :  { %5815 = vmatprep.mubr.msk.bf16.mxu0 %vm185_vm2, %v6193_v52 }
 0x287   :  { %5816 = vmatmul.mubr.msk.bf16.gmra.mxu0 %vm185_vm2, %v6194_v36 }
 0x288   :  { %5819 = vmatprep.mubr.msk.bf16.mxu0 %vm185_vm2, %v6195_v10 }
 0x28f   :  { %5820 = vmatmul.mubr.msk.bf16.gmra.mxu0 %vm185_vm2, %v6196_v7 }
 0x290   :  { %5823 = vmatprep.mubr.msk.bf16.mxu0 %vm185_vm2, %v6197_v50 }
 0x297   :  { %5824 = vmatmul.mubr.msk.bf16.gmra.mxu0 %vm185_vm2, %v6198_v11 }
 0x298   :  { %5827 = vmatprep.mubr.msk.bf16.mxu0 %vm185_vm2, %v6199_v17 }
 0x29f   :  { %5828 = vmatmul.mubr.msk.bf16.gmra.mxu0 %vm185_vm2, %v6200_v9 }
 0x2a0   :  { %5831 = vmatprep.mubr.msk.bf16.mxu0 %vm185_vm2, %v6201_v18 }
 0x2a7   :  { %5832 = vmatmul.mubr.msk.bf16.gmra.mxu0 %vm185_vm2, %v6202_v51 }
 0x2a8   :  { %5835 = vmatprep.mubr.msk.bf16.mxu0 %vm185_vm2, %v6203_v35 }
 0x2af   :  { %5836 = vmatmul.mubr.msk.bf16.gmra.mxu0 %vm185_vm2, %v6204_v8 }
 0x2b0   :  { %2153 = vmatprep.mubr.f32.mxu0 %v6474_v29 }
 0x31f   :  { %v5311_v19 = vpop.f32.mrf.mxu0 }
 0x321   :  { %v5312_v37 = vpop.f32.mrf.mxu0 }
 0x322   :  { %v5313_v20 = vadd.f32 %v5312_v37, %v5311_v19 }
 0x327   :  { %v1151_v6 = vpop.f32.mrf.mxu0 }
 0x328   :  { %v1152_v21 = vadd.f32 %v5313_v20, %v1151_v6 }
 0x329   :  { %v5798_v22 = vpop.f32.mrf.mxu0 }
 0x32a   :  { %v1156_v55 = vadd.f32 %v1155_v14, %v1152_v21 }
 0x32c   :  { %1157 = vst [vmem:[#allocation2 + $0x1] sm:$0x1] %v1156_v55 }
 0x32f   :  { %v6815_v16 = vpop.f32.mrf.mxu0 }
 0x331   :  { %v6817_v24 = vpop.f32.mrf.mxu0 }
 0x333   :  { %v6819_v39 = vpop.f32.mrf.mxu0 }
 0x335   :  { %v6821_v25 = vpop.f32.mrf.mxu0 }
 0x337   :  { %v6823_v15 = vpop.f32.mrf.mxu0 }
 0x339   :  { %v6825_v26 = vpop.f32.mrf.mxu0 }
 0x33b   :  { %v6827_v27 = vpop.f32.mrf.mxu0 }
 0x33d   :  { %v6829_v4 = vpop.f32.mrf.mxu0 }
 0x33f   :  { %v5813_v28 = vpop.f32.mrf.mxu0 }
 0x340   :  { %v1414_v37 = vadd.f32 %v5813_v28, %v6512_v0 }
 0x341   :  { %v1405_v32 = vpop.f32.mrf.mxu0 }
 0x343   :  { %v5814_v13 = vpop.f32.mrf.mxu0 }
 0x344   :  { %v1417_v51 = vadd.f32 %v5814_v13, %v6512_v0 }
 0x345   :  { %v1408_v44 = vpop.f32.mrf.mxu0 }
 0x346   :  { %v1527_v21 = vmax.f32 %v1417_v51, 0.0  ;;  %v1409_v22 = vadd.f32 %v6512_v0, %v1408_v44 }
 0x347   :  { %v5817_v41 = vpop.f32.mrf.mxu0 }
 0x348   :  { %v1430_v63 = vadd.f32 %v5817_v41, %v6512_v0  ;;  %v1526_v41 = vmax.f32 %v1414_v37, 0.0 }
 0x349   :  { %v1421_v46 = vpop.f32.mrf.mxu0 }
 0x34a   :  { %v1530_v11 = vmax.f32 %v1430_v63, 0.0  ;;  %v1422_v17 = vadd.f32 %v6512_v0, %v1421_v46  ;;  %v1406_v46 = vadd.f32 %v6512_v0, %v1405_v32 }
 0x34b   :  { %v5818_v12 = vpop.f32.mrf.mxu0 }
 0x34c   :  { %v1433_v56 = vadd.f32 %v5818_v12, %v6512_v0  ;;  %v1528_v20 = vmax.f32 %v1422_v17, 0.0 }
 0x34d   :  { %v1424_v42 = vpop.f32.mrf.mxu0 }
 0x34e   :  { %v1531_v36 = vmax.f32 %v1433_v56, 0.0  ;;  %v1425_v10 = vadd.f32 %v6512_v0, %v1424_v42  ;;  %v1401_v42 = vadd.f32 %v6827_v27, %v6512_v0 }
 0x34f   :  { %v6831_v47 = vpop.f32.mrf.mxu0 }
 0x350   :  { %v1529_v35 = vmax.f32 %v1425_v10, 0.0 }
 0x351   :  { %v6833_v57 = vpop.f32.mrf.mxu0 }
 0x353   :  { %v6835_v48 = vpop.f32.mrf.mxu0 }
 0x355   :  { %v6837_v53 = vpop.f32.mrf.mxu0 }
 0x357   :  { %v5825_v49 = vpop.f32.mrf.mxu0 }
 0x358   :  { %v1462_v44 = vadd.f32 %v5825_v49, %v6512_v0 }
 0x359   :  { %v6839_v45 = vpop.f32.mrf.mxu0 }
 0x35a   :  { %v1538_v27 = vmax.f32 %v1462_v44, 0.0  ;;  %v1454_v49 = vadd.f32 %v6512_v0, %v6839_v45  ;;  %v1446_v45 = vadd.f32 %v6831_v47, %v6512_v0  ;;  %v1438_v47 = vadd.f32 %v6512_v0, %v6833_v57  ;;  %v6219_v44 = vld [vmem:[%s7796_s0 + $0x220] sm:$0xff]  }
 0x35b   :  { %v5826_v3 = vpop.f32.mrf.mxu0 }
 0x35c   :  { %v1465_v28 = vadd.f32 %v5826_v3, %v6512_v0  ;;  %v1523_v3 = vmax.f32 %v1401_v42, 0.0  ;;  %v1536_v63 = vmax.f32 %v1454_v49, 0.0  ;;  %v1534_v10 = vmax.f32 %v1446_v45, 0.0  ;;  %v6217_v42 = vld [vmem:[%s7796_s0 + $0x210] sm:$0xff]  }
 0x35d   :  { %v1456_v58 = vpop.f32.mrf.mxu0 }
 0x35e   :  { %v1539_v32 = vmax.f32 %v1465_v28, 0.0  ;;  %v6215_v28 = vld [vmem:[%s7796_s0 + $0x200] sm:$0xff]  }
 0x35f   :  { %v5829_v59 = vpop.f32.mrf.mxu0 }
 0x360   :  { %v1478_v8 = vadd.f32 %v5829_v59, %v6512_v0  ;;  %v1525_v59 = vmax.f32 %v1409_v22, 0.0  ;;  %v6209_v22 = vld [vmem:[%s7796_s0 + $0x1d0] sm:$0xff]  }
 0x361   :  { %v1469_v34 = vpop.f32.mrf.mxu0 }
 0x362   :  { %v1542_v55 = vmax.f32 %v1478_v8, 0.0  ;;  %v1470_v13 = vadd.f32 %v6512_v0, %v1469_v34  ;;  %v1398_v34 = vadd.f32 %v6823_v15, %v6512_v0  ;;  %v1390_v15 = vadd.f32 %v6512_v0, %v6825_v26  ;;  %v6894_v8 = vld [vmem:[%s7799_s3] ss:$0 sm:$0xff] }
 0x363   :  { %v5830_v60 = vpop.f32.mrf.mxu0  ;;  %v1382_v26 = vadd.f32 %v6815_v16, %v6512_v0  ;;  %v1374_v16 = vadd.f32 %v6512_v0, %v6817_v24 }
 0x364   :  { %v1481_v9 = vadd.f32 %v5830_v60, %v6512_v0  ;;  %v1540_v60 = vmax.f32 %v1470_v13, 0.0  ;;  %v6212_v13 = vld [vmem:[%s7796_s0 + $0x1e8] sm:$0xff]  }
 0x365   :  { %v1472_v2 = vpop.f32.mrf.mxu0 }
 0x366   :  { %v1543_v6 = vmax.f32 %v1481_v9, 0.0  ;;  %v1473_v14 = vadd.f32 %v6512_v0, %v1472_v2  ;;  %v1524_v2 = vmax.f32 %v1406_v46, 0.0  ;;  %v1532_v9 = vmax.f32 %v1438_v47, 0.0  ;;  %v6214_v46 = vld [vmem:[%s7796_s0 + $0x1f8] sm:$0xff]  }
 0x367   :  { %v5833_v43 = vpop.f32.mrf.mxu0 }
 0x368   :  { %v1494_v40 = vadd.f32 %v5833_v43, %v6512_v0  ;;  %v1541_v12 = vmax.f32 %v1473_v14, 0.0  ;;  %v1457_v43 = vadd.f32 %v6512_v0, %v1456_v58  ;;  %v1449_v58 = vadd.f32 %v6835_v48, %v6512_v0  ;;  %v6207_v14 = vld [vmem:[%s7796_s0 + $0x1c0] sm:$0xff]  }
 0x369   :  { %v1485_v61 = vpop.f32.mrf.mxu0  ;;  %v1441_v48 = vadd.f32 %v6512_v0, %v6837_v53 }
 0x36a   :  { %v1546_v7 = vmax.f32 %v1494_v40, 0.0  ;;  %v1486_v50 = vadd.f32 %v6512_v0, %v1485_v61  ;;  %v1393_v61 = vadd.f32 %v6512_v0, %v6829_v4  ;;  %v1537_v40 = vmax.f32 %v1457_v43, 0.0 }
 0x36b   :  { %v5834_v62 = vpop.f32.mrf.mxu0  ;;  %v1385_v4 = vadd.f32 %v6819_v39, %v6512_v0  ;;  %v1377_v39 = vadd.f32 %v6512_v0, %v6821_v25 }
 0x36c   :  { %v1497_v54 = vadd.f32 %v5834_v62, %v6512_v0  ;;  %v1544_v19 = vmax.f32 %v1486_v50, 0.0  ;;  %v1522_v62 = vmax.f32 %v1398_v34, 0.0  ;;  %v1518_v50 = vmax.f32 %v1382_v26, 0.0  ;;  %v6221_v34 = vld [vmem:[%s7796_s0 + $0x230] sm:$0xff]  }
 0x36d   :  { %v1488_v1 = vpop.f32.mrf.mxu0  ;;  %v1517_v53 = vmax.f32 %v1377_v39, 0.0 }
 0x36e   :  { %v1547_v38 = vmax.f32 %v1497_v54, 0.0  ;;  %v1489_v52 = vadd.f32 %v6512_v0, %v1488_v1  ;;  %v1521_v54 = vmax.f32 %v1393_v61, 0.0 }
 0x36f   :  { %v5837_v56 = vpop.f32.mrf.mxu0 }
 0x370   :  { %5339 = vmatprep.subr.mxu1 %v1547_v38  ;;  %v1545_v18 = vmax.f32 %v1489_v52, 0.0  ;;  %v1520_v38 = vmax.f32 %v1390_v15, 0.0  ;;  %v1535_v52 = vmax.f32 %v1449_v58, 0.0  ;;  %v1510_v51 = vadd.f32 %v5837_v56, %v6512_v0 }
 0x371   :  { %5340 = vmatpush3.msra.mxu1 %v1531_v36  ;;  %v1501_v1 = vpop.f32.mrf.mxu0  ;;  %v1519_v36 = vmax.f32 %v1385_v4, 0.0 }
 0x372   :  { %5341 = vmatprep.subr.mxu1 %v1546_v7  ;;  %v1550_v24 = vmax.f32 %v1510_v51, 0.0 }
 0x373   :  { %5342 = vmatpush3.msra.mxu1 %v1530_v11  ;;  %v5838_v7 = vpop.f32.mrf.mxu0  ;;  %v1533_v11 = vmax.f32 %v1441_v48, 0.0 }
 0x374   :  { %5343 = vmatprep.subr.mxu1 %v1545_v18  ;;  %v1513_v17 = vadd.f32 %v5838_v7, %v6512_v0  ;;  %v1516_v18 = vmax.f32 %v1374_v16, 0.0 }
 0x375   :  { %5344 = vmatpush3.msra.mxu1 %v1529_v35  ;;  %v1504_v25 = vpop.f32.mrf.mxu0 }
 0x376   :  { %5345 = vmatprep.subr.mxu1 %v1544_v19  ;;  %v1551_v57 = vmax.f32 %v1513_v17, 0.0  ;;  %v1505_v35 = vadd.f32 %v6512_v0, %v1504_v25  ;;  %v1502_v19 = vadd.f32 %v6894_v8, %v1501_v1 }
 0x377   :  { %5346 = vmatpush3.msra.mxu1 %v1528_v20  ;;  %v6205_v20 = vld [vmem:[%s7796_s0 + $0x1b0] sm:$0xff]  }
 0x378   :  { %5347 = vmatprep.subr.mxu1 %v1543_v6  ;;  %v1549_v0 = vmax.f32 %v1505_v35, 0.0  ;;  %v1548_v37 = vmax.f32 %v1502_v19, 0.0  ;;  %v6206_v6 = vld [vmem:[%s7796_s0 + $0x1b8] sm:$0xff]  }
 0x379   :  { %5348 = vmatpush3.msra.mxu1 %v1527_v21  ;;  %v6208_v21 = vld [vmem:[%s7796_s0 + $0x1c8] sm:$0xff]  }
 0x37a   :  { %5349 = vmatprep.subr.mxu1 %v1542_v55  ;;  %v6211_v55 = vld [vmem:[%s7796_s0 + $0x1e0] sm:$0xff]  }
 0x37b   :  { %5350 = vmatpush3.msra.mxu1 %v1526_v41  ;;  %v6213_v41 = vld [vmem:[%s7796_s0 + $0x1f0] sm:$0xff]  }
 0x37c   :  { %5351 = vmatprep.subr.mxu1 %v1541_v12  ;;  %v6216_v12 = vld [vmem:[%s7796_s0 + $0x208] sm:$0xff]  }
 0x37d   :  { %5352 = vmatpush3.msra.mxu1 %v1525_v59  ;;  %v6218_v59 = vld [vmem:[%s7796_s0 + $0x218] sm:$0xff]  }
 0x37e   :  { %5353 = vmatprep.subr.mxu1 %v1540_v60  ;;  %v6220_v60 = vld [vmem:[%s7796_s0 + $0x228] sm:$0xff]  }
 0x37f   :  { %5354 = vmatpush3.msra.mxu1 %v1524_v2  ;;  %v6222_v2 = vld [vmem:[%s7796_s0 + $0x238] sm:$0xff]  }
 0x380   :  { %5355 = vmatprep.subr.mxu1 %v1539_v32 }
 0x381   :  { %5356 = vmatpush3.msra.mxu1 %v1523_v3 }
 0x382   :  { %5357 = vmatprep.subr.mxu1 %v1538_v27  ;;  %v1692_v27 = vld [vmem:[#allocation2 + $0x2] sm:$0x1] }
 0x383   :  { %5358 = vmatpush3.msra.mxu1 %v1522_v62 }
 0x384   :  { %5359 = vmatprep.subr.mxu1 %v1537_v40 }
 0x385   :  { %5360 = vmatpush3.msra.mxu1 %v1521_v54 }
 0x386   :  { %5361 = vmatprep.subr.mxu1 %v1536_v63 }
 0x387   :  { %5362 = vmatpush3.msra.mxu1 %v1520_v38 }
 0x388   :  { %5363 = vmatprep.subr.mxu1 %v1535_v52 }
 0x389   :  { %5364 = vmatpush3.msra.mxu1 %v1519_v36 }
 0x38a   :  { %5365 = vmatprep.subr.mxu1 %v1534_v10 }
 0x38b   :  { %5366 = vmatpush3.msra.mxu1 %v1518_v50 }
 0x38c   :  { %5367 = vmatprep.subr.mxu1 %v1533_v11 }
 0x38d   :  { %5368 = vmatpush3.msra.mxu1 %v1517_v53 }
 0x38e   :  { %5369 = vmatprep.subr.mxu1 %v1532_v9 }
 0x38f   :  { %5370 = vmatpush3.msra.mxu1 %v1516_v18 }
 0x390   :  { %1617 = vmatmul.mubr.f32.vlgmr.msra.gmra.mxu1 %v6476_v30  ;;  %5839 = vmatprep.subr.mxu1 %v6341_v31 }
 0x391   :  { %5840 = vmatpush3.msra.mxu1 %v1551_v57  ;;  %5847 = vmatprep.mubr.msk.f32.mxu1 %vm6342_vm3, %v6341_v31 }
 0x392   :  { %5841 = vmatprep.subr.mxu1 %v6341_v31 }
 0x393   :  { %5842 = vmatpush3.msra.mxu1 %v1550_v24 }
 0x394   :  { %5843 = vmatprep.subr.mxu1 %v6341_v31 }
 0x395   :  { %5844 = vmatpush3.msra.mxu1 %v1549_v0 }
 0x396   :  { %5845 = vmatprep.subr.mxu1 %v6341_v31 }
 0x397   :  { %5846 = vmatpush3.msra.mxu1 %v1548_v37 }
 0x398   :  { %5848 = vmatmul.mubr.msk.f32.vlgmr.msra.gmra.mxu1 %vm475_vm4, %v6481_v33  ;;  %5850 = vmatprep.subr.bf16.mxu1 %v6395_v5 }
 0x399   :  { %5851 = vmatpush3.bf16.msra.mxu1 %v6395_v5  ;;  %5854 = vmatprep.mubr.msk.bf16.mxu1 %vm185_vm2, %v6205_v20 }
 0x39a   :  { %5852 = vmatprep.subr.bf16.mxu1 %v6581_v23 }
 0x39d   :  { %5853 = vmatpush3.bf16.msra.mxu1 %v6581_v23  ;;  %v6210_v23 = vld [vmem:[%s7796_s0 + $0x1d8] sm:$0xff]  }
 0x3a0   :  { %5855 = vmatmul.mubr.msk.bf16.vlgmr.msra.gmra.mxu1 %vm185_vm2, %v6206_v6 }
 0x3a1   :  { %5858 = vmatprep.mubr.msk.bf16.mxu1 %vm185_vm2, %v6207_v14 }
 0x3a8   :  { %5859 = vmatmul.mubr.msk.bf16.gmra.mxu1 %vm185_vm2, %v6208_v21 }
 0x3a9   :  { %5862 = vmatprep.mubr.msk.bf16.mxu1 %vm185_vm2, %v6209_v22 }
 0x3b0   :  { %5863 = vmatmul.mubr.msk.bf16.gmra.mxu1 %vm185_vm2, %v6210_v23 }
 0x3b1   :  { %5866 = vmatprep.mubr.msk.bf16.mxu1 %vm185_vm2, %v6211_v55 }
 0x3b8   :  { %5867 = vmatmul.mubr.msk.bf16.gmra.mxu1 %vm185_vm2, %v6212_v13 }
 0x3b9   :  { %5870 = vmatprep.mubr.msk.bf16.mxu1 %vm185_vm2, %v6213_v41 }
 0x3c0   :  { %5871 = vmatmul.mubr.msk.bf16.gmra.mxu1 %vm185_vm2, %v6214_v46 }
 0x3c1   :  { %5874 = vmatprep.mubr.msk.bf16.mxu1 %vm185_vm2, %v6215_v28 }
 0x3c8   :  { %5875 = vmatmul.mubr.msk.bf16.gmra.mxu1 %vm185_vm2, %v6216_v12 }
 0x3c9   :  { %5878 = vmatprep.mubr.msk.bf16.mxu1 %vm185_vm2, %v6217_v42 }
 0x3d0   :  { %5879 = vmatmul.mubr.msk.bf16.gmra.mxu1 %vm185_vm2, %v6218_v59 }
 0x3d1   :  { %5882 = vmatprep.mubr.msk.bf16.mxu1 %vm185_vm2, %v6219_v44 }
 0x3d8   :  { %5883 = vmatmul.mubr.msk.bf16.gmra.mxu1 %vm185_vm2, %v6220_v60 }
 0x3d9   :  { %5886 = vmatprep.mubr.msk.bf16.mxu1 %vm185_vm2, %v6221_v34 }
 0x3e0   :  { %5887 = vmatmul.mubr.msk.bf16.gmra.mxu1 %vm185_vm2, %v6222_v2 }
 0x3e1   :  { %2690 = vmatprep.mubr.f32.mxu1 %v6474_v29 }
 0x450   :  { %v5371_v32 = vpop.f32.mrf.mxu1 }
 0x452   :  { %v5372_v43 = vpop.f32.mrf.mxu1 }
 0x453   :  { %v5373_v3 = vadd.f32 %v5372_v43, %v5371_v32 }
 0x458   :  { %v1688_v61 = vpop.f32.mrf.mxu1 }
 0x459   :  { %v1689_v49 = vadd.f32 %v5373_v3, %v1688_v61 }
 0x45a   :  { %v5849_v56 = vpop.f32.mrf.mxu1 }
 0x45b   :  { %v1693_v62 = vadd.f32 %v1692_v27, %v1689_v49 }
 0x45d   :  { %1694 = vst [vmem:[#allocation2 + $0x2] sm:$0x1] %v1693_v62 }
 0x460   :  { %v6981_v15 = vpop.f32.mrf.mxu1 }
 0x462   :  { %v6983_v58 = vpop.f32.mrf.mxu1 }
 0x464   :  { %v6985_v40 = vpop.f32.mrf.mxu1 }
 0x466   :  { %v6987_v4 = vpop.f32.mrf.mxu1 }
 0x468   :  { %v6989_v54 = vpop.f32.mrf.mxu1 }
 0x46a   :  { %v6991_v45 = vpop.f32.mrf.mxu1 }
 0x46c   :  { %v6993_v63 = vpop.f32.mrf.mxu1 }
 0x46e   :  { %v6995_v1 = vpop.f32.mrf.mxu1 }
 0x470   :  { %v5864_v26 = vpop.f32.mrf.mxu1 }
 0x471   :  { %v1951_v32 = vadd.f32 %v6894_v8, %v5864_v26 }
 0x472   :  { %v1942_v38 = vpop.f32.mrf.mxu1 }
 0x474   :  { %v5865_v52 = vpop.f32.mrf.mxu1 }
 0x475   :  { %v1954_v44 = vadd.f32 %v6894_v8, %v5865_v52  ;;  %v2063_v52 = vmax.f32 %v1951_v32, 0.0  ;;  %v6223_v32 = vld [vmem:[%s7796_s0 + $0x240] sm:$0xff]  }
 0x476   :  { %v1945_v48 = vpop.f32.mrf.mxu1 }
 0x477   :  { %v2064_v27 = vmax.f32 %v1954_v44, 0.0  ;;  %v1946_v49 = vadd.f32 %v6894_v8, %v1945_v48 }
 0x478   :  { %v5868_v36 = vpop.f32.mrf.mxu1 }
 0x479   :  { %v1967_v14 = vadd.f32 %v6894_v8, %v5868_v36  ;;  %v1943_v36 = vadd.f32 %v6894_v8, %v1942_v38 }
 0x47a   :  { %v1958_v39 = vpop.f32.mrf.mxu1 }
 0x47b   :  { %v2067_v28 = vmax.f32 %v1967_v14, 0.0  ;;  %v1959_v12 = vadd.f32 %v6894_v8, %v1958_v39 }
 0x47c   :  { %v5869_v10 = vpop.f32.mrf.mxu1 }
 0x47d   :  { %v1970_v0 = vadd.f32 %v6894_v8, %v5869_v10  ;;  %v2065_v43 = vmax.f32 %v1959_v12, 0.0  ;;  %v1938_v10 = vadd.f32 %v6894_v8, %v6993_v63 }
 0x47e   :  { %v1961_v47 = vpop.f32.mrf.mxu1 }
 0x47f   :  { %v2068_v55 = vmax.f32 %v1970_v0, 0.0  ;;  %v1962_v13 = vadd.f32 %v6894_v8, %v1961_v47  ;;  %v2062_v47 = vmax.f32 %v1946_v49, 0.0  ;;  %v6227_v49 = vld [vmem:[%s7796_s0 + $0x260] sm:$0xff]  }
 0x480   :  { %v6997_v7 = vpop.f32.mrf.mxu1 }
 0x481   :  { %v2066_v60 = vmax.f32 %v1962_v13, 0.0 }
 0x482   :  { %v6999_v50 = vpop.f32.mrf.mxu1 }
 0x484   :  { %v7001_v16 = vpop.f32.mrf.mxu1 }
 0x486   :  { %v7003_v11 = vpop.f32.mrf.mxu1 }
 0x488   :  { %v5876_v53 = vpop.f32.mrf.mxu1 }
 0x489   :  { %v1999_v48 = vadd.f32 %v6894_v8, %v5876_v53 }
 0x48a   :  { %v7005_v17 = vpop.f32.mrf.mxu1 }
 0x48b   :  { %v2075_v63 = vmax.f32 %v1999_v48, 0.0  ;;  %v1991_v53 = vadd.f32 %v6894_v8, %v7005_v17  ;;  %v1983_v17 = vadd.f32 %v6894_v8, %v6997_v7  ;;  %v1975_v7 = vadd.f32 %v6894_v8, %v6999_v50  ;;  %v6236_v48 = vld [vmem:[%s7796_s0 + $0x2a8] sm:$0xff]  }
 0x48c   :  { %v5877_v9 = vpop.f32.mrf.mxu1 }
 0x48d   :  { %v2002_v26 = vadd.f32 %v6894_v8, %v5877_v9  ;;  %v2060_v9 = vmax.f32 %v1938_v10, 0.0  ;;  %v2069_v12 = vmax.f32 %v1975_v7, 0.0  ;;  %v6234_v10 = vld [vmem:[%s7796_s0 + $0x298] sm:$0xff]  }
 0x48e   :  { %v1993_v25 = vpop.f32.mrf.mxu1 }
 0x48f   :  { %v2076_v38 = vmax.f32 %v2002_v26, 0.0  ;;  %v6232_v26 = vld [vmem:[%s7796_s0 + $0x288] sm:$0xff]  }
 0x490   :  { %v5880_v18 = vpop.f32.mrf.mxu1 }
 0x491   :  { %v2015_v34 = vadd.f32 %v6894_v8, %v5880_v18 }
 0x492   :  { %v2006_v51 = vpop.f32.mrf.mxu1 }
 0x493   :  { %v2079_v56 = vmax.f32 %v2015_v34, 0.0  ;;  %v2007_v62 = vadd.f32 %v6894_v8, %v2006_v51  ;;  %v1935_v51 = vadd.f32 %v6894_v8, %v6989_v54  ;;  %v1927_v54 = vadd.f32 %v6894_v8, %v6991_v45 }
 0x494   :  { %v5881_v57 = vpop.f32.mrf.mxu1  ;;  %v1919_v45 = vadd.f32 %v6894_v8, %v6981_v15  ;;  %v1911_v15 = vadd.f32 %v6894_v8, %v6983_v58 }
 0x495   :  { %v2018_v42 = vadd.f32 %v6894_v8, %v5881_v57  ;;  %v2077_v18 = vmax.f32 %v2007_v62, 0.0  ;;  %v2061_v57 = vmax.f32 %v1943_v36, 0.0  ;;  %v2059_v0 = vmax.f32 %v1935_v51, 0.0  ;;  %v6229_v62 = vld [vmem:[%s7796_s0 + $0x270] sm:$0xff]   ;;  %v6231_v36 = vld [vmem:[%s7796_s0 + $0x280] sm:$0xff]   ;;  %v6238_v51 = vld [vmem:[%s7796_s0 + $0x2b8] sm:$0xff]  }
 0x496   :  { %v2009_v35 = vpop.f32.mrf.mxu1 }
 0x497   :  { %v2080_v3 = vmax.f32 %v2018_v42, 0.0  ;;  %v2010_v61 = vadd.f32 %v6894_v8, %v2009_v35  ;;  %v1994_v35 = vadd.f32 %v6894_v8, %v1993_v25  ;;  %v1986_v25 = vadd.f32 %v6894_v8, %v7001_v16 }
 0x498   :  { %v5884_v24 = vpop.f32.mrf.mxu1  ;;  %v1978_v16 = vadd.f32 %v6894_v8, %v7003_v11  ;;  %v2053_v42 = vmax.f32 %v1911_v15, 0.0 }
 0x499   :  { %v2031_v20 = vadd.f32 %v6894_v8, %v5884_v24  ;;  %v2078_v39 = vmax.f32 %v2010_v61, 0.0  ;;  %v1930_v24 = vadd.f32 %v6894_v8, %v6995_v1  ;;  %v1922_v1 = vadd.f32 %v6894_v8, %v6985_v40  ;;  %v6225_v61 = vld [vmem:[%s7796_s0 + $0x250] sm:$0xff]  }
 0x49a   :  { %v2022_v19 = vpop.f32.mrf.mxu1  ;;  %v1914_v40 = vadd.f32 %v6894_v8, %v6987_v4 }
 0x49b   :  { %v2083_v41 = vmax.f32 %v2031_v20, 0.0  ;;  %v2023_v46 = vadd.f32 %v6894_v8, %v2022_v19  ;;  %v2058_v20 = vmax.f32 %v1930_v24, 0.0 }
 0x49c   :  { %v5885_v37 = vpop.f32.mrf.mxu1  ;;  %v2054_v11 = vmax.f32 %v1914_v40, 0.0 }
 0x49d   :  { %v2034_v6 = vadd.f32 %v6894_v8, %v5885_v37  ;;  %v2081_v2 = vmax.f32 %v2023_v46, 0.0  ;;  %v2074_v37 = vmax.f32 %v1994_v35, 0.0  ;;  %v2070_v46 = vmax.f32 %v1978_v16, 0.0 }
 0x49e   :  { %v2025_v21 = vpop.f32.mrf.mxu1 }
 0x49f   :  { %v2084_v22 = vmax.f32 %v2034_v6, 0.0  ;;  %v2026_v23 = vadd.f32 %v6894_v8, %v2025_v21  ;;  %v2073_v6 = vmax.f32 %v1991_v53, 0.0  ;;  %v2057_v21 = vmax.f32 %v1927_v54, 0.0  ;;  %v2229_v53 = vld [vmem:[#allocation2 + $0x3] sm:$0x1] }
 0x4a0   :  { %v5888_v19 = vpop.f32.mrf.mxu1 }
 0x4a1   :  { %5399 = vmatprep.subr.mxu0 %v2084_v22  ;;  %v2082_v59 = vmax.f32 %v2026_v23, 0.0  ;;  %v2072_v22 = vmax.f32 %v1986_v25, 0.0  ;;  %v2056_v23 = vmax.f32 %v1922_v1, 0.0 }
 0x4a2   :  { %5400 = vmatpush3.msra.mxu0 %v2068_v55  ;;  %v2038_v14 = vpop.f32.mrf.mxu1  ;;  %v2071_v55 = vmax.f32 %v1983_v17, 0.0 }
 0x4a3   :  { %5401 = vmatprep.subr.mxu0 %v2083_v41  ;;  %v2055_v41 = vmax.f32 %v1919_v45, 0.0 }
 0x4a4   :  { %5402 = vmatpush3.msra.mxu0 %v2067_v28  ;;  %v5889_v13 = vpop.f32.mrf.mxu1 }
 0x4a5   :  { %5403 = vmatprep.subr.mxu0 %v2082_v59  ;;  %v2050_v28 = vadd.f32 %v6894_v8, %v5889_v13  ;;  %v2047_v59 = vadd.f32 %v6894_v8, %v5888_v19 }
 0x4a6   :  { %5404 = vmatpush3.msra.mxu0 %v2066_v60  ;;  %v2041_v4 = vpop.f32.mrf.mxu1  ;;  %v2039_v60 = vadd.f32 %v6894_v8, %v2038_v14 }
 0x4a7   :  { %5405 = vmatprep.subr.mxu0 %v2081_v2  ;;  %v2088_v50 = vmax.f32 %v2050_v28, 0.0  ;;  %v2042_v44 = vadd.f32 %v6894_v8, %v2041_v4  ;;  %v2087_v58 = vmax.f32 %v2047_v59, 0.0 }
 0x4a8   :  { %5406 = vmatpush3.msra.mxu0 %v2065_v43  ;;  %v2085_v2 = vmax.f32 %v2039_v60, 0.0  ;;  %v7074_v43 = vld [vmem:[%s7798_s2] sm:$0xff]  }
 0x4a9   :  { %5407 = vmatprep.subr.mxu0 %v2080_v3  ;;  %v2086_v34 = vmax.f32 %v2042_v44, 0.0  ;;  %v6224_v3 = vld [vmem:[%s7796_s0 + $0x248] sm:$0xff]  }
 0x4aa   :  { %5408 = vmatpush3.msra.mxu0 %v2064_v27  ;;  %v6226_v27 = vld [vmem:[%s7796_s0 + $0x258] sm:$0xff]  }
 0x4ab   :  { %5409 = vmatprep.subr.mxu0 %v2079_v56  ;;  %v6228_v56 = vld [vmem:[%s7796_s0 + $0x268] sm:$0xff]  }
 0x4ac   :  { %5410 = vmatpush3.msra.mxu0 %v2063_v52  ;;  %v6230_v52 = vld [vmem:[%s7796_s0 + $0x278] sm:$0xff]  }
 0x4ad   :  { %5411 = vmatprep.subr.mxu0 %v2078_v39  ;;  %v6233_v39 = vld [vmem:[%s7796_s0 + $0x290] sm:$0xff]  }
 0x4ae   :  { %5412 = vmatpush3.msra.mxu0 %v2062_v47  ;;  %v6235_v47 = vld [vmem:[%s7796_s0 + $0x2a0] sm:$0xff]  }
 0x4af   :  { %5413 = vmatprep.subr.mxu0 %v2077_v18  ;;  %v6237_v18 = vld [vmem:[%s7796_s0 + $0x2b0] sm:$0xff]  }
 0x4b0   :  { %5414 = vmatpush3.msra.mxu0 %v2061_v57  ;;  %v6239_v57 = vld [vmem:[%s7796_s0 + $0x2c0] sm:$0xff]  }
 0x4b1   :  { %5415 = vmatprep.subr.mxu0 %v2076_v38  ;;  %v6240_v38 = vld [vmem:[%s7796_s0 + $0x2c8] sm:$0xff]  }
 0x4b2   :  { %5416 = vmatpush3.msra.mxu0 %v2060_v9 }
 0x4b3   :  { %5417 = vmatprep.subr.mxu0 %v2075_v63 }
 0x4b4   :  { %5418 = vmatpush3.msra.mxu0 %v2059_v0 }
 0x4b5   :  { %5419 = vmatprep.subr.mxu0 %v2074_v37 }
 0x4b6   :  { %5420 = vmatpush3.msra.mxu0 %v2058_v20 }
 0x4b7   :  { %5421 = vmatprep.subr.mxu0 %v2073_v6 }
 0x4b8   :  { %5422 = vmatpush3.msra.mxu0 %v2057_v21 }
 0x4b9   :  { %5423 = vmatprep.subr.mxu0 %v2072_v22 }
 0x4ba   :  { %5424 = vmatpush3.msra.mxu0 %v2056_v23 }
 0x4bb   :  { %5425 = vmatprep.subr.mxu0 %v2071_v55 }
 0x4bc   :  { %5426 = vmatpush3.msra.mxu0 %v2055_v41 }
 0x4bd   :  { %5427 = vmatprep.subr.mxu0 %v2070_v46 }
 0x4be   :  { %5428 = vmatpush3.msra.mxu0 %v2054_v11 }
 0x4bf   :  { %5429 = vmatprep.subr.mxu0 %v2069_v12 }
 0x4c0   :  { %5430 = vmatpush3.msra.mxu0 %v2053_v42 }
 0x4c1   :  { %2154 = vmatmul.mubr.f32.vlgmr.msra.gmra.mxu0 %v6476_v30  ;;  %5890 = vmatprep.subr.mxu0 %v6341_v31 }
 0x4c2   :  { %5891 = vmatpush3.msra.mxu0 %v2088_v50  ;;  %5898 = vmatprep.mubr.msk.f32.mxu0 %vm6342_vm3, %v6341_v31 }
 0x4c3   :  { %5892 = vmatprep.subr.mxu0 %v6341_v31 }
 0x4c4   :  { %5893 = vmatpush3.msra.mxu0 %v2087_v58 }
 0x4c5   :  { %5894 = vmatprep.subr.mxu0 %v6341_v31 }
 0x4c6   :  { %5895 = vmatpush3.msra.mxu0 %v2086_v34 }
 0x4c7   :  { %5896 = vmatprep.subr.mxu0 %v6341_v31 }
 0x4c8   :  { %5897 = vmatpush3.msra.mxu0 %v2085_v2 }
 0x4c9   :  { %5899 = vmatmul.mubr.msk.f32.vlgmr.msra.gmra.mxu0 %vm475_vm4, %v6481_v33  ;;  %5901 = vmatprep.subr.bf16.mxu0 %v6395_v5 }
 0x4ca   :  { %5902 = vmatpush3.bf16.msra.mxu0 %v6395_v5  ;;  %5905 = vmatprep.mubr.msk.bf16.mxu0 %vm185_vm2, %v6223_v32 }
 0x4cb   :  { %5903 = vmatprep.subr.bf16.mxu0 %v7074_v43 }
 0x4ce   :  { %5904 = vmatpush3.bf16.msra.mxu0 %v7074_v43 }
 0x4d1   :  { %5906 = vmatmul.mubr.msk.bf16.vlgmr.msra.gmra.mxu0 %vm185_vm2, %v6224_v3 }
 0x4d2   :  { %5909 = vmatprep.mubr.msk.bf16.mxu0 %vm185_vm2, %v6225_v61 }
 0x4d9   :  { %5910 = vmatmul.mubr.msk.bf16.gmra.mxu0 %vm185_vm2, %v6226_v27 }
 0x4da   :  { %5913 = vmatprep.mubr.msk.bf16.mxu0 %vm185_vm2, %v6227_v49 }
 0x4e1   :  { %5914 = vmatmul.mubr.msk.bf16.gmra.mxu0 %vm185_vm2, %v6228_v56 }
 0x4e2   :  { %5917 = vmatprep.mubr.msk.bf16.mxu0 %vm185_vm2, %v6229_v62 }
 0x4e9   :  { %5918 = vmatmul.mubr.msk.bf16.gmra.mxu0 %vm185_vm2, %v6230_v52 }
 0x4ea   :  { %5921 = vmatprep.mubr.msk.bf16.mxu0 %vm185_vm2, %v6231_v36 }
 0x4f1   :  { %5922 = vmatmul.mubr.msk.bf16.gmra.mxu0 %vm185_vm2, %v6232_v26 }
 0x4f2   :  { %5925 = vmatprep.mubr.msk.bf16.mxu0 %vm185_vm2, %v6233_v39 }
 0x4f9   :  { %5926 = vmatmul.mubr.msk.bf16.gmra.mxu0 %vm185_vm2, %v6234_v10 }
 0x4fa   :  { %5929 = vmatprep.mubr.msk.bf16.mxu0 %vm185_vm2, %v6235_v47 }
 0x501   :  { %5930 = vmatmul.mubr.msk.bf16.gmra.mxu0 %vm185_vm2, %v6236_v48 }
 0x502   :  { %5933 = vmatprep.mubr.msk.bf16.mxu0 %vm185_vm2, %v6237_v18 }
 0x509   :  { %5934 = vmatmul.mubr.msk.bf16.gmra.mxu0 %vm185_vm2, %v6238_v51 }
 0x50a   :  { %5937 = vmatprep.mubr.msk.bf16.mxu0 %vm185_vm2, %v6239_v57 }
 0x511   :  { %5938 = vmatmul.mubr.msk.bf16.gmra.mxu0 %vm185_vm2, %v6240_v38 }
 0x512   :  { %3227 = vmatprep.mubr.f32.mxu0 %v6474_v29 }
 0x581   :  { %v5431_v35 = vpop.f32.mrf.mxu0 }
 0x583   :  { %v5432_v9 = vpop.f32.mrf.mxu0 }
 0x584   :  { %v5433_v24 = vadd.f32 %v5432_v9, %v5431_v35 }
 0x589   :  { %v2225_v63 = vpop.f32.mrf.mxu0 }
 0x58a   :  { %v2226_v19 = vadd.f32 %v5433_v24, %v2225_v63 }
 0x58b   :  { %v5900_v0 = vpop.f32.mrf.mxu0 }
 0x58c   :  { %v2230_v54 = vadd.f32 %v2229_v53, %v2226_v19 }
 0x58e   :  { %2231 = vst [vmem:[#allocation2 + $0x3] sm:$0x1] %v2230_v54 }
 0x591   :  { %v7147_v25 = vpop.f32.mrf.mxu0 }
 0x593   :  { %v7149_v37 = vpop.f32.mrf.mxu0 }
 0x595   :  { %v7151_v1 = vpop.f32.mrf.mxu0 }
 0x597   :  { %v7153_v20 = vpop.f32.mrf.mxu0 }
 0x599   :  { %v7155_v17 = vpop.f32.mrf.mxu0 }
 0x59b   :  { %v7157_v6 = vpop.f32.mrf.mxu0 }
 0x59d   :  { %v7159_v14 = vpop.f32.mrf.mxu0 }
 0x59f   :  { %v7161_v45 = vpop.f32.mrf.mxu0 }
 0x5a1   :  { %v5915_v21 = vpop.f32.mrf.mxu0 }
 0x5a2   :  { %v2488_v9 = vadd.f32 %v6894_v8, %v5915_v21 }
 0x5a3   :  { %v2479_v22 = vpop.f32.mrf.mxu0 }
 0x5a5   :  { %v5916_v16 = vpop.f32.mrf.mxu0 }
 0x5a6   :  { %v2491_v51 = vadd.f32 %v6894_v8, %v5916_v16 }
 0x5a7   :  { %v2482_v23 = vpop.f32.mrf.mxu0 }
 0x5a8   :  { %v2601_v19 = vmax.f32 %v2491_v51, 0.0  ;;  %v2483_v0 = vadd.f32 %v6894_v8, %v2482_v23 }
 0x5a9   :  { %v5919_v40 = vpop.f32.mrf.mxu0 }
 0x5aa   :  { %v2504_v27 = vadd.f32 %v6894_v8, %v5919_v40  ;;  %v2600_v40 = vmax.f32 %v2488_v9, 0.0 }
 0x5ab   :  { %v2495_v55 = vpop.f32.mrf.mxu0 }
 0x5ac   :  { %v2604_v10 = vmax.f32 %v2504_v27, 0.0  ;;  %v2496_v47 = vadd.f32 %v6894_v8, %v2495_v55  ;;  %v2480_v55 = vadd.f32 %v6894_v8, %v2479_v22 }
 0x5ad   :  { %v5920_v7 = vpop.f32.mrf.mxu0 }
 0x5ae   :  { %v2507_v2 = vadd.f32 %v6894_v8, %v5920_v7  ;;  %v2602_v24 = vmax.f32 %v2496_v47, 0.0 }
 0x5af   :  { %v2498_v13 = vpop.f32.mrf.mxu0 }
 0x5b0   :  { %v2605_v52 = vmax.f32 %v2507_v2, 0.0  ;;  %v2499_v36 = vadd.f32 %v6894_v8, %v2498_v13  ;;  %v2475_v13 = vadd.f32 %v6894_v8, %v7159_v14 }
 0x5b1   :  { %v7163_v41 = vpop.f32.mrf.mxu0 }
 0x5b2   :  { %v2603_v57 = vmax.f32 %v2499_v36, 0.0 }
 0x5b3   :  { %v7165_v15 = vpop.f32.mrf.mxu0 }
 0x5b5   :  { %v7167_v46 = vpop.f32.mrf.mxu0 }
 0x5b7   :  { %v7169_v11 = vpop.f32.mrf.mxu0 }
 0x5b9   :  { %v5927_v28 = vpop.f32.mrf.mxu0 }
 0x5ba   :  { %v2536_v23 = vadd.f32 %v6894_v8, %v5927_v28 }
 0x5bb   :  { %v7171_v12 = vpop.f32.mrf.mxu0 }
 0x5bc   :  { %v2612_v14 = vmax.f32 %v2536_v23, 0.0  ;;  %v2528_v28 = vadd.f32 %v6894_v8, %v7171_v12  ;;  %v2520_v12 = vadd.f32 %v6894_v8, %v7163_v41  ;;  %v2512_v41 = vadd.f32 %v6894_v8, %v7165_v15  ;;  %v6254_v23 = vld [vmem:[%s7796_s0 + $0x338] sm:$0xff]  }
 0x5bd   :  { %v5928_v4 = vpop.f32.mrf.mxu0 }
 0x5be   :  { %v2539_v21 = vadd.f32 %v6894_v8, %v5928_v4  ;;  %v2597_v4 = vmax.f32 %v2475_v13, 0.0  ;;  %v2610_v27 = vmax.f32 %v2528_v28, 0.0  ;;  %v2608_v36 = vmax.f32 %v2520_v12, 0.0  ;;  %v6252_v13 = vld [vmem:[%s7796_s0 + $0x328] sm:$0xff]   ;;  %v2766_v28 = vld [vmem:[#allocation2 + $0x4] sm:$0x1] }
 0x5bf   :  { %v2530_v42 = vpop.f32.mrf.mxu0 }
 0x5c0   :  { %v2613_v22 = vmax.f32 %v2539_v21, 0.0  ;;  %v6250_v21 = vld [vmem:[%s7796_s0 + $0x318] sm:$0xff]  }
 0x5c1   :  { %v5931_v59 = vpop.f32.mrf.mxu0 }
 0x5c2   :  { %v2552_v38 = vadd.f32 %v6894_v8, %v5931_v59  ;;  %v2599_v59 = vmax.f32 %v2483_v0, 0.0  ;;  %v6245_v0 = vld [vmem:[%s7796_s0 + $0x2f0] sm:$0xff]  }
 0x5c3   :  { %v2543_v50 = vpop.f32.mrf.mxu0 }
 0x5c4   :  { %v2616_v54 = vmax.f32 %v2552_v38, 0.0  ;;  %v2544_v16 = vadd.f32 %v6894_v8, %v2543_v50  ;;  %v2472_v50 = vadd.f32 %v6894_v8, %v7155_v17  ;;  %v2464_v17 = vadd.f32 %v6894_v8, %v7157_v6 }
 0x5c5   :  { %v5932_v44 = vpop.f32.mrf.mxu0  ;;  %v2456_v6 = vadd.f32 %v6894_v8, %v7147_v25  ;;  %v2448_v25 = vadd.f32 %v6894_v8, %v7149_v37 }
 0x5c6   :  { %v2555_v48 = vadd.f32 %v6894_v8, %v5932_v44  ;;  %v2614_v44 = vmax.f32 %v2544_v16, 0.0  ;;  %v6247_v16 = vld [vmem:[%s7796_s0 + $0x300] sm:$0xff]  }
 0x5c7   :  { %v2546_v58 = vpop.f32.mrf.mxu0 }
 0x5c8   :  { %v2617_v63 = vmax.f32 %v2555_v48, 0.0  ;;  %v2547_v53 = vadd.f32 %v6894_v8, %v2546_v58  ;;  %v2598_v58 = vmax.f32 %v2480_v55, 0.0  ;;  %v2606_v48 = vmax.f32 %v2512_v41, 0.0  ;;  %v6249_v55 = vld [vmem:[%s7796_s0 + $0x310] sm:$0xff]  }
 0x5c9   :  { %v5935_v60 = vpop.f32.mrf.mxu0 }
 0x5ca   :  { %v2568_v3 = vadd.f32 %v6894_v8, %v5935_v60  ;;  %v2615_v7 = vmax.f32 %v2547_v53, 0.0  ;;  %v2531_v60 = vadd.f32 %v6894_v8, %v2530_v42  ;;  %v2523_v42 = vadd.f32 %v6894_v8, %v7167_v46  ;;  %v6243_v53 = vld [vmem:[%s7796_s0 + $0x2e0] sm:$0xff]  }
 0x5cb   :  { %v2559_v34 = vpop.f32.mrf.mxu0  ;;  %v2515_v46 = vadd.f32 %v6894_v8, %v7169_v11 }
 0x5cc   :  { %v2620_v26 = vmax.f32 %v2568_v3, 0.0  ;;  %v2560_v39 = vadd.f32 %v6894_v8, %v2559_v34  ;;  %v2467_v34 = vadd.f32 %v6894_v8, %v7161_v45  ;;  %v2611_v3 = vmax.f32 %v2531_v60, 0.0 }
 0x5cd   :  { %v5936_v32 = vpop.f32.mrf.mxu0  ;;  %v2459_v45 = vadd.f32 %v6894_v8, %v7151_v1  ;;  %v2451_v1 = vadd.f32 %v6894_v8, %v7153_v20 }
 0x5ce   :  { %v2571_v61 = vadd.f32 %v6894_v8, %v5936_v32  ;;  %v2618_v35 = vmax.f32 %v2560_v39, 0.0  ;;  %v2596_v32 = vmax.f32 %v2472_v50, 0.0  ;;  %v2592_v39 = vmax.f32 %v2456_v6, 0.0  ;;  %v6256_v50 = vld [vmem:[%s7796_s0 + $0x348] sm:$0xff]  }
 0x5cf   :  { %v2562_v49 = vpop.f32.mrf.mxu0  ;;  %v2591_v11 = vmax.f32 %v2451_v1, 0.0 }
 0x5d0   :  { %v2621_v56 = vmax.f32 %v2571_v61, 0.0  ;;  %v2563_v62 = vadd.f32 %v6894_v8, %v2562_v49  ;;  %v2595_v61 = vmax.f32 %v2467_v34, 0.0 }
 0x5d1   :  { %v5939_v2 = vpop.f32.mrf.mxu0 }
 0x5d2   :  { %5459 = vmatprep.subr.mxu1 %v2621_v56  ;;  %v2619_v18 = vmax.f32 %v2563_v62, 0.0  ;;  %v2594_v56 = vmax.f32 %v2464_v17, 0.0  ;;  %v2609_v62 = vmax.f32 %v2523_v42, 0.0  ;;  %v2584_v51 = vadd.f32 %v6894_v8, %v5939_v2 }
 0x5d3   :  { %5460 = vmatpush3.msra.mxu1 %v2605_v52  ;;  %v2575_v49 = vpop.f32.mrf.mxu0  ;;  %v2593_v52 = vmax.f32 %v2459_v45, 0.0 }
 0x5d4   :  { %5461 = vmatprep.subr.mxu1 %v2620_v26  ;;  %v2624_v37 = vmax.f32 %v2584_v51, 0.0  ;;  %v2576_v38 = vadd.f32 %v6894_v8, %v2575_v49 }
 0x5d5   :  { %5462 = vmatpush3.msra.mxu1 %v2604_v10  ;;  %v5940_v26 = vpop.f32.mrf.mxu0  ;;  %v2607_v10 = vmax.f32 %v2515_v46, 0.0 }
 0x5d6   :  { %5463 = vmatprep.subr.mxu1 %v2619_v18  ;;  %v2587_v47 = vadd.f32 %v6894_v8, %v5940_v26  ;;  %v2590_v18 = vmax.f32 %v2448_v25, 0.0  ;;  %v2622_v9 = vmax.f32 %v2576_v38, 0.0 }
 0x5d7   :  { %5464 = vmatpush3.msra.mxu1 %v2603_v57  ;;  %v2578_v20 = vpop.f32.mrf.mxu0 }
 0x5d8   :  { %5465 = vmatprep.subr.mxu1 %v2618_v35  ;;  %v2625_v15 = vmax.f32 %v2587_v47, 0.0  ;;  %v2579_v57 = vadd.f32 %v6894_v8, %v2578_v20 }
 0x5d9   :  { %5466 = vmatpush3.msra.mxu1 %v2602_v24  ;;  %v6241_v24 = vld [vmem:[%s7796_s0 + $0x2d0] sm:$0xff]  }
 0x5da   :  { %5467 = vmatprep.subr.mxu1 %v2617_v63  ;;  %v2623_v35 = vmax.f32 %v2579_v57, 0.0  ;;  %v6242_v63 = vld [vmem:[%s7796_s0 + $0x2d8] sm:$0xff]  }
 0x5db   :  { %5468 = vmatpush3.msra.mxu1 %v2601_v19  ;;  %v6244_v19 = vld [vmem:[%s7796_s0 + $0x2e8] sm:$0xff]  }
 0x5dc   :  { %5469 = vmatprep.subr.mxu1 %v2616_v54  ;;  %v6246_v54 = vld [vmem:[%s7796_s0 + $0x2f8] sm:$0xff]  }
 0x5dd   :  { %5470 = vmatpush3.msra.mxu1 %v2600_v40  ;;  %v6248_v40 = vld [vmem:[%s7796_s0 + $0x308] sm:$0xff]  }
 0x5de   :  { %5471 = vmatprep.subr.mxu1 %v2615_v7  ;;  %v6251_v7 = vld [vmem:[%s7796_s0 + $0x320] sm:$0xff]  }
 0x5df   :  { %5472 = vmatpush3.msra.mxu1 %v2599_v59  ;;  %v6253_v59 = vld [vmem:[%s7796_s0 + $0x330] sm:$0xff]  }
 0x5e0   :  { %5473 = vmatprep.subr.mxu1 %v2614_v44  ;;  %v6255_v44 = vld [vmem:[%s7796_s0 + $0x340] sm:$0xff]  }
 0x5e1   :  { %5474 = vmatpush3.msra.mxu1 %v2598_v58  ;;  %v6257_v58 = vld [vmem:[%s7796_s0 + $0x350] sm:$0xff]  }
 0x5e2   :  { %5475 = vmatprep.subr.mxu1 %v2613_v22  ;;  %v6258_v22 = vld [vmem:[%s7796_s0 + $0x358] sm:$0xff]  }
 0x5e3   :  { %5476 = vmatpush3.msra.mxu1 %v2597_v4 }
 0x5e4   :  { %5477 = vmatprep.subr.mxu1 %v2612_v14 }
 0x5e5   :  { %5478 = vmatpush3.msra.mxu1 %v2596_v32 }
 0x5e6   :  { %5479 = vmatprep.subr.mxu1 %v2611_v3 }
 0x5e7   :  { %5480 = vmatpush3.msra.mxu1 %v2595_v61 }
 0x5e8   :  { %5481 = vmatprep.subr.mxu1 %v2610_v27 }
 0x5e9   :  { %5482 = vmatpush3.msra.mxu1 %v2594_v56 }
 0x5ea   :  { %5483 = vmatprep.subr.mxu1 %v2609_v62 }
 0x5eb   :  { %5484 = vmatpush3.msra.mxu1 %v2593_v52 }
 0x5ec   :  { %5485 = vmatprep.subr.mxu1 %v2608_v36 }
 0x5ed   :  { %5486 = vmatpush3.msra.mxu1 %v2592_v39 }
 0x5ee   :  { %5487 = vmatprep.subr.mxu1 %v2607_v10 }
 0x5ef   :  { %5488 = vmatpush3.msra.mxu1 %v2591_v11 }
 0x5f0   :  { %5489 = vmatprep.subr.mxu1 %v2606_v48 }
 0x5f1   :  { %5490 = vmatpush3.msra.mxu1 %v2590_v18 }
 0x5f2   :  { %2691 = vmatmul.mubr.f32.vlgmr.msra.gmra.mxu1 %v6476_v30  ;;  %5941 = vmatprep.subr.mxu1 %v6341_v31 }
 0x5f3   :  { %5942 = vmatpush3.msra.mxu1 %v2625_v15  ;;  %5949 = vmatprep.mubr.msk.f32.mxu1 %vm6342_vm3, %v6341_v31 }
 0x5f4   :  { %5943 = vmatprep.subr.mxu1 %v6341_v31 }
 0x5f5   :  { %5944 = vmatpush3.msra.mxu1 %v2624_v37 }
 0x5f6   :  { %5945 = vmatprep.subr.mxu1 %v6341_v31 }
 0x5f7   :  { %5946 = vmatpush3.msra.mxu1 %v2623_v35 }
 0x5f8   :  { %5947 = vmatprep.subr.mxu1 %v6341_v31 }
 0x5f9   :  { %5948 = vmatpush3.msra.mxu1 %v2622_v9 }
 0x5fa   :  { %5950 = vmatmul.mubr.msk.f32.vlgmr.msra.gmra.mxu1 %vm475_vm4, %v6481_v33  ;;  %5952 = vmatprep.subr.bf16.mxu1 %v6395_v5 }
 0x5fb   :  { %5953 = vmatpush3.bf16.msra.mxu1 %v6395_v5  ;;  %5956 = vmatprep.mubr.msk.bf16.mxu1 %vm185_vm2, %v6241_v24 }
 0x5fc   :  { %5954 = vmatprep.subr.bf16.mxu1 %v7074_v43 }
 0x5ff   :  { %5955 = vmatpush3.bf16.msra.mxu1 %v7074_v43 }
 0x602   :  { %5957 = vmatmul.mubr.msk.bf16.vlgmr.msra.gmra.mxu1 %vm185_vm2, %v6242_v63 }
 0x603   :  { %5960 = vmatprep.mubr.msk.bf16.mxu1 %vm185_vm2, %v6243_v53 }
 0x60a   :  { %5961 = vmatmul.mubr.msk.bf16.gmra.mxu1 %vm185_vm2, %v6244_v19 }
 0x60b   :  { %5964 = vmatprep.mubr.msk.bf16.mxu1 %vm185_vm2, %v6245_v0 }
 0x612   :  { %5965 = vmatmul.mubr.msk.bf16.gmra.mxu1 %vm185_vm2, %v6246_v54 }
 0x613   :  { %5968 = vmatprep.mubr.msk.bf16.mxu1 %vm185_vm2, %v6247_v16 }
 0x61a   :  { %5969 = vmatmul.mubr.msk.bf16.gmra.mxu1 %vm185_vm2, %v6248_v40 }
 0x61b   :  { %5972 = vmatprep.mubr.msk.bf16.mxu1 %vm185_vm2, %v6249_v55 }
 0x622   :  { %5973 = vmatmul.mubr.msk.bf16.gmra.mxu1 %vm185_vm2, %v6250_v21 }
 0x623   :  { %5976 = vmatprep.mubr.msk.bf16.mxu1 %vm185_vm2, %v6251_v7 }
 0x62a   :  { %5977 = vmatmul.mubr.msk.bf16.gmra.mxu1 %vm185_vm2, %v6252_v13 }
 0x62b   :  { %5980 = vmatprep.mubr.msk.bf16.mxu1 %vm185_vm2, %v6253_v59 }
 0x632   :  { %5981 = vmatmul.mubr.msk.bf16.gmra.mxu1 %vm185_vm2, %v6254_v23 }
 0x633   :  { %5984 = vmatprep.mubr.msk.bf16.mxu1 %vm185_vm2, %v6255_v44 }
 0x63a   :  { %5985 = vmatmul.mubr.msk.bf16.gmra.mxu1 %vm185_vm2, %v6256_v50  ;;  %v7346_v50 = vld [vmem:[%s7799_s3] ss:$0 sm:$0xff] }
 0x63b   :  { %5988 = vmatprep.mubr.msk.bf16.mxu1 %vm185_vm2, %v6257_v58 }
 0x642   :  { %5989 = vmatmul.mubr.msk.bf16.gmra.mxu1 %vm185_vm2, %v6258_v22 }
 0x643   :  { %3764 = vmatprep.mubr.f32.mxu1 %v6474_v29 }
 0x6b2   :  { %v5491_v60 = vpop.f32.mrf.mxu1 }
 0x6b4   :  { %v5492_v4 = vpop.f32.mrf.mxu1 }
 0x6b5   :  { %v5493_v34 = vadd.f32 %v5492_v4, %v5491_v60 }
 0x6ba   :  { %v2762_v14 = vpop.f32.mrf.mxu1 }
 0x6bb   :  { %v2763_v2 = vadd.f32 %v5493_v34, %v2762_v14 }
 0x6bc   :  { %v5951_v32 = vpop.f32.mrf.mxu1 }
 0x6bd   :  { %v2767_v17 = vadd.f32 %v2766_v28, %v2763_v2 }
 0x6bf   :  { %2768 = vst [vmem:[#allocation2 + $0x4] sm:$0x1] %v2767_v17 }
 0x6c2   :  { %v7308_v42 = vpop.f32.mrf.mxu1 }
 0x6c4   :  { %v7310_v3 = vpop.f32.mrf.mxu1 }
 0x6c6   :  { %v7312_v45 = vpop.f32.mrf.mxu1 }
 0x6c8   :  { %v7314_v61 = vpop.f32.mrf.mxu1 }
 0x6ca   :  { %v7316_v12 = vpop.f32.mrf.mxu1 }
 0x6cc   :  { %v7318_v27 = vpop.f32.mrf.mxu1 }
 0x6ce   :  { %v7320_v49 = vpop.f32.mrf.mxu1 }
 0x6d0   :  { %v7322_v6 = vpop.f32.mrf.mxu1 }
 0x6d2   :  { %v5966_v56 = vpop.f32.mrf.mxu1 }
 0x6d3   :  { %v3025_v34 = vadd.f32 %v7346_v50, %v5966_v56 }
 0x6d4   :  { %v3016_v62 = vpop.f32.mrf.mxu1 }
 0x6d6   :  { %v5967_v46 = vpop.f32.mrf.mxu1 }
 0x6d7   :  { %v3028_v58 = vadd.f32 %v7346_v50, %v5967_v46 }
 0x6d8   :  { %v3019_v52 = vpop.f32.mrf.mxu1 }
 0x6d9   :  { %v3138_v2 = vmax.f32 %v3028_v58, 0.0  ;;  %v3020_v32 = vadd.f32 %v7346_v50, %v3019_v52 }
 0x6da   :  { %v5970_v1 = vpop.f32.mrf.mxu1 }
 0x6db   :  { %v3041_v19 = vadd.f32 %v6894_v8, %v5970_v1  ;;  %v3137_v1 = vmax.f32 %v3025_v34, 0.0 }
 0x6dc   :  { %v3032_v36 = vpop.f32.mrf.mxu1 }
 0x6dd   :  { %v3141_v13 = vmax.f32 %v3041_v19, 0.0  ;;  %v3033_v59 = vadd.f32 %v6894_v8, %v3032_v36  ;;  %v3017_v36 = vadd.f32 %v7346_v50, %v3016_v62 }
 0x6de   :  { %v5971_v41 = vpop.f32.mrf.mxu1 }
 0x6df   :  { %v3044_v9 = vadd.f32 %v6894_v8, %v5971_v41  ;;  %v3139_v14 = vmax.f32 %v3033_v59, 0.0 }
 0x6e0   :  { %v3035_v26 = vpop.f32.mrf.mxu1 }
 0x6e1   :  { %v3142_v40 = vmax.f32 %v3044_v9, 0.0  ;;  %v3036_v55 = vadd.f32 %v6894_v8, %v3035_v26  ;;  %v3012_v26 = vadd.f32 %v7346_v50, %v7320_v49 }
 0x6e2   :  { %v7324_v39 = vpop.f32.mrf.mxu1 }
 0x6e3   :  { %v3140_v22 = vmax.f32 %v3036_v55, 0.0 }
 0x6e4   :  { %v7326_v25 = vpop.f32.mrf.mxu1 }
 0x6e6   :  { %v7328_v10 = vpop.f32.mrf.mxu1 }
 0x6e8   :  { %v7330_v11 = vpop.f32.mrf.mxu1 }
 0x6ea   :  { %v5978_v47 = vpop.f32.mrf.mxu1 }
 0x6eb   :  { %v3073_v52 = vadd.f32 %v7346_v50, %v5978_v47 }
 0x6ec   :  { %v7332_v48 = vpop.f32.mrf.mxu1 }
 0x6ed   :  { %v3149_v49 = vmax.f32 %v3073_v52, 0.0  ;;  %v3065_v47 = vadd.f32 %v7346_v50, %v7332_v48  ;;  %v3057_v48 = vadd.f32 %v7346_v50, %v7324_v39  ;;  %v3049_v39 = vadd.f32 %v7346_v50, %v7326_v25  ;;  %v6273_v52 = vld [vmem:[%s7796_s0 + $0x3d0] sm:$0xff]  }
 0x6ee   :  { %v5979_v20 = vpop.f32.mrf.mxu1 }
 0x6ef   :  { %v3076_v56 = vadd.f32 %v7346_v50, %v5979_v20  ;;  %v3134_v20 = vmax.f32 %v3012_v26, 0.0  ;;  %v3147_v19 = vmax.f32 %v3065_v47, 0.0  ;;  %v3145_v55 = vmax.f32 %v3057_v48, 0.0  ;;  %v6271_v26 = vld [vmem:[%s7796_s0 + $0x3c0] sm:$0xff]  }
 0x6f0   :  { %v3067_v18 = vpop.f32.mrf.mxu1 }
 0x6f1   :  { %v3150_v62 = vmax.f32 %v3076_v56, 0.0  ;;  %v6269_v56 = vld [vmem:[%s7796_s0 + $0x3b0] sm:$0xff]  }
 0x6f2   :  { %v5982_v51 = vpop.f32.mrf.mxu1 }
 0x6f3   :  { %v3089_v60 = vadd.f32 %v7346_v50, %v5982_v51  ;;  %v3136_v51 = vmax.f32 %v3020_v32, 0.0  ;;  %v6263_v32 = vld [vmem:[%s7796_s0 + $0x380] sm:$0xff]  }
 0x6f4   :  { %v3080_v15 = vpop.f32.mrf.mxu1 }
 0x6f5   :  { %v3153_v17 = vmax.f32 %v3089_v60, 0.0  ;;  %v3081_v46 = vadd.f32 %v7346_v50, %v3080_v15  ;;  %v3009_v15 = vadd.f32 %v7346_v50, %v7316_v12  ;;  %v3001_v12 = vadd.f32 %v7346_v50, %v7318_v27 }
 0x6f6   :  { %v5983_v57 = vpop.f32.mrf.mxu1  ;;  %v2993_v27 = vadd.f32 %v7346_v50, %v7308_v42  ;;  %v2985_v42 = vadd.f32 %v7346_v50, %v7310_v3 }
 0x6f7   :  { %v3092_v23 = vadd.f32 %v6894_v8, %v5983_v57  ;;  %v3151_v57 = vmax.f32 %v3081_v46, 0.0  ;;  %v6266_v46 = vld [vmem:[%s7796_s0 + $0x398] sm:$0xff]  }
 0x6f8   :  { %v3083_v37 = vpop.f32.mrf.mxu1 }
 0x6f9   :  { %v3084_v28 = vadd.f32 %v7346_v50, %v3083_v37  ;;  %v3135_v37 = vmax.f32 %v3017_v36, 0.0  ;;  %v6268_v36 = vld [vmem:[%s7796_s0 + $0x3a8] sm:$0xff]  }
 0x6fa   :  { %v5986_v38 = vpop.f32.mrf.mxu1 }
 0x6fb   :  { %v3105_v63 = vadd.f32 %v6894_v8, %v5986_v38  ;;  %v3152_v41 = vmax.f32 %v3084_v28, 0.0  ;;  %v3068_v38 = vadd.f32 %v7346_v50, %v3067_v18  ;;  %v3060_v18 = vadd.f32 %v7346_v50, %v7328_v10  ;;  %v6261_v28 = vld [vmem:[%s7796_s0 + $0x370] sm:$0xff]  }
 0x6fc   :  { %v3096_v35 = vpop.f32.mrf.mxu1  ;;  %v3052_v10 = vadd.f32 %v7346_v50, %v7330_v11 }
 0x6fd   :  { %v3157_v21 = vmax.f32 %v3105_v63, 0.0  ;;  %v3097_v7 = vadd.f32 %v6894_v8, %v3096_v35  ;;  %v3004_v35 = vadd.f32 %v7346_v50, %v7322_v6  ;;  %v3148_v63 = vmax.f32 %v3068_v38, 0.0 }
 0x6fe   :  { %v5987_v24 = vpop.f32.mrf.mxu1  ;;  %v2996_v6 = vadd.f32 %v7346_v50, %v7312_v45  ;;  %v2988_v45 = vadd.f32 %v7346_v50, %v7314_v61 }
 0x6ff   :  { %v3108_v53 = vadd.f32 %v6894_v8, %v5987_v24  ;;  %v3155_v4 = vmax.f32 %v3097_v7, 0.0  ;;  %v3133_v24 = vmax.f32 %v3009_v15, 0.0  ;;  %v3129_v7 = vmax.f32 %v2993_v27, 0.0  ;;  %v6275_v15 = vld [vmem:[%s7796_s0 + $0x3e0] sm:$0xff]  }
 0x700   :  { %v3099_v0 = vpop.f32.mrf.mxu1  ;;  %v3128_v11 = vmax.f32 %v2988_v45, 0.0 }
 0x701   :  { %v3158_v54 = vmax.f32 %v3108_v53, 0.0  ;;  %v3100_v16 = vadd.f32 %v6894_v8, %v3099_v0  ;;  %v3154_v8 = vmax.f32 %v3092_v23, 0.0  ;;  %v3132_v53 = vmax.f32 %v3004_v35, 0.0 }
 0x702   :  { %v5990_v9 = vpop.f32.mrf.mxu1  ;;  %v3143_v23 = vmax.f32 %v3049_v39, 0.0 }
 0x703   :  { %5519 = vmatprep.subr.mxu0 %v3158_v54  ;;  %v3156_v44 = vmax.f32 %v3100_v16, 0.0  ;;  %v3131_v54 = vmax.f32 %v3001_v12, 0.0  ;;  %v3146_v16 = vmax.f32 %v3060_v18, 0.0  ;;  %v3121_v58 = vadd.f32 %v7346_v50, %v5990_v9 }
 0x704   :  { %5520 = vmatpush3.msra.mxu0 %v3142_v40  ;;  %v3112_v0 = vpop.f32.mrf.mxu1  ;;  %v3130_v40 = vmax.f32 %v2996_v6, 0.0 }
 0x705   :  { %5521 = vmatprep.subr.mxu0 %v3157_v21  ;;  %v3161_v3 = vmax.f32 %v3121_v58, 0.0  ;;  %v3113_v60 = vadd.f32 %v7346_v50, %v3112_v0 }
 0x706   :  { %5522 = vmatpush3.msra.mxu0 %v3141_v13  ;;  %v5991_v21 = vpop.f32.mrf.mxu1  ;;  %v3144_v13 = vmax.f32 %v3052_v10, 0.0 }
 0x707   :  { %5523 = vmatprep.subr.mxu0 %v3156_v44  ;;  %v3124_v59 = vadd.f32 %v7346_v50, %v5991_v21  ;;  %v3127_v44 = vmax.f32 %v2985_v42, 0.0  ;;  %v3159_v34 = vmax.f32 %v3113_v60, 0.0 }
 0x708   :  { %5524 = vmatpush3.msra.mxu0 %v3140_v22  ;;  %v3115_v61 = vpop.f32.mrf.mxu1 }
 0x709   :  { %5525 = vmatprep.subr.mxu0 %v3155_v4  ;;  %v3162_v25 = vmax.f32 %v3124_v59, 0.0  ;;  %v3116_v22 = vadd.f32 %v7346_v50, %v3115_v61 }
 0x70a   :  { %5526 = vmatpush3.msra.mxu0 %v3139_v14  ;;  %v6259_v14 = vld [vmem:[%s7796_s0 + $0x360] sm:$0xff]  }
 0x70b   :  { %5527 = vmatprep.subr.mxu0 %v3154_v8  ;;  %v3160_v4 = vmax.f32 %v3116_v22, 0.0  ;;  %v6260_v8 = vld [vmem:[%s7796_s0 + $0x368] sm:$0xff]  }
 0x70c   :  { %5528 = vmatpush3.msra.mxu0 %v3138_v2  ;;  %v6262_v2 = vld [vmem:[%s7796_s0 + $0x378] sm:$0xff]  }
 0x70d   :  { %5529 = vmatprep.subr.mxu0 %v3153_v17  ;;  %v6265_v17 = vld [vmem:[%s7796_s0 + $0x390] sm:$0xff]  }
 0x70e   :  { %5530 = vmatpush3.msra.mxu0 %v3137_v1  ;;  %v6267_v1 = vld [vmem:[%s7796_s0 + $0x3a0] sm:$0xff]  }
 0x70f   :  { %5531 = vmatprep.subr.mxu0 %v3152_v41  ;;  %v6270_v41 = vld [vmem:[%s7796_s0 + $0x3b8] sm:$0xff]  }
 0x710   :  { %5532 = vmatpush3.msra.mxu0 %v3136_v51  ;;  %v6272_v51 = vld [vmem:[%s7796_s0 + $0x3c8] sm:$0xff]  }
 0x711   :  { %5533 = vmatprep.subr.mxu0 %v3151_v57  ;;  %v6274_v57 = vld [vmem:[%s7796_s0 + $0x3d8] sm:$0xff]  }
 0x712   :  { %5534 = vmatpush3.msra.mxu0 %v3135_v37  ;;  %v6276_v37 = vld [vmem:[%s7796_s0 + $0x3e8] sm:$0xff]  }
 0x713   :  { %5535 = vmatprep.subr.mxu0 %v3150_v62 }
 0x714   :  { %5536 = vmatpush3.msra.mxu0 %v3134_v20 }
 0x715   :  { %5537 = vmatprep.subr.mxu0 %v3149_v49  ;;  %v3303_v49 = vld [vmem:[#allocation2 + $0x5] sm:$0x1] }
 0x716   :  { %5538 = vmatpush3.msra.mxu0 %v3133_v24 }
 0x717   :  { %5539 = vmatprep.subr.mxu0 %v3148_v63 }
 0x718   :  { %5540 = vmatpush3.msra.mxu0 %v3132_v53 }
 0x719   :  { %5541 = vmatprep.subr.mxu0 %v3147_v19 }
 0x71a   :  { %5542 = vmatpush3.msra.mxu0 %v3131_v54 }
 0x71b   :  { %5543 = vmatprep.subr.mxu0 %v3146_v16 }
 0x71c   :  { %5544 = vmatpush3.msra.mxu0 %v3130_v40 }
 0x71d   :  { %5545 = vmatprep.subr.mxu0 %v3145_v55 }
 0x71e   :  { %5546 = vmatpush3.msra.mxu0 %v3129_v7 }
 0x71f   :  { %5547 = vmatprep.subr.mxu0 %v3144_v13 }
 0x720   :  { %5548 = vmatpush3.msra.mxu0 %v3128_v11 }
 0x721   :  { %5549 = vmatprep.subr.mxu0 %v3143_v23 }
 0x722   :  { %5550 = vmatpush3.msra.mxu0 %v3127_v44 }
 0x723   :  { %3228 = vmatmul.mubr.f32.vlgmr.msra.gmra.mxu0 %v6476_v30  ;;  %5992 = vmatprep.subr.mxu0 %v6341_v31 }
 0x724   :  { %5993 = vmatpush3.msra.mxu0 %v3162_v25  ;;  %6000 = vmatprep.mubr.msk.f32.mxu0 %vm6342_vm3, %v6341_v31 }
 0x725   :  { %5994 = vmatprep.subr.mxu0 %v6341_v31 }
 0x726   :  { %5995 = vmatpush3.msra.mxu0 %v3161_v3 }
 0x727   :  { %5996 = vmatprep.subr.mxu0 %v6341_v31 }
 0x728   :  { %5997 = vmatpush3.msra.mxu0 %v3160_v4 }
 0x729   :  { %5998 = vmatprep.subr.mxu0 %v6341_v31 }
 0x72a   :  { %5999 = vmatpush3.msra.mxu0 %v3159_v34 }
 0x72b   :  { %6001 = vmatmul.mubr.msk.f32.vlgmr.msra.gmra.mxu0 %vm475_vm4, %v6481_v33  ;;  %6003 = vmatprep.subr.bf16.mxu0 %v6395_v5 }
 0x72c   :  { %6004 = vmatpush3.bf16.msra.mxu0 %v6395_v5  ;;  %6007 = vmatprep.mubr.msk.bf16.mxu0 %vm185_vm2, %v6259_v14 }
 0x72d   :  { %6005 = vmatprep.subr.bf16.mxu0 %v7074_v43 }
 0x730   :  { %6006 = vmatpush3.bf16.msra.mxu0 %v7074_v43  ;;  %v6264_v43 = vld [vmem:[%s7796_s0 + $0x388] sm:$0xff]  }
 0x733   :  { %6008 = vmatmul.mubr.msk.bf16.vlgmr.msra.gmra.mxu0 %vm185_vm2, %v6260_v8 }
 0x734   :  { %6011 = vmatprep.mubr.msk.bf16.mxu0 %vm185_vm2, %v6261_v28 }
 0x73b   :  { %6012 = vmatmul.mubr.msk.bf16.gmra.mxu0 %vm185_vm2, %v6262_v2 }
 0x73c   :  { %6015 = vmatprep.mubr.msk.bf16.mxu0 %vm185_vm2, %v6263_v32 }
 0x743   :  { %6016 = vmatmul.mubr.msk.bf16.gmra.mxu0 %vm185_vm2, %v6264_v43 }
 0x744   :  { %6019 = vmatprep.mubr.msk.bf16.mxu0 %vm185_vm2, %v6265_v17 }
 0x74b   :  { %6020 = vmatmul.mubr.msk.bf16.gmra.mxu0 %vm185_vm2, %v6266_v46 }
 0x74c   :  { %6023 = vmatprep.mubr.msk.bf16.mxu0 %vm185_vm2, %v6267_v1 }
 0x753   :  { %6024 = vmatmul.mubr.msk.bf16.gmra.mxu0 %vm185_vm2, %v6268_v36 }
 0x754   :  { %6027 = vmatprep.mubr.msk.bf16.mxu0 %vm185_vm2, %v6269_v56 }
 0x75b   :  { %6028 = vmatmul.mubr.msk.bf16.gmra.mxu0 %vm185_vm2, %v6270_v41 }
 0x75c   :  { %6031 = vmatprep.mubr.msk.bf16.mxu0 %vm185_vm2, %v6271_v26 }
 0x763   :  { %6032 = vmatmul.mubr.msk.bf16.gmra.mxu0 %vm185_vm2, %v6272_v51 }
 0x764   :  { %6035 = vmatprep.mubr.msk.bf16.mxu0 %vm185_vm2, %v6273_v52 }
 0x76b   :  { %6036 = vmatmul.mubr.msk.bf16.gmra.mxu0 %vm185_vm2, %v6274_v57 }
 0x76c   :  { %6039 = vmatprep.mubr.msk.bf16.mxu0 %vm185_vm2, %v6275_v15 }
 0x773   :  { %6040 = vmatmul.mubr.msk.bf16.gmra.mxu0 %vm185_vm2, %v6276_v37 }
 0x774   :  { %4301 = vmatprep.mubr.f32.mxu0 %v6474_v29 }
 0x7e3   :  { %v5551_v62 = vpop.f32.mrf.mxu0 }
 0x7e5   :  { %v5552_v38 = vpop.f32.mrf.mxu0 }
 0x7e6   :  { %v5553_v20 = vadd.f32 %v5552_v38, %v5551_v62 }
 0x7eb   :  { %v3299_v35 = vpop.f32.mrf.mxu0 }
 0x7ec   :  { %v3300_v47 = vadd.f32 %v5553_v20, %v3299_v35 }
 0x7ed   :  { %v6002_v9 = vpop.f32.mrf.mxu0 }
 0x7ee   :  { %v3304_v24 = vadd.f32 %v3303_v49, %v3300_v47 }
 0x7f0   :  { %3305 = vst [vmem:[#allocation2 + $0x5] sm:$0x1] %v3304_v24 }
 0x7f3   :  { %v7474_v12 = vpop.f32.mrf.mxu0 }
 0x7f5   :  { %v7476_v18 = vpop.f32.mrf.mxu0 }
 0x7f7   :  { %v7478_v63 = vpop.f32.mrf.mxu0 }
 0x7f9   :  { %v7480_v6 = vpop.f32.mrf.mxu0 }
 0x7fb   :  { %v7482_v53 = vpop.f32.mrf.mxu0 }
 0x7fd   :  { %v7484_v29 = vpop.f32.mrf.mxu0 }
 0x7ff   :  { %v7486_v48 = vpop.f32.mrf.mxu0 }
 0x801   :  { %v7488_v19 = vpop.f32.mrf.mxu0 }
 0x803   :  { %v6017_v0 = vpop.f32.mrf.mxu0 }
 0x804   :  { %v3562_v37 = vadd.f32 %v7346_v50, %v6017_v0 }
 0x805   :  { %v3553_v27 = vpop.f32.mrf.mxu0 }
 0x806   :  { %v3674_v24 = vmax.f32 %v3562_v37, 0.0  ;;  %v6317_v37 = vld [vmem:[%s7798_s2] sm:$0xff]  }
 0x807   :  { %v6018_v54 = vpop.f32.mrf.mxu0 }
 0x808   :  { %v3565_v51 = vadd.f32 %v7346_v50, %v6018_v54  ;;  %v3554_v54 = vadd.f32 %v7346_v50, %v3553_v27 }
 0x809   :  { %v3556_v16 = vpop.f32.mrf.mxu0 }
 0x80a   :  { %v3675_v35 = vmax.f32 %v3565_v51, 0.0  ;;  %v3557_v49 = vadd.f32 %v7346_v50, %v3556_v16 }
 0x80b   :  { %v6021_v10 = vpop.f32.mrf.mxu0 }
 0x80c   :  { %v3578_v8 = vadd.f32 %v7346_v50, %v6021_v10 }
 0x80d   :  { %v3569_v40 = vpop.f32.mrf.mxu0 }
 0x80e   :  { %v3678_v36 = vmax.f32 %v3578_v8, 0.0  ;;  %v3570_v56 = vadd.f32 %v7346_v50, %v3569_v40  ;;  %v3549_v40 = vadd.f32 %v7346_v50, %v7486_v48 }
 0x80f   :  { %v6022_v45 = vpop.f32.mrf.mxu0 }
 0x810   :  { %v3581_v60 = vadd.f32 %v7346_v50, %v6022_v45  ;;  %v3676_v62 = vmax.f32 %v3570_v56, 0.0  ;;  %v3673_v45 = vmax.f32 %v3557_v49, 0.0  ;;  %v6283_v49 = vld [vmem:[%s7796_s0 + $0x420] sm:$0xff]  }
 0x811   :  { %v3572_v55 = vpop.f32.mrf.mxu0 }
 0x812   :  { %v3679_v43 = vmax.f32 %v3581_v60, 0.0  ;;  %v3573_v17 = vadd.f32 %v7346_v50, %v3572_v55 }
 0x813   :  { %v7490_v39 = vpop.f32.mrf.mxu0 }
 0x814   :  { %v3677_v52 = vmax.f32 %v3573_v17, 0.0 }
 0x815   :  { %v7492_v21 = vpop.f32.mrf.mxu0 }
 0x817   :  { %v7494_v7 = vpop.f32.mrf.mxu0 }
 0x819   :  { %v7496_v42 = vpop.f32.mrf.mxu0 }
 0x81b   :  { %v6029_v13 = vpop.f32.mrf.mxu0 }
 0x81c   :  { %v3610_v16 = vadd.f32 %v7346_v50, %v6029_v13 }
 0x81d   :  { %v7498_v11 = vpop.f32.mrf.mxu0 }
 0x81e   :  { %v3686_v48 = vmax.f32 %v3610_v16, 0.0  ;;  %v3602_v13 = vadd.f32 %v7346_v50, %v7498_v11  ;;  %v3594_v11 = vadd.f32 %v7346_v50, %v7490_v39  ;;  %v3586_v39 = vadd.f32 %v7346_v50, %v7492_v21  ;;  %v6292_v16 = vld [vmem:[%s7796_s0 + $0x468] sm:$0xff]  }
 0x81f   :  { %v6030_v59 = vpop.f32.mrf.mxu0 }
 0x820   :  { %v3613_v0 = vadd.f32 %v7346_v50, %v6030_v59  ;;  %v3671_v59 = vmax.f32 %v3549_v40, 0.0  ;;  %v6290_v40 = vld [vmem:[%s7796_s0 + $0x458] sm:$0xff]  }
 0x821   :  { %v3604_v23 = vpop.f32.mrf.mxu0 }
 0x822   :  { %v3687_v27 = vmax.f32 %v3613_v0, 0.0  ;;  %v6288_v0 = vld [vmem:[%s7796_s0 + $0x448] sm:$0xff]  }
 0x823   :  { %v6033_v61 = vpop.f32.mrf.mxu0 }
 0x824   :  { %v3626_v57 = vadd.f32 %v7346_v50, %v6033_v61  ;;  %v3546_v61 = vadd.f32 %v7346_v50, %v7482_v53  ;;  %v3538_v53 = vadd.f32 %v7346_v50, %v7484_v29  ;;  %v3530_v29 = vadd.f32 %v7346_v50, %v7474_v12 }
 0x825   :  { %v3617_v44 = vpop.f32.mrf.mxu0  ;;  %v3522_v12 = vadd.f32 %v7346_v50, %v7476_v18 }
 0x826   :  { %v3690_v47 = vmax.f32 %v3626_v57, 0.0  ;;  %v3618_v9 = vadd.f32 %v7346_v50, %v3617_v44  ;;  %v3672_v44 = vmax.f32 %v3554_v54, 0.0  ;;  %v3668_v8 = vmax.f32 %v3538_v53, 0.0  ;;  %v6287_v54 = vld [vmem:[%s7796_s0 + $0x440] sm:$0xff]  }
 0x827   :  { %v6034_v58 = vpop.f32.mrf.mxu0  ;;  %v3666_v17 = vmax.f32 %v3530_v29, 0.0  ;;  %v3664_v56 = vmax.f32 %v3522_v12, 0.0 }
 0x828   :  { %v3629_v41 = vadd.f32 %v7346_v50, %v6034_v58  ;;  %v3688_v55 = vmax.f32 %v3618_v9, 0.0  ;;  %v3605_v58 = vadd.f32 %v7346_v50, %v3604_v23  ;;  %v3597_v23 = vadd.f32 %v7346_v50, %v7494_v7  ;;  %v6285_v9 = vld [vmem:[%s7796_s0 + $0x430] sm:$0xff]  }
 0x829   :  { %v3620_v25 = vpop.f32.mrf.mxu0  ;;  %v3589_v7 = vadd.f32 %v7346_v50, %v7496_v42 }
 0x82a   :  { %v3691_v38 = vmax.f32 %v3629_v41, 0.0  ;;  %v3621_v20 = vadd.f32 %v7346_v50, %v3620_v25  ;;  %v3541_v25 = vadd.f32 %v7346_v50, %v7488_v19  ;;  %v3685_v60 = vmax.f32 %v3605_v58, 0.0 }
 0x82b   :  { %v6037_v22 = vpop.f32.mrf.mxu0  ;;  %v3533_v19 = vadd.f32 %v7346_v50, %v7478_v63  ;;  %v3525_v63 = vadd.f32 %v7346_v50, %v7480_v6 }
 0x82c   :  { %v3642_v34 = vadd.f32 %v7346_v50, %v6037_v22  ;;  %v3689_v10 = vmax.f32 %v3621_v20, 0.0  ;;  %v6281_v20 = vld [vmem:[%s7796_s0 + $0x410] sm:$0xff]  }
 0x82d   :  { %v3633_v3 = vpop.f32.mrf.mxu0  ;;  %v3665_v42 = vmax.f32 %v3525_v63, 0.0 }
 0x82e   :  { %v3694_v46 = vmax.f32 %v3642_v34, 0.0  ;;  %v3634_v1 = vadd.f32 %v7346_v50, %v3633_v3  ;;  %v3670_v3 = vmax.f32 %v3546_v61, 0.0  ;;  %v3684_v34 = vmax.f32 %v3602_v13, 0.0  ;;  %v6294_v61 = vld [vmem:[%s7796_s0 + $0x478] sm:$0xff]  }
 0x82f   :  { %v6038_v4 = vpop.f32.mrf.mxu0 }
 0x830   :  { %v3645_v14 = vadd.f32 %v7346_v50, %v6038_v4  ;;  %v3692_v15 = vmax.f32 %v3634_v1, 0.0  ;;  %v3669_v4 = vmax.f32 %v3541_v25, 0.0  ;;  %v3840_v25 = vld [vmem:[#allocation2 + $0x6] sm:$0x1] }
 0x831   :  { %v3636_v28 = vpop.f32.mrf.mxu0 }
 0x832   :  { %v3695_v2 = vmax.f32 %v3645_v14, 0.0  ;;  %v3637_v32 = vadd.f32 %v7346_v50, %v3636_v28  ;;  %v3683_v28 = vmax.f32 %v3597_v23, 0.0 }
 0x833   :  { %v6041_v22 = vpop.f32.mrf.mxu0 }
 0x834   :  { %5579 = vmatprep.subr.mxu1 %v3695_v2  ;;  %v3693_v26 = vmax.f32 %v3637_v32, 0.0  ;;  %v3667_v2 = vmax.f32 %v3533_v19, 0.0  ;;  %v3682_v32 = vmax.f32 %v3594_v11, 0.0  ;;  %v3658_v41 = vadd.f32 %v7346_v50, %v6041_v22 }
 0x835   :  { %5580 = vmatpush3.msra.mxu1 %v3679_v43  ;;  %v3649_v14 = vpop.f32.mrf.mxu0 }
 0x836   :  { %5581 = vmatprep.subr.mxu1 %v3694_v46  ;;  %v3681_v46 = vmax.f32 %v3589_v7, 0.0  ;;  %v3698_v18 = vmax.f32 %v3658_v41, 0.0  ;;  %v3650_v51 = vadd.f32 %v7346_v50, %v3649_v14 }
 0x837   :  { %5582 = vmatpush3.msra.mxu1 %v3678_v36  ;;  %v6042_v43 = vpop.f32.mrf.mxu0  ;;  %v3680_v36 = vmax.f32 %v3586_v39, 0.0 }
 0x838   :  { %5583 = vmatprep.subr.mxu1 %v3693_v26  ;;  %v3661_v1 = vadd.f32 %v7346_v50, %v6042_v43  ;;  %v3696_v57 = vmax.f32 %v3650_v51, 0.0 }
 0x839   :  { %5584 = vmatpush3.msra.mxu1 %v3677_v52  ;;  %v3652_v6 = vpop.f32.mrf.mxu0 }
 0x83a   :  { %5585 = vmatprep.subr.mxu1 %v3692_v15  ;;  %v3699_v21 = vmax.f32 %v3661_v1, 0.0  ;;  %v3653_v26 = vadd.f32 %v7346_v50, %v3652_v6  ;;  %v6277_v15 = vld [vmem:[%s7796_s0 + $0x3f0] sm:$0xff]  }
 0x83b   :  { %5586 = vmatpush3.msra.mxu1 %v3676_v62  ;;  %v6278_v62 = vld [vmem:[%s7796_s0 + $0x3f8] sm:$0xff]  }
 0x83c   :  { %5587 = vmatprep.subr.mxu1 %v3691_v38  ;;  %v3697_v52 = vmax.f32 %v3653_v26, 0.0  ;;  %v6279_v38 = vld [vmem:[%s7796_s0 + $0x400] sm:$0xff]  }
 0x83d   :  { %5588 = vmatpush3.msra.mxu1 %v3675_v35  ;;  %v6282_v35 = vld [vmem:[%s7796_s0 + $0x418] sm:$0xff]  }
 0x83e   :  { %5589 = vmatprep.subr.mxu1 %v3690_v47  ;;  %v6284_v47 = vld [vmem:[%s7796_s0 + $0x428] sm:$0xff]  }
 0x83f   :  { %5590 = vmatpush3.msra.mxu1 %v3674_v24  ;;  %v6286_v24 = vld [vmem:[%s7796_s0 + $0x438] sm:$0xff]  }
 0x840   :  { %5591 = vmatprep.subr.mxu1 %v3689_v10  ;;  %v6289_v10 = vld [vmem:[%s7796_s0 + $0x450] sm:$0xff]  }
 0x841   :  { %5592 = vmatpush3.msra.mxu1 %v3673_v45  ;;  %v6291_v45 = vld [vmem:[%s7796_s0 + $0x460] sm:$0xff]  }
 0x842   :  { %5593 = vmatprep.subr.mxu1 %v3688_v55  ;;  %v6293_v55 = vld [vmem:[%s7796_s0 + $0x470] sm:$0xff]  }
 0x843   :  { %5594 = vmatpush3.msra.mxu1 %v3672_v44 }
 0x844   :  { %5595 = vmatprep.subr.mxu1 %v3687_v27 }
 0x845   :  { %5596 = vmatpush3.msra.mxu1 %v3671_v59 }
 0x846   :  { %5597 = vmatprep.subr.mxu1 %v3686_v48 }
 0x847   :  { %5598 = vmatpush3.msra.mxu1 %v3670_v3 }
 0x848   :  { %5599 = vmatprep.subr.mxu1 %v3685_v60 }
 0x849   :  { %5600 = vmatpush3.msra.mxu1 %v3669_v4 }
 0x84a   :  { %5601 = vmatprep.subr.mxu1 %v3684_v34 }
 0x84b   :  { %5602 = vmatpush3.msra.mxu1 %v3668_v8 }
 0x84c   :  { %5603 = vmatprep.subr.mxu1 %v3683_v28 }
 0x84d   :  { %5604 = vmatpush3.msra.mxu1 %v3667_v2 }
 0x84e   :  { %5605 = vmatprep.subr.mxu1 %v3682_v32 }
 0x84f   :  { %5606 = vmatpush3.msra.mxu1 %v3666_v17 }
 0x850   :  { %5607 = vmatprep.subr.mxu1 %v3681_v46 }
 0x851   :  { %5608 = vmatpush3.msra.mxu1 %v3665_v42 }
 0x852   :  { %5609 = vmatprep.subr.mxu1 %v3680_v36 }
 0x853   :  { %5610 = vmatpush3.msra.mxu1 %v3664_v56 }
 0x854   :  { %3765 = vmatmul.mubr.f32.vlgmr.msra.gmra.mxu1 %v6476_v30  ;;  %6043 = vmatprep.subr.mxu1 %v6341_v31 }
 0x855   :  { %6044 = vmatpush3.msra.mxu1 %v3699_v21  ;;  %6051 = vmatprep.mubr.msk.f32.mxu1 %vm6342_vm3, %v6341_v31 }
 0x856   :  { %6045 = vmatprep.subr.mxu1 %v6341_v31 }
 0x857   :  { %6046 = vmatpush3.msra.mxu1 %v3698_v18 }
 0x858   :  { %6047 = vmatprep.subr.mxu1 %v6341_v31 }
 0x859   :  { %6048 = vmatpush3.msra.mxu1 %v3697_v52 }
 0x85a   :  { %6049 = vmatprep.subr.mxu1 %v6341_v31 }
 0x85b   :  { %6050 = vmatpush3.msra.mxu1 %v3696_v57 }
 0x85c   :  { %6052 = vmatmul.mubr.msk.f32.vlgmr.msra.gmra.mxu1 %vm475_vm4, %v6481_v33  ;;  %6054 = vmatprep.subr.bf16.mxu1 %v6395_v5 }
 0x85d   :  { %6055 = vmatpush3.bf16.msra.mxu1 %v6395_v5  ;;  %6058 = vmatprep.mubr.msk.bf16.mxu1 %vm185_vm2, %v6277_v15  ;;  %v6280_v5 = vld [vmem:[%s7796_s0 + $0x408] sm:$0xff]  }
 0x85e   :  { %6056 = vmatprep.subr.bf16.mxu1 %v6317_v37 }
 0x861   :  { %6057 = vmatpush3.bf16.msra.mxu1 %v6317_v37 }
 0x862   :  { %6125 = vmatprep.subr.bf16.mxu1 %v6341_v31 }
 0x864   :  { %6059 = vmatmul.mubr.msk.bf16.vlgmr.msra.gmra.mxu1 %vm185_vm2, %v6278_v62 }
 0x865   :  { %6062 = vmatprep.mubr.msk.bf16.mxu1 %vm185_vm2, %v6279_v38 }
 0x86c   :  { %6063 = vmatmul.mubr.msk.bf16.gmra.mxu1 %vm185_vm2, %v6280_v5 }
 0x86d   :  { %6066 = vmatprep.mubr.msk.bf16.mxu1 %vm185_vm2, %v6281_v20 }
 0x874   :  { %6067 = vmatmul.mubr.msk.bf16.gmra.mxu1 %vm185_vm2, %v6282_v35 }
 0x875   :  { %6070 = vmatprep.mubr.msk.bf16.mxu1 %vm185_vm2, %v6283_v49 }
 0x87c   :  { %6071 = vmatmul.mubr.msk.bf16.gmra.mxu1 %vm185_vm2, %v6284_v47 }
 0x87d   :  { %6074 = vmatprep.mubr.msk.bf16.mxu1 %vm185_vm2, %v6285_v9 }
 0x884   :  { %6075 = vmatmul.mubr.msk.bf16.gmra.mxu1 %vm185_vm2, %v6286_v24 }
 0x885   :  { %6078 = vmatprep.mubr.msk.bf16.mxu1 %vm185_vm2, %v6287_v54 }
 0x88c   :  { %6079 = vmatmul.mubr.msk.bf16.gmra.mxu1 %vm185_vm2, %v6288_v0 }
 0x88d   :  { %6082 = vmatprep.mubr.msk.bf16.mxu1 %vm185_vm2, %v6289_v10 }
 0x894   :  { %6083 = vmatmul.mubr.msk.bf16.gmra.mxu1 %vm185_vm2, %v6290_v40 }
 0x895   :  { %6086 = vmatprep.mubr.msk.bf16.mxu1 %vm185_vm2, %v6291_v45 }
 0x89c   :  { %6087 = vmatmul.mubr.msk.bf16.gmra.mxu1 %vm185_vm2, %v6292_v16 }
 0x89d   :  { %6090 = vmatprep.mubr.msk.bf16.mxu1 %vm185_vm2, %v6293_v55 }
 0x8a4   :  { %6091 = vmatmul.mubr.msk.bf16.gmra.mxu1 %vm185_vm2, %v6294_v61 }
 0x8a5   :  { %6141 = vmatprep.mubr.msk.bf16.mxu1 %vm6342_vm3, %v6341_v31 }
 0x914   :  { %v5611_v44 = vpop.f32.mrf.mxu1 }
 0x916   :  { %v5612_v27 = vpop.f32.mrf.mxu1 }
 0x917   :  { %v5613_v58 = vadd.f32 %v5612_v27, %v5611_v44 }
 0x91c   :  { %v3836_v59 = vpop.f32.mrf.mxu1 }
 0x91d   :  { %v3837_v48 = vadd.f32 %v5613_v58, %v3836_v59 }
 0x91e   :  { %v6053_v13 = vpop.f32.mrf.mxu1 }
 0x91f   :  { %v3841_v22 = vadd.f32 %v3840_v25, %v3837_v48 }
 0x921   :  { %3842 = vst [vmem:[#allocation2 + $0x6] sm:$0x1] %v3841_v22 }
 0x924   :  { %v7638_v3 = vpop.f32.mrf.mxu1 }
 0x926   :  { %v7640_v53 = vpop.f32.mrf.mxu1 }
 0x928   :  { %v7642_v23 = vpop.f32.mrf.mxu1 }
 0x92a   :  { %v7644_v60 = vpop.f32.mrf.mxu1 }
 0x92c   :  { %v7646_v19 = vpop.f32.mrf.mxu1 }
 0x92e   :  { %v7648_v4 = vpop.f32.mrf.mxu1 }
 0x930   :  { %v7650_v11 = vpop.f32.mrf.mxu1 }
 0x932   :  { %v7652_v34 = vpop.f32.mrf.mxu1 }
 0x934   :  { %v6068_v14 = vpop.f32.mrf.mxu1 }
 0x935   :  { %v4099_v55 = vadd.f32 %v7346_v50, %v6068_v14 }
 0x936   :  { %v4090_v29 = vpop.f32.mrf.mxu1 }
 0x937   :  { %v4211_v13 = vmax.f32 %v4099_v55, 0.0  ;;  %v4091_v22 = vadd.f32 %v7346_v50, %v4090_v29  ;;  %v6300_v55 = vld [vmem:[%s7800_s4 + $0x10] sm:$0xff]  }
 0x938   :  { %v6069_v8 = vpop.f32.mrf.mxu1 }
 0x939   :  { %v4102_v10 = vadd.f32 %v7346_v50, %v6069_v8 }
 0x93a   :  { %v4093_v28 = vpop.f32.mrf.mxu1 }
 0x93b   :  { %v4212_v58 = vmax.f32 %v4102_v10, 0.0  ;;  %v4094_v59 = vadd.f32 %v7346_v50, %v4093_v28 }
 0x93c   :  { %v6072_v7 = vpop.f32.mrf.mxu1 }
 0x93d   :  { %v4115_v37 = vadd.f32 %v7346_v50, %v6072_v7  ;;  %v4086_v7 = vadd.f32 %v7346_v50, %v7650_v11 }
 0x93e   :  { %v4106_v2 = vpop.f32.mrf.mxu1 }
 0x93f   :  { %v4215_v9 = vmax.f32 %v4115_v37, 0.0  ;;  %v4107_v24 = vadd.f32 %v7346_v50, %v4106_v2  ;;  %v4210_v2 = vmax.f32 %v4094_v59, 0.0  ;;  %v6305_v59 = vld [vmem:[%s7802_s6 + $0x28] sm:$0xff]  }
 0x940   :  { %v6073_v63 = vpop.f32.mrf.mxu1 }
 0x941   :  { %v4118_v51 = vadd.f32 %v7346_v50, %v6073_v63  ;;  %v4213_v61 = vmax.f32 %v4107_v24, 0.0 }
 0x942   :  { %v4109_v32 = vpop.f32.mrf.mxu1 }
 0x943   :  { %v4216_v20 = vmax.f32 %v4118_v51, 0.0  ;;  %v4110_v35 = vadd.f32 %v7346_v50, %v4109_v32  ;;  %v4083_v32 = vadd.f32 %v7346_v50, %v7646_v19  ;;  %v4075_v19 = vadd.f32 %v7346_v50, %v7648_v4 }
 0x944   :  { %v7654_v39 = vpop.f32.mrf.mxu1  ;;  %v4067_v4 = vadd.f32 %v7346_v50, %v7638_v3  ;;  %v4059_v3 = vadd.f32 %v7346_v50, %v7640_v53 }
 0x945   :  { %v4214_v40 = vmax.f32 %v4110_v35, 0.0 }
 0x946   :  { %v7656_v43 = vpop.f32.mrf.mxu1 }
 0x948   :  { %v7658_v17 = vpop.f32.mrf.mxu1 }
 0x94a   :  { %v7660_v12 = vpop.f32.mrf.mxu1 }
 0x94c   :  { %v6080_v46 = vpop.f32.mrf.mxu1 }
 0x94d   :  { %v4147_v28 = vadd.f32 %v7346_v50, %v6080_v46 }
 0x94e   :  { %v7662_v42 = vpop.f32.mrf.mxu1 }
 0x94f   :  { %v4223_v11 = vmax.f32 %v4147_v28, 0.0  ;;  %v4139_v46 = vadd.f32 %v7346_v50, %v7662_v42  ;;  %v4131_v42 = vadd.f32 %v7346_v50, %v7654_v39  ;;  %v4123_v39 = vadd.f32 %v7346_v50, %v7656_v43 }
 0x950   :  { %v6081_v1 = vpop.f32.mrf.mxu1 }
 0x951   :  { %v4150_v14 = vadd.f32 %v7346_v50, %v6081_v1  ;;  %v4208_v1 = vmax.f32 %v4086_v7, 0.0 }
 0x952   :  { %v4141_v36 = vpop.f32.mrf.mxu1 }
 0x953   :  { %v4224_v29 = vmax.f32 %v4150_v14, 0.0 }
 0x954   :  { %v6084_v6 = vpop.f32.mrf.mxu1 }
 0x955   :  { %v4163_v45 = vadd.f32 %v7346_v50, %v6084_v6  ;;  %v4209_v6 = vmax.f32 %v4091_v22, 0.0 }
 0x956   :  { %v4154_v56 = vpop.f32.mrf.mxu1 }
 0x957   :  { %v4227_v25 = vmax.f32 %v4163_v45, 0.0  ;;  %v4155_v48 = vadd.f32 %v7346_v50, %v4154_v56  ;;  %v4142_v56 = vadd.f32 %v7346_v50, %v4141_v36  ;;  %v4134_v36 = vadd.f32 %v7346_v50, %v7658_v17  ;;  %v6295_v45 = vld [vmem:[%s7800_s4 + $0x38] sm:$0xff]  }
 0x958   :  { %v6085_v41 = vpop.f32.mrf.mxu1  ;;  %v4126_v17 = vadd.f32 %v7346_v50, %v7660_v12 }
 0x959   :  { %v4166_v54 = vadd.f32 %v7346_v50, %v6085_v41  ;;  %v4225_v63 = vmax.f32 %v4155_v48, 0.0  ;;  %v4078_v41 = vadd.f32 %v7346_v50, %v7652_v34  ;;  %v4070_v34 = vadd.f32 %v7346_v50, %v7642_v23  ;;  %v6307_v48 = vld [vmem:[%s7802_s6 + $0x18] sm:$0xff]  }
 0x95a   :  { %v4157_v21 = vpop.f32.mrf.mxu1  ;;  %v4220_v37 = vmax.f32 %v4134_v36, 0.0  ;;  %v4062_v23 = vadd.f32 %v7346_v50, %v7644_v60  ;;  %v4218_v35 = vmax.f32 %v4126_v17, 0.0 }
 0x95b   :  { %v4228_v44 = vmax.f32 %v4166_v54, 0.0  ;;  %v4158_v27 = vadd.f32 %v7346_v50, %v4157_v21  ;;  %v4206_v51 = vmax.f32 %v4078_v41, 0.0  ;;  %v5181_v41 = vld [vmem:[%s7801_s5] ss:$0 sm:$0xff]  ;;  %s6343_s5 = smov [#allocation3]  }
 0x95c   :  { %v6088_v26 = vpop.f32.mrf.mxu1  ;;  %v4202_v12 = vmax.f32 %v4062_v23, 0.0 }
 0x95d   :  { %v4179_v57 = vadd.f32 %v7346_v50, %v6088_v26  ;;  %v4226_v8 = vmax.f32 %v4158_v27, 0.0  ;;  %v4207_v26 = vmax.f32 %v4083_v32, 0.0  ;;  %v6303_v27 = vld [vmem:[%s7802_s6 + $0x38] sm:$0xff]  }
 0x95e   :  { %v4170_v18 = vpop.f32.mrf.mxu1  ;;  %6126 = vmatpush3.bf16.msra.mxu1 %v6303_v27 }
 0x95f   :  { %v4231_v49 = vmax.f32 %v4179_v57, 0.0  ;;  %v4171_v47 = vadd.f32 %v7346_v50, %v4170_v18  ;;  %v4222_v18 = vmax.f32 %v4142_v56, 0.0  ;;  %6127 = vmatprep.subr.bf16.mxu1 %v6341_v31  ;;  %v6309_v56 = vld [vmem:[%s7802_s6 + $0x8] sm:$0xff]  }
 0x960   :  { %v6089_v52 = vpop.f32.mrf.mxu1 }
 0x961   :  { %v4182_v15 = vadd.f32 %v7346_v50, %v6089_v52  ;;  %v4229_v16 = vmax.f32 %v4171_v47, 0.0  ;;  %v4221_v52 = vmax.f32 %v4139_v46, 0.0  ;;  %v4217_v47 = vmax.f32 %v4123_v39, 0.0 }
 0x962   :  { %v4173_v62 = vpop.f32.mrf.mxu1 }
 0x963   :  { %v4232_v38 = vmax.f32 %v4182_v15, 0.0  ;;  %v4174_v5 = vadd.f32 %v7346_v50, %v4173_v62  ;;  %v4205_v15 = vmax.f32 %v4075_v19, 0.0  ;;  %v4204_v62 = vmax.f32 %v4070_v34, 0.0 }
 0x964   :  { %v6092_v21 = vpop.f32.mrf.mxu1 }
 0x965   :  { %5639 = vmatprep.subr.mxu0 %v4232_v38  ;;  %v4230_v0 = vmax.f32 %v4174_v5, 0.0  ;;  %v4219_v38 = vmax.f32 %v4131_v42, 0.0  ;;  %v4195_v24 = vadd.f32 %v7346_v50, %v6092_v21 }
 0x966   :  { %5640 = vmatpush3.msra.mxu0 %v4216_v20  ;;  %v4186_v57 = vpop.f32.mrf.mxu1  ;;  %v4203_v20 = vmax.f32 %v4067_v4, 0.0 }
 0x967   :  { %5641 = vmatprep.subr.mxu0 %v4231_v49  ;;  %v4235_v53 = vmax.f32 %v4195_v24, 0.0 }
 0x968   :  { %5642 = vmatpush3.msra.mxu0 %v4215_v9  ;;  %v6093_v5 = vpop.f32.mrf.mxu1  ;;  %v4201_v9 = vmax.f32 %v4059_v3, 0.0 }
 0x969   :  { %5643 = vmatprep.subr.mxu0 %v4230_v0  ;;  %v4198_v49 = vadd.f32 %v7346_v50, %v6093_v5  ;;  %v4187_v0 = vadd.f32 %v7346_v50, %v4186_v57 }
 0x96a   :  { %5644 = vmatpush3.msra.mxu0 %v4214_v40  ;;  %v4189_v60 = vpop.f32.mrf.mxu1 }
 0x96b   :  { %5645 = vmatprep.subr.mxu0 %v4229_v16  ;;  %v4236_v43 = vmax.f32 %v4198_v49, 0.0  ;;  %v4190_v54 = vadd.f32 %v7346_v50, %v4189_v60  ;;  %v4233_v40 = vmax.f32 %v4187_v0, 0.0  ;;  %v6297_v50 = vld [vmem:[%s7800_s4 + $0x28] sm:$0xff]   ;;  %v6299_v16 = vld [vmem:[%s7800_s4 + $0x18] sm:$0xff]  }
 0x96c   :  { %5646 = vmatpush3.msra.mxu0 %v4213_v61  ;;  %v6301_v61 = vld [vmem:[%s7800_s4 + $0x8] sm:$0xff]  }
 0x96d   :  { %5647 = vmatprep.subr.mxu0 %v4228_v44  ;;  %v4234_v10 = vmax.f32 %v4190_v54, 0.0  ;;  %v6302_v44 = vld [vmem:[%s7800_s4] sm:$0xff]  }
 0x96e   :  { %5648 = vmatpush3.msra.mxu0 %v4212_v58  ;;  %v6304_v58 = vld [vmem:[%s7802_s6 + $0x30] sm:$0xff]  }
 0x96f   :  { %5649 = vmatprep.subr.mxu0 %v4227_v25  ;;  %6128 = vmatpush3.bf16.msra.mxu1 %v6304_v58  ;;  %v6306_v25 = vld [vmem:[%s7802_s6 + $0x20] sm:$0xff]  }
 0x970   :  { %5650 = vmatpush3.msra.mxu0 %v4211_v13  ;;  %6129 = vmatprep.subr.bf16.mxu1 %v6341_v31  ;;  %v6308_v13 = vld [vmem:[%s7802_s6 + $0x10] sm:$0xff]  }
 0x971   :  { %5651 = vmatprep.subr.mxu0 %v4226_v8 }
 0x972   :  { %5652 = vmatpush3.msra.mxu0 %v4210_v2  ;;  %v4377_v2 = vld [vmem:[#allocation2 + $0x7] sm:$0x1] }
 0x973   :  { %5653 = vmatprep.subr.mxu0 %v4225_v63  ;;  %6130 = vmatpush3.bf16.msra.mxu1 %v6305_v59 }
 0x974   :  { %5654 = vmatpush3.msra.mxu0 %v4209_v6  ;;  %6131 = vmatprep.subr.bf16.mxu1 %v6341_v31 }
 0x975   :  { %5655 = vmatprep.subr.mxu0 %v4224_v29 }
 0x976   :  { %5656 = vmatpush3.msra.mxu0 %v4208_v1  ;;  %v6310_v1 = vld [vmem:[%s7802_s6] sm:$0xff]   ;;  %s4622_s6 = sshll.u32 %s6343_s5, 4  ;;  %s4623_s6 = int_to_ptr.vmem [resolvable:$true] %s4622_s6 }
 0x977   :  { %5657 = vmatprep.subr.mxu0 %v4223_v11  ;;  %6132 = vmatpush3.bf16.msra.mxu1 %v6306_v25  ;;  %s6318_s15 = scalar_lea.vmem %s4623_s6, 128  ;;  %p6323_p1 = scmp.lt.s32.totalorder %s4623_s6, %s4623_s6 }
 0x978   :  { %5658 = vmatpush3.msra.mxu0 %v4207_v26  ;;  %6133 = vmatprep.subr.bf16.mxu1 %v6341_v31  ;;  %p6319_p0 = scmp.ne.s32.totalorder %s4623_s6, %s6318_s15  ;;  %p6324_p2 = scmp.lt.s32.totalorder %s6318_s15, %s6318_s15 }
 0x979   :  { %5659 = vmatprep.subr.mxu0 %v4222_v18 }
 0x97a   :  { %5660 = vmatpush3.msra.mxu0 %v4206_v51  ;;  %p6325_p3 = por %p6324_p2, %p6323_p1 }
 0x97b   :  { %5661 = vmatprep.subr.mxu0 %v4221_v52  ;;  %6134 = vmatpush3.bf16.msra.mxu1 %v6307_v48 }
 0x97c   :  { %5662 = vmatpush3.msra.mxu0 %v4205_v15  ;;  %6135 = vmatprep.subr.bf16.mxu1 %v6341_v31  ;;  %p6326_p4 = pnand %p6325_p3, %p6319_p0 }
 0x97d   :  { %5663 = vmatprep.subr.mxu0 %v4220_v37 }
 0x97e   :  { %5664 = vmatpush3.msra.mxu0 %v4204_v62 }
 0x97f   :  { %5665 = vmatprep.subr.mxu0 %v4219_v38  ;;  %6136 = vmatpush3.bf16.msra.mxu1 %v6308_v13 }
 0x980   :  { %5666 = vmatpush3.msra.mxu0 %v4203_v20  ;;  %6137 = vmatprep.subr.bf16.mxu1 %v6341_v31 }
 0x981   :  { %5667 = vmatprep.subr.mxu0 %v4218_v35 }
 0x982   :  { %5668 = vmatpush3.msra.mxu0 %v4202_v12 }
 0x983   :  { %5669 = vmatprep.subr.mxu0 %v4217_v47  ;;  %6138 = vmatpush3.bf16.msra.mxu1 %v6309_v56 }
 0x984   :  { %5670 = vmatpush3.msra.mxu0 %v4201_v9  ;;  %6139 = vmatprep.subr.bf16.mxu1 %v6341_v31 }
 0x985   :  { %6094 = vmatprep.subr.mxu0 %v6341_v31  ;;  %4302 = vmatmul.mubr.f32.vlgmr.msra.gmra.mxu0 %v6476_v30  ;;  %v6296_v30 = vld [vmem:[%s7800_s4 + $0x30] sm:$0xff]  }
 0x986   :  { %6095 = vmatpush3.msra.mxu0 %v4236_v43  ;;  %6102 = vmatprep.mubr.msk.f32.mxu0 %vm6342_vm3, %v6341_v31 }
 0x987   :  { %6096 = vmatprep.subr.mxu0 %v6341_v31  ;;  %6140 = vmatpush3.bf16.msra.mxu1 %v6310_v1 }
 0x988   :  { %6097 = vmatpush3.msra.mxu0 %v4235_v53 }
 0x989   :  { %6098 = vmatprep.subr.mxu0 %v6341_v31 }
 0x98a   :  { %6099 = vmatpush3.msra.mxu0 %v4234_v10 }
 0x98b   :  { %6100 = vmatprep.subr.mxu0 %v6341_v31 }
 0x98c   :  { %6101 = vmatpush3.msra.mxu0 %v4233_v40 }
 0x98d   :  { %6103 = vmatmul.mubr.msk.f32.vlgmr.msra.gmra.mxu0 %vm475_vm4, %v6481_v33  ;;  %6105 = vmatprep.subr.bf16.mxu0 %v6341_v31  ;;  %v6298_v33 = vld [vmem:[%s7800_s4 + $0x20] sm:$0xff]  }
 0x98e   :  { %6106 = vmatpush3.bf16.msra.mxu0 %v6295_v45  ;;  %6121 = vmatprep.mubr.msk.bf16.mxu0 %vm6342_vm3, %v6341_v31 }
 0x98f   :  { %6107 = vmatprep.subr.bf16.mxu0 %v6341_v31 }
 0x992   :  { %6108 = vmatpush3.bf16.msra.mxu0 %v6296_v30 }
 0x993   :  { %6109 = vmatprep.subr.bf16.mxu0 %v6341_v31 }
 0x996   :  { %6110 = vmatpush3.bf16.msra.mxu0 %v6297_v50 }
 0x997   :  { %6111 = vmatprep.subr.bf16.mxu0 %v6341_v31 }
 0x99a   :  { %6112 = vmatpush3.bf16.msra.mxu0 %v6298_v33 }
 0x99b   :  { %6113 = vmatprep.subr.bf16.mxu0 %v6341_v31 }
 0x99e   :  { %6114 = vmatpush3.bf16.msra.mxu0 %v6299_v16 }
 0x99f   :  { %6115 = vmatprep.subr.bf16.mxu0 %v6341_v31 }
 0x9a2   :  { %6116 = vmatpush3.bf16.msra.mxu0 %v6300_v55 }
 0x9a3   :  { %6117 = vmatprep.subr.bf16.mxu0 %v6341_v31 }
 0x9a6   :  { %6118 = vmatpush3.bf16.msra.mxu0 %v6301_v61 }
 0x9a7   :  { %6119 = vmatprep.subr.bf16.mxu0 %v6341_v31  ;;  %v5190_v31 = vld [vmem:[%s7803_s7] ss:$0 sm:$0xff] }
 0x9aa   :  { %6120 = vmatpush3.bf16.msra.mxu0 %v6302_v44 }
 0xa45   :  { %v5671_v22 = vpop.f32.mrf.mxu0 }
 0xa47   :  { %v5672_v14 = vpop.f32.mrf.mxu0 }
 0xa48   :  { %v5673_v8 = vadd.f32 %v5672_v14, %v5671_v22 }
 0xa4d   :  { %v4373_v7 = vpop.f32.mrf.mxu0 }
 0xa4e   :  { %v4374_v28 = vadd.f32 %v5673_v8, %v4373_v7 }
 0xa4f   :  { %v6104_v63 = vpop.f32.mrf.mxu0 }
 0xa50   :  { %v4378_v32 = vadd.f32 %v4377_v2, %v4374_v28 }
 0xa52   :  { %4379 = vst [vmem:[#allocation2 + $0x7] sm:$0x1] %v4378_v32 }
 0xa59   :  { %v4383_v6 = vld [vmem:[#allocation2] sm:$0xff] }
 0xa5a   :  { %v4384_v29 = vpack.c.bf16 %v4383_v6, %v4383_v6 }
 0xa5c   :  { %6122 = vmatmul.mubr.bf16.vlgmr.msra.gmra.mxu0 %v4384_v29 }
 0xb1c   :  { %v4490_v11 = vpop.f32.mrf.mxu0 }
 0xb1d   :  { %v4491_v46 = vadd.f32 %v5181_v41, %v4490_v11 }
 0xb1e   :  { %v6123_v21 = vpop.f32.mrf.mxu0 }
 0xb1f   :  { %v4496_v26 = vmax.f32 %v4491_v46, 0.0 }
 0xb20   :  { %v4493_v19 = vpop.f32.mrf.mxu0 }
 0xb21   :  { %v4497_v36 = vpack.c.bf16 %v4496_v26, %v4496_v26 }
 0xb22   :  { %v6124_v18 = vpop.f32.mrf.mxu0 }
 0xb23   :  { %6142 = vmatmul.mubr.bf16.vlgmr.msra.gmra.mxu1 %v4497_v36 }
 0xbe3   :  { %v4603_v34 = vpop.f32.mrf.mxu1 }
 0xbe4   :  { %v4604_v51 = vadd.f32 %v5190_v31, %v4603_v34 }
 0xbe5   :  { %v6143_v42 = vpop.f32.mrf.mxu1 }
 0xbe6   :  { %v4609_v52 = vmul.f32 %v4604_v51, %v4604_v51 }
 0xbe7   :  { %v4606_v57 = vpop.f32.mrf.mxu1 }
 0xbe8   :  { %4610 = vadd.xlane.f32.xlu0 %v4609_v52 }
 0xbe9   :  { %v6144_v4 = vpop.f32.mrf.mxu1 }
 0xc71   :  { %v4611_v15 = vpop.xlane.xlu0 %4610 }
 0xc72   :  { %v4612_v37 = vmax.f32 %v4611_v15, 1e-24 }
 0xc74   :  { %6311 = vrsqrt.f32 %v4612_v37 }
 0xc81   :  { %v6312_v17 = vpop.eup %6311 }
 0xc82   :  { %v4614_v62 = vmul.f32 %v6312_v17, %v4604_v51 }
 0xc84   :  { %4615 = vst [vmem:[#allocation3] sm:$0xff] %v4614_v62 }
 0xc85   :  { %6329 = shalt.err (!%p6326_p4)
}
 0xc86   :  { %4625 = dma.vmem_to_hbm [thread:$0]  %s4623_s6, 128, %s7804_s8, [#allocation4]  }
 0xc87   :  { %6338 = dma.done.wait [#allocation4], 128  }
 0xc88   :  { %6339 = vsyncadd [#allocation4], 4294967168 }
 0xc89   :  { %4629 = vsyncpa [#allocation4], 1 }

</bundles_post_ra>
